<compile_context>
chip_gen: v7x
topology: tpu7x:2x2x1
jax: 0.10.0
libtpu: 0.0.40
codegen_flags: <defaults>
</compile_context>

<pallas_src>
import functools

import jax
import jax.numpy as jnp
from jax.experimental import pallas as pl
from jax.experimental.pallas import tpu as pltpu


# ---------------------------------------------------------------------------
# Fused Conv2d(4x4, stride 1|2, pad 1) [+ bias, + InstanceNorm, + LeakyReLU]
# ---------------------------------------------------------------------------
def _conv_kernel(x_ref, w_ref, b_ref, o_ref, acc_ref, *,
                 n_row_taps, n_col_taps, th, wf, wo, cout,
                 apply_lrelu, apply_in, slope, eps):
    """One (batch, row-tile) grid step.

    x_ref : (1, Hr*Wf, Cf)  bf16  resident padded/folded image (flat rows)
    w_ref : (n_row_taps, Cf, n_col_taps*Cout) bf16
    b_ref : (1, Cout) f32
    o_ref : (1, th, wo, cout)
    acc_ref: (th, wo, cout) f32 scratch accumulator
    """
    ti = pl.program_id(1)
    base = ti * th
    acc_ref[...] = jnp.zeros_like(acc_ref)

    for rt in range(n_row_taps):                      # 2 (stride-2) or 4 (stride-1)
        start = pl.multiple_of((base + rt) * wf, 8)   # wf % 8 == 0
        lhs = x_ref[0, pl.ds(start, th * wf), :]      # (th*wf, Cf) bf16
        y = jnp.dot(lhs, w_ref[rt],
                    preferred_element_type=jnp.float32)   # (th*wf, nct*cout)
        y = y.reshape(th, wf, n_col_taps * cout)      # layout-preserving (wf%8==0)
        contrib = y[:, 0:wo, 0:cout]
        for ct in range(1, n_col_taps):
            contrib = contrib + y[:, ct:ct + wo, ct * cout:(ct + 1) * cout]
        acc_ref[...] += contrib

    acc = acc_ref[...] + b_ref[...].astype(jnp.float32)    # (th, wo, cout)

    if apply_in:
        # Two-pass mean / biased variance over the whole (Ho, Wo) tile per channel.
        inv_n = 1.0 / (th * wo)
        mean = jnp.sum(jnp.sum(acc, axis=0, keepdims=True),
                       axis=1, keepdims=True) * inv_n      # (1,1,cout)
        cen = acc - mean
        var = jnp.sum(jnp.sum(cen * cen, axis=0, keepdims=True),
                      axis=1, keepdims=True) * inv_n
        acc = cen * jax.lax.rsqrt(var + eps)
    if apply_in or apply_lrelu:
        acc = jnp.where(acc >= 0, acc, slope * acc)

    o_ref[0] = acc.astype(o_ref.dtype)


def _vmem_footprint(shape, dtype):
    """Rough VMEM bytes for one buffer: pad lanes to 128, sublanes to tile height."""
    itemsize = jnp.dtype(dtype).itemsize
    lanes = -(-shape[-1] // 128) * 128
    sub_mult = 8 if itemsize >= 4 else (16 if itemsize == 2 else 32)
    rows = shape[-2] if len(shape) >= 2 else 1
    rows = -(-rows // sub_mult) * sub_mult
    lead = 1
    for d in shape[:-2]:
        lead *= d
    return lead * rows * lanes * itemsize


def conv_block_pallas(x, w_hwio, b, *, stride, apply_lrelu=False, apply_in=False,
                      out_dtype=jnp.bfloat16, slope=0.2, eps=1e-5, max_rows=8):
    """x: (B,H,W,Cin) NHWC, w_hwio: (4,4,Cin,Cout), b: (Cout,).  Returns NHWC."""
    B, H, W, Cin = x.shape
    KH, KW, _, Cout = w_hwio.shape
    assert (KH, KW) == (4, 4) and stride in (1, 2)
    pad = 1
    Ho = (H + 2 * pad - KH) // stride + 1
    Wo = (W + 2 * pad - KW) // stride + 1
    assert Ho > 0 and Wo > 0

    # InstanceNorm needs whole-image statistics -> single row tile covering Ho.
    TH = Ho if apply_in else min(max_rows, Ho)
    grid_t = 1 if apply_in else pl.cdiv(Ho, TH)

    x_bf = x.astype(jnp.bfloat16)
    w_bf = w_hwio.astype(jnp.bfloat16)

    if stride == 2:
        # Fold both H and W even/odd phases into channels (one fused pad+copy).
        n_row_taps, n_col_taps = 2, 2
        Hp = H + 2 * pad
        Hp += Hp % 2                                   # even -> foldable
        Hr = Hp // 2
        need = grid_t * TH + n_row_taps - 1
        if need > Hr:                                  # cdiv overhang -> extra zero rows
            Hr = need
            Hp = 2 * Hr
        Wp = W + 2 * pad
        Wp += (-Wp) % 16                               # folded width multiple of 8
        Wf = Wp // 2
        Cf = 4 * Cin
        xp = jnp.pad(x_bf, ((0, 0), (pad, Hp - H - pad), (pad, Wp - W - pad), (0, 0)))
        x_in = (xp.reshape(B, Hr, 2, Wf, 2, Cin)
                  .transpose(0, 1, 3, 2, 4, 5)
                  .reshape(B, Hr * Wf, Cf))
        w_taps = []
        for dh in range(2):
            blk = w_bf[2 * dh:2 * dh + 2]              # (hp, kw, Cin, Cout)
            cols = [blk[:, 2 * dw:2 * dw + 2].reshape(4 * Cin, Cout)
                    for dw in range(2)]
            w_taps.append(jnp.concatenate(cols, axis=1))    # (4Cin, 2Cout)
        w_mat = jnp.stack(w_taps)                      # (2, 4Cin, 2Cout)
    else:
        n_row_taps, n_col_taps = KH, KW
        Hp = H + 2 * pad
        need = grid_t * TH + n_row_taps - 1
        if need > Hp:
            Hp = need
        Hr = Hp
        Wp = W + 2 * pad
        Wp += (-Wp) % 8
        Wf = Wp
        Cf = Cin
        xp = jnp.pad(x_bf, ((0, 0), (pad, Hp - H - pad), (pad, Wp - W - pad), (0, 0)))
        x_in = xp.reshape(B, Hr * Wf, Cf)
        w_mat = jnp.stack([jnp.concatenate([w_bf[kh, kw] for kw in range(KW)], axis=1)
                           for kh in range(KH)])       # (4, Cin, 4Cout)

    b_mat = b.astype(jnp.float32).reshape(1, Cout)
    kdim = w_mat.shape[1]
    ncat = n_col_taps * Cout
    out_isize = jnp.dtype(out_dtype).itemsize

    kernel = functools.partial(
        _conv_kernel, n_row_taps=n_row_taps, n_col_taps=n_col_taps,
        th=TH, wf=Wf, wo=Wo, cout=Cout,
        apply_lrelu=apply_lrelu, apply_in=apply_in, slope=slope, eps=eps)

    flops = 2 * B * Ho * Wo * Cout * KH * KW * Cin
    bytes_accessed = (x_in.size * 2 + w_mat.size * 2 + b_mat.size * 4
                      + B * Ho * Wo * Cout * out_isize)

    # VMEM budget from actual (lane-padded) block footprints + headroom,
    # capped to v7x's 64 MiB per TensorCore.
    vmem_bytes = (2 * _vmem_footprint((1, Hr * Wf, Cf), jnp.bfloat16)
                  + 2 * _vmem_footprint((n_row_taps, kdim, ncat), jnp.bfloat16)
                  + 2 * _vmem_footprint((1, Cout), jnp.float32)
                  + 2 * _vmem_footprint((1, TH, Wo, Cout), out_dtype)
                  + _vmem_footprint((TH, Wo, Cout), jnp.float32)
                  + 2 * _vmem_footprint((TH * Wf, ncat), jnp.float32))
    vmem_limit = int(min(max(vmem_bytes + (8 << 20), 16 << 20), 64 << 20))

    out = pl.pallas_call(
        kernel,
        out_shape=jax.ShapeDtypeStruct((B, Ho, Wo, Cout), out_dtype),
        grid=(B, grid_t),
        in_specs=[
            # whole padded/folded image of batch bi, resident across row tiles
            pl.BlockSpec((1, Hr * Wf, Cf), lambda bi, ti: (bi, 0, 0)),
            pl.BlockSpec((n_row_taps, kdim, ncat), lambda bi, ti: (0, 0, 0)),
            pl.BlockSpec((1, Cout), lambda bi, ti: (0, 0)),
        ],
        out_specs=pl.BlockSpec((1, TH, Wo, Cout), lambda bi, ti: (bi, ti, 0, 0)),
        scratch_shapes=[pltpu.VMEM((TH, Wo, Cout), jnp.float32)],
        compiler_params=pltpu.CompilerParams(
            dimension_semantics=("parallel", "parallel"),
            vmem_limit_bytes=vmem_limit),
        cost_estimate=pl.CostEstimate(
            flops=flops,
            transcendentals=(B * Cout if apply_in else 0),
            bytes_accessed=bytes_accessed),
    )(x_in, w_mat, b_mat)
    return out


# ---------------------------------------------------------------------------
# PathDiscriminator
# ---------------------------------------------------------------------------
def init_params(key, in_channels, out_channels, channels):
    specs = [
        (in_channels, channels),
        (channels, channels * 2),
        (channels * 2, channels * 4),
        (channels * 4, channels * 8),
        (channels * 8, out_channels),
    ]
    params = []
    for cin, cout in specs:
        key, k1, k2 = jax.random.split(key, 3)
        fan_in = cin * 4 * 4
        bound = 1.0 / (fan_in ** 0.5)
        w = jax.random.uniform(k1, (4, 4, cin, cout), jnp.float32, -bound, bound)
        b = jax.random.uniform(k2, (cout,), jnp.float32, -bound, bound)
        params.append((w, b))
    return params


def path_discriminator_forward(x_nchw, params):
    x = jnp.transpose(x_nchw, (0, 2, 3, 1))                  # NCHW -> NHWC
    (w1, b1), (w2, b2), (w3, b3), (w4, b4), (w5, b5) = params
    x = conv_block_pallas(x, w1, b1, stride=2, apply_lrelu=True)
    x = conv_block_pallas(x, w2, b2, stride=2, apply_in=True)   # conv+IN+LeakyReLU fused
    x = conv_block_pallas(x, w3, b3, stride=2, apply_in=True)
    x = conv_block_pallas(x, w4, b4, stride=1, apply_in=True)
    x = conv_block_pallas(x, w5, b5, stride=1, out_dtype=jnp.float32)
    return jnp.transpose(x, (0, 3, 1, 2))                    # NHWC -> NCHW


# Pure-JAX f32 reference for correctness check.
def _ref_forward(x_nchw, params):
    def conv(x, w, b, stride, pad):
        y = jax.lax.conv_general_dilated(
            x, w, (stride, stride), ((pad, pad), (pad, pad)),
            dimension_numbers=("NHWC", "HWIO", "NHWC"))
        return y + b

    def lrelu(x):
        return jnp.where(x >= 0, x, 0.2 * x)

    def inorm(x):
        m = jnp.mean(x, axis=(1, 2), keepdims=True)
        v = jnp.mean((x - m) ** 2, axis=(1, 2), keepdims=True)
        return (x - m) / jnp.sqrt(v + 1e-5)

    x = jnp.transpose(x_nchw, (0, 2, 3, 1))
    (w1, b1), (w2, b2), (w3, b3), (w4, b4), (w5, b5) = params
    x = lrelu(conv(x, w1, b1, 2, 1))
    x = lrelu(inorm(conv(x, w2, b2, 2, 1)))
    x = lrelu(inorm(conv(x, w3, b3, 2, 1)))
    x = lrelu(inorm(conv(x, w4, b4, 1, 1)))
    x = conv(x, w5, b5, 1, 1)
    return jnp.transpose(x, (0, 3, 1, 2))


if __name__ == "__main__":
    key = jax.random.PRNGKey(0)
    k_in, k_params = jax.random.split(key)

    B, IN_CH, OUT_CH, CH, S = 2, 4, 1, 8, 32   # 32px survives the 5-conv stack
    x = jax.random.normal(k_in, (B, IN_CH, S, S), jnp.float32)   # NCHW input
    params = init_params(k_params, IN_CH, OUT_CH, CH)

    fwd = jax.jit(path_discriminator_forward)
    out = jax.block_until_ready(fwd(x, params))

    ref = jax.block_until_ready(_ref_forward(x, params))
    assert out.shape == (B, OUT_CH, 2, 2), out.shape
    # bf16 activations/weights end-to-end (f32 accumulation & statistics):
    # expect ~1% deviation from the pure-f32 reference after 5 layers.
    assert jnp.allclose(out, ref, rtol=3e-2, atol=3e-2), "mismatch vs JAX reference"

    print("KERNEL_OK")
</pallas_src>

<mosaic_0001>
module attributes {stable_mosaic.version = 11 : i64} {
  func.func @_conv_kernel(%arg0: i32, %arg1: i32, %arg2: memref<1x408x16xbf16, #tpu.memory_space<vmem>>, %arg3: memref<2x16x16xbf16, #tpu.memory_space<vmem>>, %arg4: memref<1x8xf32, #tpu.memory_space<vmem>>, %arg5: memref<1x8x16x8xbf16, #tpu.memory_space<vmem>>, %arg6: memref<8x16x8xf32, #tpu.memory_space<vmem>>) attributes {dimension_semantics = [#tpu.dimension_semantics<parallel>, #tpu.dimension_semantics<parallel>], iteration_bounds = array<i64: 2, 2>, scalar_prefetch = 0 : i64, scratch_operands = 1 : i64, tpu.core_type = #tpu.core_type<tc>, window_params = [{transform_indices = @transform_0, window_bounds = array<i64: 1, 408, 16>}, {pipeline_mode = #tpu.pipeline_mode<synchronous>, transform_indices = @transform_1, window_bounds = array<i64: 2, 16, 16>}, {pipeline_mode = #tpu.pipeline_mode<synchronous>, transform_indices = @transform_2, window_bounds = array<i64: 1, 8>}, {transform_indices = @transform_3, window_bounds = array<i64: 1, 8, 16, 8>}]} {
    %c8_i32 = arith.constant 8 : i32
    %0 = arith.muli %arg1, %c8_i32 : i32
    %cst = arith.constant 0.000000e+00 : f32
    %1 = vector.broadcast %cst : f32 to vector<8x16x8xf32>
    %c0 = arith.constant 0 : index
    %c0_0 = arith.constant 0 : index
    %c0_1 = arith.constant 0 : index
    %2 = vector.load %arg6[%c0, %c0_0, %c0_1] : memref<8x16x8xf32, #tpu.memory_space<vmem>>, vector<8x16x8xf32>
    tpu.vector_store %arg6[%c0, %c0_0, %c0_1], %1 {strides = array<i32>} : memref<8x16x8xf32, #tpu.memory_space<vmem>>, vector<8x16x8xf32>,
    %c0_i32 = arith.constant 0 : i32
    %3 = arith.addi %0, %c0_i32 : i32
    %c24_i32 = arith.constant 24 : i32
    %4 = arith.muli %3, %c24_i32 : i32
    %5 = tpu.assume_multiple %4, 8 : i32
    %c0_2 = arith.constant 0 : index
    %6 = arith.index_cast %5 : i32 to index
    %c0_3 = arith.constant 0 : index
    %7 = vector.load %arg2[%c0_2, %6, %c0_3] : memref<1x408x16xbf16, #tpu.memory_space<vmem>>, vector<1x192x16xbf16>
    %8 = vector.shape_cast %7 : vector<1x192x16xbf16> to vector<192x16xbf16>
    %c0_4 = arith.constant 0 : index
    %c0_5 = arith.constant 0 : index
    %c0_6 = arith.constant 0 : index
    %9 = vector.load %arg3[%c0_4, %c0_5, %c0_6] : memref<2x16x16xbf16, #tpu.memory_space<vmem>>, vector<1x16x16xbf16>
    %10 = vector.shape_cast %9 : vector<1x16x16xbf16> to vector<16x16xbf16>
    %cst_7 = arith.constant dense<0.000000e+00> : vector<192x16xf32>
    %11 = tpu.matmul %8, %10, %cst_7 {dimension_numbers = #tpu.dot_dimension_numbers<[1], [0], [0], [1], [0, 0, 1, 1], [], []>} : vector<192x16xbf16>, vector<16x16xbf16>, vector<192x16xf32> -> vector<192x16xf32>
    %12 = vector.shape_cast %11 : vector<192x16xf32> to vector<8x24x16xf32>
    %13 = vector.extract_strided_slice %12 {offsets = [0, 0, 0], sizes = [8, 16, 8], strides = [1, 1, 1]} : vector<8x24x16xf32> to vector<8x16x8xf32>
    %14 = vector.extract_strided_slice %12 {offsets = [0, 1, 8], sizes = [8, 16, 8], strides = [1, 1, 1]} : vector<8x24x16xf32> to vector<8x16x8xf32>
    %15 = arith.addf %13, %14 : vector<8x16x8xf32>
    %c0_8 = arith.constant 0 : index
    %c0_9 = arith.constant 0 : index
    %c0_10 = arith.constant 0 : index
    %16 = vector.load %arg6[%c0_8, %c0_9, %c0_10] : memref<8x16x8xf32, #tpu.memory_space<vmem>>, vector<8x16x8xf32>
    %17 = arith.addf %16, %15 : vector<8x16x8xf32>
    %c0_11 = arith.constant 0 : index
    %c0_12 = arith.constant 0 : index
    %c0_13 = arith.constant 0 : index
    %18 = vector.load %arg6[%c0_11, %c0_12, %c0_13] : memref<8x16x8xf32, #tpu.memory_space<vmem>>, vector<8x16x8xf32>
    tpu.vector_store %arg6[%c0_11, %c0_12, %c0_13], %17 {strides = array<i32>} : memref<8x16x8xf32, #tpu.memory_space<vmem>>, vector<8x16x8xf32>,
    %c1_i32 = arith.constant 1 : i32
    %19 = arith.addi %0, %c1_i32 : i32
    %c24_i32_14 = arith.constant 24 : i32
    %20 = arith.muli %19, %c24_i32_14 : i32
    %21 = tpu.assume_multiple %20, 8 : i32
    %c0_15 = arith.constant 0 : index
    %22 = arith.index_cast %21 : i32 to index
    %c0_16 = arith.constant 0 : index
    %23 = vector.load %arg2[%c0_15, %22, %c0_16] : memref<1x408x16xbf16, #tpu.memory_space<vmem>>, vector<1x192x16xbf16>
    %24 = vector.shape_cast %23 : vector<1x192x16xbf16> to vector<192x16xbf16>
    %c1 = arith.constant 1 : index
    %c0_17 = arith.constant 0 : index
    %c0_18 = arith.constant 0 : index
    %25 = vector.load %arg3[%c1, %c0_17, %c0_18] : memref<2x16x16xbf16, #tpu.memory_space<vmem>>, vector<1x16x16xbf16>
    %26 = vector.shape_cast %25 : vector<1x16x16xbf16> to vector<16x16xbf16>
    %cst_19 = arith.constant dense<0.000000e+00> : vector<192x16xf32>
    %27 = tpu.matmul %24, %26, %cst_19 {dimension_numbers = #tpu.dot_dimension_numbers<[1], [0], [0], [1], [0, 0, 1, 1], [], []>} : vector<192x16xbf16>, vector<16x16xbf16>, vector<192x16xf32> -> vector<192x16xf32>
    %28 = vector.shape_cast %27 : vector<192x16xf32> to vector<8x24x16xf32>
    %29 = vector.extract_strided_slice %28 {offsets = [0, 0, 0], sizes = [8, 16, 8], strides = [1, 1, 1]} : vector<8x24x16xf32> to vector<8x16x8xf32>
    %30 = vector.extract_strided_slice %28 {offsets = [0, 1, 8], sizes = [8, 16, 8], strides = [1, 1, 1]} : vector<8x24x16xf32> to vector<8x16x8xf32>
    %31 = arith.addf %29, %30 : vector<8x16x8xf32>
    %c0_20 = arith.constant 0 : index
    %c0_21 = arith.constant 0 : index
    %c0_22 = arith.constant 0 : index
    %32 = vector.load %arg6[%c0_20, %c0_21, %c0_22] : memref<8x16x8xf32, #tpu.memory_space<vmem>>, vector<8x16x8xf32>
    %33 = arith.addf %32, %31 : vector<8x16x8xf32>
    %c0_23 = arith.constant 0 : index
    %c0_24 = arith.constant 0 : index
    %c0_25 = arith.constant 0 : index
    %34 = vector.load %arg6[%c0_23, %c0_24, %c0_25] : memref<8x16x8xf32, #tpu.memory_space<vmem>>, vector<8x16x8xf32>
    tpu.vector_store %arg6[%c0_23, %c0_24, %c0_25], %33 {strides = array<i32>} : memref<8x16x8xf32, #tpu.memory_space<vmem>>, vector<8x16x8xf32>,
    %c0_26 = arith.constant 0 : index
    %c0_27 = arith.constant 0 : index
    %c0_28 = arith.constant 0 : index
    %35 = vector.load %arg6[%c0_26, %c0_27, %c0_28] : memref<8x16x8xf32, #tpu.memory_space<vmem>>, vector<8x16x8xf32>
    %c0_29 = arith.constant 0 : index
    %c0_30 = arith.constant 0 : index
    %36 = vector.load %arg4[%c0_29, %c0_30] : memref<1x8xf32, #tpu.memory_space<vmem>>, vector<1x8xf32>
    %37 = vector.shape_cast %36 : vector<1x8xf32> to vector<1x1x8xf32>
    %38 = vector.broadcast %37 : vector<1x1x8xf32> to vector<8x16x8xf32>
    %39 = arith.addf %35, %38 : vector<8x16x8xf32>
    %cst_31 = arith.constant 0.000000e+00 : f32
    %40 = vector.broadcast %cst_31 : f32 to vector<8x16x8xf32>
    %41 = arith.cmpf oge, %39, %40 : vector<8x16x8xf32>
    %cst_32 = arith.constant 2.000000e-01 : f32
    %42 = vector.broadcast %cst_32 : f32 to vector<8x16x8xf32>
    %43 = arith.mulf %42, %39 : vector<8x16x8xf32>
    %44 = arith.select %41, %39, %43 : vector<8x16x8xi1>, vector<8x16x8xf32>
    %45 = arith.truncf %44 : vector<8x16x8xf32> to vector<8x16x8xbf16>
    %c0_33 = arith.constant 0 : index
    %c0_34 = arith.constant 0 : index
    %c0_35 = arith.constant 0 : index
    %c0_36 = arith.constant 0 : index
    %46 = vector.load %arg5[%c0_33, %c0_34, %c0_35, %c0_36] : memref<1x8x16x8xbf16, #tpu.memory_space<vmem>>, vector<1x8x16x8xbf16>
    %47 = vector.shape_cast %46 : vector<1x8x16x8xbf16> to vector<8x16x8xbf16>
    %48 = vector.shape_cast %45 : vector<8x16x8xbf16> to vector<1x8x16x8xbf16>
    tpu.vector_store %arg5[%c0_33, %c0_34, %c0_35, %c0_36], %48 {strides = array<i32>} : memref<1x8x16x8xbf16, #tpu.memory_space<vmem>>, vector<1x8x16x8xbf16>,
    return
  }
  func.func @transform_0(%arg0: i32, %arg1: i32) -> (i32, i32, i32) {
    %c0_i32 = arith.constant 0 : i32
    %c0_i32_0 = arith.constant 0 : i32
    %c0_i32_1 = arith.constant 0 : i32
    return %arg0, %c0_i32, %c0_i32_0 : i32, i32, i32
  }
  func.func @transform_1(%arg0: i32, %arg1: i32) -> (i32, i32, i32) {
    %c0_i32 = arith.constant 0 : i32
    %c0_i32_0 = arith.constant 0 : i32
    %c0_i32_1 = arith.constant 0 : i32
    %c0_i32_2 = arith.constant 0 : i32
    return %c0_i32, %c0_i32_0, %c0_i32_1 : i32, i32, i32
  }
  func.func @transform_2(%arg0: i32, %arg1: i32) -> (i32, i32) {
    %c0_i32 = arith.constant 0 : i32
    %c0_i32_0 = arith.constant 0 : i32
    %c0_i32_1 = arith.constant 0 : i32
    return %c0_i32, %c0_i32_0 : i32, i32
  }
  func.func @transform_3(%arg0: i32, %arg1: i32) -> (i32, i32, i32, i32) {
    %c0_i32 = arith.constant 0 : i32
    %c0_i32_0 = arith.constant 0 : i32
    %c0_i32_1 = arith.constant 0 : i32
    return %arg0, %arg1, %c0_i32, %c0_i32_0 : i32, i32, i32, i32
  }
}

module attributes {stable_mosaic.version = 11 : i64} {
  func.func @_conv_kernel(%arg0: i32, %arg1: i32, %arg2: memref<1x144x32xbf16, #tpu.memory_space<vmem>>, %arg3: memref<2x32x32xbf16, #tpu.memory_space<vmem>>, %arg4: memref<1x16xf32, #tpu.memory_space<vmem>>, %arg5: memref<1x8x8x16xbf16, #tpu.memory_space<vmem>>, %arg6: memref<8x8x16xf32, #tpu.memory_space<vmem>>) attributes {dimension_semantics = [#tpu.dimension_semantics<parallel>, #tpu.dimension_semantics<parallel>], iteration_bounds = array<i64: 2, 1>, scalar_prefetch = 0 : i64, scratch_operands = 1 : i64, tpu.core_type = #tpu.core_type<tc>, window_params = [{transform_indices = @transform_0, window_bounds = array<i64: 1, 144, 32>}, {pipeline_mode = #tpu.pipeline_mode<synchronous>, transform_indices = @transform_1, window_bounds = array<i64: 2, 32, 32>}, {pipeline_mode = #tpu.pipeline_mode<synchronous>, transform_indices = @transform_2, window_bounds = array<i64: 1, 16>}, {transform_indices = @transform_3, window_bounds = array<i64: 1, 8, 8, 16>}]} {
    %c8_i32 = arith.constant 8 : i32
    %0 = arith.muli %arg1, %c8_i32 : i32
    %cst = arith.constant 0.000000e+00 : f32
    %1 = vector.broadcast %cst : f32 to vector<8x8x16xf32>
    %c0 = arith.constant 0 : index
    %c0_0 = arith.constant 0 : index
    %c0_1 = arith.constant 0 : index
    %2 = vector.load %arg6[%c0, %c0_0, %c0_1] : memref<8x8x16xf32, #tpu.memory_space<vmem>>, vector<8x8x16xf32>
    tpu.vector_store %arg6[%c0, %c0_0, %c0_1], %1 {strides = array<i32>} : memref<8x8x16xf32, #tpu.memory_space<vmem>>, vector<8x8x16xf32>,
    %c0_i32 = arith.constant 0 : i32
    %3 = arith.addi %0, %c0_i32 : i32
    %c16_i32 = arith.constant 16 : i32
    %4 = arith.muli %3, %c16_i32 : i32
    %5 = tpu.assume_multiple %4, 8 : i32
    %c0_2 = arith.constant 0 : index
    %6 = arith.index_cast %5 : i32 to index
    %c0_3 = arith.constant 0 : index
    %7 = vector.load %arg2[%c0_2, %6, %c0_3] : memref<1x144x32xbf16, #tpu.memory_space<vmem>>, vector<1x128x32xbf16>
    %8 = vector.shape_cast %7 : vector<1x128x32xbf16> to vector<128x32xbf16>
    %c0_4 = arith.constant 0 : index
    %c0_5 = arith.constant 0 : index
    %c0_6 = arith.constant 0 : index
    %9 = vector.load %arg3[%c0_4, %c0_5, %c0_6] : memref<2x32x32xbf16, #tpu.memory_space<vmem>>, vector<1x32x32xbf16>
    %10 = vector.shape_cast %9 : vector<1x32x32xbf16> to vector<32x32xbf16>
    %cst_7 = arith.constant dense<0.000000e+00> : vector<128x32xf32>
    %11 = tpu.matmul %8, %10, %cst_7 {dimension_numbers = #tpu.dot_dimension_numbers<[1], [0], [0], [1], [0, 0, 1, 1], [], []>} : vector<128x32xbf16>, vector<32x32xbf16>, vector<128x32xf32> -> vector<128x32xf32>
    %12 = vector.shape_cast %11 : vector<128x32xf32> to vector<8x16x32xf32>
    %13 = vector.extract_strided_slice %12 {offsets = [0, 0, 0], sizes = [8, 8, 16], strides = [1, 1, 1]} : vector<8x16x32xf32> to vector<8x8x16xf32>
    %14 = vector.extract_strided_slice %12 {offsets = [0, 1, 16], sizes = [8, 8, 16], strides = [1, 1, 1]} : vector<8x16x32xf32> to vector<8x8x16xf32>
    %15 = arith.addf %13, %14 : vector<8x8x16xf32>
    %c0_8 = arith.constant 0 : index
    %c0_9 = arith.constant 0 : index
    %c0_10 = arith.constant 0 : index
    %16 = vector.load %arg6[%c0_8, %c0_9, %c0_10] : memref<8x8x16xf32, #tpu.memory_space<vmem>>, vector<8x8x16xf32>
    %17 = arith.addf %16, %15 : vector<8x8x16xf32>
    %c0_11 = arith.constant 0 : index
    %c0_12 = arith.constant 0 : index
    %c0_13 = arith.constant 0 : index
    %18 = vector.load %arg6[%c0_11, %c0_12, %c0_13] : memref<8x8x16xf32, #tpu.memory_space<vmem>>, vector<8x8x16xf32>
    tpu.vector_store %arg6[%c0_11, %c0_12, %c0_13], %17 {strides = array<i32>} : memref<8x8x16xf32, #tpu.memory_space<vmem>>, vector<8x8x16xf32>,
    %c1_i32 = arith.constant 1 : i32
    %19 = arith.addi %0, %c1_i32 : i32
    %c16_i32_14 = arith.constant 16 : i32
    %20 = arith.muli %19, %c16_i32_14 : i32
    %21 = tpu.assume_multiple %20, 8 : i32
    %c0_15 = arith.constant 0 : index
    %22 = arith.index_cast %21 : i32 to index
    %c0_16 = arith.constant 0 : index
    %23 = vector.load %arg2[%c0_15, %22, %c0_16] : memref<1x144x32xbf16, #tpu.memory_space<vmem>>, vector<1x128x32xbf16>
    %24 = vector.shape_cast %23 : vector<1x128x32xbf16> to vector<128x32xbf16>
    %c1 = arith.constant 1 : index
    %c0_17 = arith.constant 0 : index
    %c0_18 = arith.constant 0 : index
    %25 = vector.load %arg3[%c1, %c0_17, %c0_18] : memref<2x32x32xbf16, #tpu.memory_space<vmem>>, vector<1x32x32xbf16>
    %26 = vector.shape_cast %25 : vector<1x32x32xbf16> to vector<32x32xbf16>
    %cst_19 = arith.constant dense<0.000000e+00> : vector<128x32xf32>
    %27 = tpu.matmul %24, %26, %cst_19 {dimension_numbers = #tpu.dot_dimension_numbers<[1], [0], [0], [1], [0, 0, 1, 1], [], []>} : vector<128x32xbf16>, vector<32x32xbf16>, vector<128x32xf32> -> vector<128x32xf32>
    %28 = vector.shape_cast %27 : vector<128x32xf32> to vector<8x16x32xf32>
    %29 = vector.extract_strided_slice %28 {offsets = [0, 0, 0], sizes = [8, 8, 16], strides = [1, 1, 1]} : vector<8x16x32xf32> to vector<8x8x16xf32>
    %30 = vector.extract_strided_slice %28 {offsets = [0, 1, 16], sizes = [8, 8, 16], strides = [1, 1, 1]} : vector<8x16x32xf32> to vector<8x8x16xf32>
    %31 = arith.addf %29, %30 : vector<8x8x16xf32>
    %c0_20 = arith.constant 0 : index
    %c0_21 = arith.constant 0 : index
    %c0_22 = arith.constant 0 : index
    %32 = vector.load %arg6[%c0_20, %c0_21, %c0_22] : memref<8x8x16xf32, #tpu.memory_space<vmem>>, vector<8x8x16xf32>
    %33 = arith.addf %32, %31 : vector<8x8x16xf32>
    %c0_23 = arith.constant 0 : index
    %c0_24 = arith.constant 0 : index
    %c0_25 = arith.constant 0 : index
    %34 = vector.load %arg6[%c0_23, %c0_24, %c0_25] : memref<8x8x16xf32, #tpu.memory_space<vmem>>, vector<8x8x16xf32>
    tpu.vector_store %arg6[%c0_23, %c0_24, %c0_25], %33 {strides = array<i32>} : memref<8x8x16xf32, #tpu.memory_space<vmem>>, vector<8x8x16xf32>,
    %c0_26 = arith.constant 0 : index
    %c0_27 = arith.constant 0 : index
    %c0_28 = arith.constant 0 : index
    %35 = vector.load %arg6[%c0_26, %c0_27, %c0_28] : memref<8x8x16xf32, #tpu.memory_space<vmem>>, vector<8x8x16xf32>
    %c0_29 = arith.constant 0 : index
    %c0_30 = arith.constant 0 : index
    %36 = vector.load %arg4[%c0_29, %c0_30] : memref<1x16xf32, #tpu.memory_space<vmem>>, vector<1x16xf32>
    %37 = vector.shape_cast %36 : vector<1x16xf32> to vector<1x1x16xf32>
    %38 = vector.broadcast %37 : vector<1x1x16xf32> to vector<8x8x16xf32>
    %39 = arith.addf %35, %38 : vector<8x8x16xf32>
    %cst_31 = arith.constant dense<0.000000e+00> : vector<8x16xf32>
    %40 = vector.multi_reduction <add>, %39, %cst_31 [0] : vector<8x8x16xf32> to vector<8x16xf32>
    %41 = vector.shape_cast %40 : vector<8x16xf32> to vector<1x8x16xf32>
    %cst_32 = arith.constant dense<0.000000e+00> : vector<1x16xf32>
    %42 = vector.multi_reduction <add>, %41, %cst_32 [1] : vector<1x8x16xf32> to vector<1x16xf32>
    %43 = vector.shape_cast %42 : vector<1x16xf32> to vector<1x1x16xf32>
    %cst_33 = arith.constant 1.562500e-02 : f32
    %44 = vector.broadcast %cst_33 : f32 to vector<1x1x16xf32>
    %45 = arith.mulf %43, %44 : vector<1x1x16xf32>
    %46 = vector.broadcast %45 : vector<1x1x16xf32> to vector<8x8x16xf32>
    %47 = arith.subf %39, %46 : vector<8x8x16xf32>
    %48 = arith.mulf %47, %47 : vector<8x8x16xf32>
    %cst_34 = arith.constant dense<0.000000e+00> : vector<8x16xf32>
    %49 = vector.multi_reduction <add>, %48, %cst_34 [0] : vector<8x8x16xf32> to vector<8x16xf32>
    %50 = vector.shape_cast %49 : vector<8x16xf32> to vector<1x8x16xf32>
    %cst_35 = arith.constant dense<0.000000e+00> : vector<1x16xf32>
    %51 = vector.multi_reduction <add>, %50, %cst_35 [1] : vector<1x8x16xf32> to vector<1x16xf32>
    %52 = vector.shape_cast %51 : vector<1x16xf32> to vector<1x1x16xf32>
    %cst_36 = arith.constant 1.562500e-02 : f32
    %53 = vector.broadcast %cst_36 : f32 to vector<1x1x16xf32>
    %54 = arith.mulf %52, %53 : vector<1x1x16xf32>
    %cst_37 = arith.constant 9.99999974E-6 : f32
    %55 = vector.broadcast %cst_37 : f32 to vector<1x1x16xf32>
    %56 = arith.addf %54, %55 : vector<1x1x16xf32>
    %57 = math.rsqrt %56 : vector<1x1x16xf32>
    %58 = vector.broadcast %57 : vector<1x1x16xf32> to vector<8x8x16xf32>
    %59 = arith.mulf %47, %58 : vector<8x8x16xf32>
    %cst_38 = arith.constant 0.000000e+00 : f32
    %60 = vector.broadcast %cst_38 : f32 to vector<8x8x16xf32>
    %61 = arith.cmpf oge, %59, %60 : vector<8x8x16xf32>
    %cst_39 = arith.constant 2.000000e-01 : f32
    %62 = vector.broadcast %cst_39 : f32 to vector<8x8x16xf32>
    %63 = arith.mulf %62, %59 : vector<8x8x16xf32>
    %64 = arith.select %61, %59, %63 : vector<8x8x16xi1>, vector<8x8x16xf32>
    %65 = arith.truncf %64 : vector<8x8x16xf32> to vector<8x8x16xbf16>
    %c0_40 = arith.constant 0 : index
    %c0_41 = arith.constant 0 : index
    %c0_42 = arith.constant 0 : index
    %c0_43 = arith.constant 0 : index
    %66 = vector.load %arg5[%c0_40, %c0_41, %c0_42, %c0_43] : memref<1x8x8x16xbf16, #tpu.memory_space<vmem>>, vector<1x8x8x16xbf16>
    %67 = vector.shape_cast %66 : vector<1x8x8x16xbf16> to vector<8x8x16xbf16>
    %68 = vector.shape_cast %65 : vector<8x8x16xbf16> to vector<1x8x8x16xbf16>
    tpu.vector_store %arg5[%c0_40, %c0_41, %c0_42, %c0_43], %68 {strides = array<i32>} : memref<1x8x8x16xbf16, #tpu.memory_space<vmem>>, vector<1x8x8x16xbf16>,
    return
  }
  func.func @transform_0(%arg0: i32, %arg1: i32) -> (i32, i32, i32) {
    %c0_i32 = arith.constant 0 : i32
    %c0_i32_0 = arith.constant 0 : i32
    %c0_i32_1 = arith.constant 0 : i32
    return %arg0, %c0_i32, %c0_i32_0 : i32, i32, i32
  }
  func.func @transform_1(%arg0: i32, %arg1: i32) -> (i32, i32, i32) {
    %c0_i32 = arith.constant 0 : i32
    %c0_i32_0 = arith.constant 0 : i32
    %c0_i32_1 = arith.constant 0 : i32
    %c0_i32_2 = arith.constant 0 : i32
    return %c0_i32, %c0_i32_0, %c0_i32_1 : i32, i32, i32
  }
  func.func @transform_2(%arg0: i32, %arg1: i32) -> (i32, i32) {
    %c0_i32 = arith.constant 0 : i32
    %c0_i32_0 = arith.constant 0 : i32
    %c0_i32_1 = arith.constant 0 : i32
    return %c0_i32, %c0_i32_0 : i32, i32
  }
  func.func @transform_3(%arg0: i32, %arg1: i32) -> (i32, i32, i32, i32) {
    %c0_i32 = arith.constant 0 : i32
    %c0_i32_0 = arith.constant 0 : i32
    %c0_i32_1 = arith.constant 0 : i32
    return %arg0, %arg1, %c0_i32, %c0_i32_0 : i32, i32, i32, i32
  }
}

module attributes {stable_mosaic.version = 11 : i64} {
  func.func @_conv_kernel(%arg0: i32, %arg1: i32, %arg2: memref<1x48x32xbf16, #tpu.memory_space<vmem>>, %arg3: memref<4x32x256xbf16, #tpu.memory_space<vmem>>, %arg4: memref<1x64xf32, #tpu.memory_space<vmem>>, %arg5: memref<1x3x3x64xbf16, #tpu.memory_space<vmem>>, %arg6: memref<3x3x64xf32, #tpu.memory_space<vmem>>) attributes {dimension_semantics = [#tpu.dimension_semantics<parallel>, #tpu.dimension_semantics<parallel>], iteration_bounds = array<i64: 2, 1>, scalar_prefetch = 0 : i64, scratch_operands = 1 : i64, tpu.core_type = #tpu.core_type<tc>, window_params = [{transform_indices = @transform_0, window_bounds = array<i64: 1, 48, 32>}, {pipeline_mode = #tpu.pipeline_mode<synchronous>, transform_indices = @transform_1, window_bounds = array<i64: 4, 32, 256>}, {pipeline_mode = #tpu.pipeline_mode<synchronous>, transform_indices = @transform_2, window_bounds = array<i64: 1, 64>}, {transform_indices = @transform_3, window_bounds = array<i64: 1, 3, 3, 64>}]} {
    %c3_i32 = arith.constant 3 : i32
    %0 = arith.muli %arg1, %c3_i32 : i32
    %cst = arith.constant 0.000000e+00 : f32
    %1 = vector.broadcast %cst : f32 to vector<3x3x64xf32>
    %c0 = arith.constant 0 : index
    %c0_0 = arith.constant 0 : index
    %c0_1 = arith.constant 0 : index
    %2 = vector.load %arg6[%c0, %c0_0, %c0_1] : memref<3x3x64xf32, #tpu.memory_space<vmem>>, vector<3x3x64xf32>
    tpu.vector_store %arg6[%c0, %c0_0, %c0_1], %1 {strides = array<i32>} : memref<3x3x64xf32, #tpu.memory_space<vmem>>, vector<3x3x64xf32>,
    %c0_i32 = arith.constant 0 : i32
    %3 = arith.addi %0, %c0_i32 : i32
    %c8_i32 = arith.constant 8 : i32
    %4 = arith.muli %3, %c8_i32 : i32
    %5 = tpu.assume_multiple %4, 8 : i32
    %c0_2 = arith.constant 0 : index
    %6 = arith.index_cast %5 : i32 to index
    %c0_3 = arith.constant 0 : index
    %7 = vector.load %arg2[%c0_2, %6, %c0_3] : memref<1x48x32xbf16, #tpu.memory_space<vmem>>, vector<1x24x32xbf16>
    %8 = vector.shape_cast %7 : vector<1x24x32xbf16> to vector<24x32xbf16>
    %c0_4 = arith.constant 0 : index
    %c0_5 = arith.constant 0 : index
    %c0_6 = arith.constant 0 : index
    %9 = vector.load %arg3[%c0_4, %c0_5, %c0_6] : memref<4x32x256xbf16, #tpu.memory_space<vmem>>, vector<1x32x256xbf16>
    %10 = vector.shape_cast %9 : vector<1x32x256xbf16> to vector<32x256xbf16>
    %cst_7 = arith.constant dense<0.000000e+00> : vector<24x256xf32>
    %11 = tpu.matmul %8, %10, %cst_7 {dimension_numbers = #tpu.dot_dimension_numbers<[1], [0], [0], [1], [0, 0, 1, 1], [], []>} : vector<24x32xbf16>, vector<32x256xbf16>, vector<24x256xf32> -> vector<24x256xf32>
    %12 = vector.shape_cast %11 : vector<24x256xf32> to vector<3x8x256xf32>
    %13 = vector.extract_strided_slice %12 {offsets = [0, 0, 0], sizes = [3, 3, 64], strides = [1, 1, 1]} : vector<3x8x256xf32> to vector<3x3x64xf32>
    %14 = vector.extract_strided_slice %12 {offsets = [0, 1, 64], sizes = [3, 3, 64], strides = [1, 1, 1]} : vector<3x8x256xf32> to vector<3x3x64xf32>
    %15 = arith.addf %13, %14 : vector<3x3x64xf32>
    %16 = vector.extract_strided_slice %12 {offsets = [0, 2, 128], sizes = [3, 3, 64], strides = [1, 1, 1]} : vector<3x8x256xf32> to vector<3x3x64xf32>
    %17 = arith.addf %15, %16 : vector<3x3x64xf32>
    %18 = vector.extract_strided_slice %12 {offsets = [0, 3, 192], sizes = [3, 3, 64], strides = [1, 1, 1]} : vector<3x8x256xf32> to vector<3x3x64xf32>
    %19 = arith.addf %17, %18 : vector<3x3x64xf32>
    %c0_8 = arith.constant 0 : index
    %c0_9 = arith.constant 0 : index
    %c0_10 = arith.constant 0 : index
    %20 = vector.load %arg6[%c0_8, %c0_9, %c0_10] : memref<3x3x64xf32, #tpu.memory_space<vmem>>, vector<3x3x64xf32>
    %21 = arith.addf %20, %19 : vector<3x3x64xf32>
    %c0_11 = arith.constant 0 : index
    %c0_12 = arith.constant 0 : index
    %c0_13 = arith.constant 0 : index
    %22 = vector.load %arg6[%c0_11, %c0_12, %c0_13] : memref<3x3x64xf32, #tpu.memory_space<vmem>>, vector<3x3x64xf32>
    tpu.vector_store %arg6[%c0_11, %c0_12, %c0_13], %21 {strides = array<i32>} : memref<3x3x64xf32, #tpu.memory_space<vmem>>, vector<3x3x64xf32>,
    %c1_i32 = arith.constant 1 : i32
    %23 = arith.addi %0, %c1_i32 : i32
    %c8_i32_14 = arith.constant 8 : i32
    %24 = arith.muli %23, %c8_i32_14 : i32
    %25 = tpu.assume_multiple %24, 8 : i32
    %c0_15 = arith.constant 0 : index
    %26 = arith.index_cast %25 : i32 to index
    %c0_16 = arith.constant 0 : index
    %27 = vector.load %arg2[%c0_15, %26, %c0_16] : memref<1x48x32xbf16, #tpu.memory_space<vmem>>, vector<1x24x32xbf16>
    %28 = vector.shape_cast %27 : vector<1x24x32xbf16> to vector<24x32xbf16>
    %c1 = arith.constant 1 : index
    %c0_17 = arith.constant 0 : index
    %c0_18 = arith.constant 0 : index
    %29 = vector.load %arg3[%c1, %c0_17, %c0_18] : memref<4x32x256xbf16, #tpu.memory_space<vmem>>, vector<1x32x256xbf16>
    %30 = vector.shape_cast %29 : vector<1x32x256xbf16> to vector<32x256xbf16>
    %cst_19 = arith.constant dense<0.000000e+00> : vector<24x256xf32>
    %31 = tpu.matmul %28, %30, %cst_19 {dimension_numbers = #tpu.dot_dimension_numbers<[1], [0], [0], [1], [0, 0, 1, 1], [], []>} : vector<24x32xbf16>, vector<32x256xbf16>, vector<24x256xf32> -> vector<24x256xf32>
    %32 = vector.shape_cast %31 : vector<24x256xf32> to vector<3x8x256xf32>
    %33 = vector.extract_strided_slice %32 {offsets = [0, 0, 0], sizes = [3, 3, 64], strides = [1, 1, 1]} : vector<3x8x256xf32> to vector<3x3x64xf32>
    %34 = vector.extract_strided_slice %32 {offsets = [0, 1, 64], sizes = [3, 3, 64], strides = [1, 1, 1]} : vector<3x8x256xf32> to vector<3x3x64xf32>
    %35 = arith.addf %33, %34 : vector<3x3x64xf32>
    %36 = vector.extract_strided_slice %32 {offsets = [0, 2, 128], sizes = [3, 3, 64], strides = [1, 1, 1]} : vector<3x8x256xf32> to vector<3x3x64xf32>
    %37 = arith.addf %35, %36 : vector<3x3x64xf32>
    %38 = vector.extract_strided_slice %32 {offsets = [0, 3, 192], sizes = [3, 3, 64], strides = [1, 1, 1]} : vector<3x8x256xf32> to vector<3x3x64xf32>
    %39 = arith.addf %37, %38 : vector<3x3x64xf32>
    %c0_20 = arith.constant 0 : index
    %c0_21 = arith.constant 0 : index
    %c0_22 = arith.constant 0 : index
    %40 = vector.load %arg6[%c0_20, %c0_21, %c0_22] : memref<3x3x64xf32, #tpu.memory_space<vmem>>, vector<3x3x64xf32>
    %41 = arith.addf %40, %39 : vector<3x3x64xf32>
    %c0_23 = arith.constant 0 : index
    %c0_24 = arith.constant 0 : index
    %c0_25 = arith.constant 0 : index
    %42 = vector.load %arg6[%c0_23, %c0_24, %c0_25] : memref<3x3x64xf32, #tpu.memory_space<vmem>>, vector<3x3x64xf32>
    tpu.vector_store %arg6[%c0_23, %c0_24, %c0_25], %41 {strides = array<i32>} : memref<3x3x64xf32, #tpu.memory_space<vmem>>, vector<3x3x64xf32>,
    %c2_i32 = arith.constant 2 : i32
    %43 = arith.addi %0, %c2_i32 : i32
    %c8_i32_26 = arith.constant 8 : i32
    %44 = arith.muli %43, %c8_i32_26 : i32
    %45 = tpu.assume_multiple %44, 8 : i32
    %c0_27 = arith.constant 0 : index
    %46 = arith.index_cast %45 : i32 to index
    %c0_28 = arith.constant 0 : index
    %47 = vector.load %arg2[%c0_27, %46, %c0_28] : memref<1x48x32xbf16, #tpu.memory_space<vmem>>, vector<1x24x32xbf16>
    %48 = vector.shape_cast %47 : vector<1x24x32xbf16> to vector<24x32xbf16>
    %c2 = arith.constant 2 : index
    %c0_29 = arith.constant 0 : index
    %c0_30 = arith.constant 0 : index
    %49 = vector.load %arg3[%c2, %c0_29, %c0_30] : memref<4x32x256xbf16, #tpu.memory_space<vmem>>, vector<1x32x256xbf16>
    %50 = vector.shape_cast %49 : vector<1x32x256xbf16> to vector<32x256xbf16>
    %cst_31 = arith.constant dense<0.000000e+00> : vector<24x256xf32>
    %51 = tpu.matmul %48, %50, %cst_31 {dimension_numbers = #tpu.dot_dimension_numbers<[1], [0], [0], [1], [0, 0, 1, 1], [], []>} : vector<24x32xbf16>, vector<32x256xbf16>, vector<24x256xf32> -> vector<24x256xf32>
    %52 = vector.shape_cast %51 : vector<24x256xf32> to vector<3x8x256xf32>
    %53 = vector.extract_strided_slice %52 {offsets = [0, 0, 0], sizes = [3, 3, 64], strides = [1, 1, 1]} : vector<3x8x256xf32> to vector<3x3x64xf32>
    %54 = vector.extract_strided_slice %52 {offsets = [0, 1, 64], sizes = [3, 3, 64], strides = [1, 1, 1]} : vector<3x8x256xf32> to vector<3x3x64xf32>
    %55 = arith.addf %53, %54 : vector<3x3x64xf32>
    %56 = vector.extract_strided_slice %52 {offsets = [0, 2, 128], sizes = [3, 3, 64], strides = [1, 1, 1]} : vector<3x8x256xf32> to vector<3x3x64xf32>
    %57 = arith.addf %55, %56 : vector<3x3x64xf32>
    %58 = vector.extract_strided_slice %52 {offsets = [0, 3, 192], sizes = [3, 3, 64], strides = [1, 1, 1]} : vector<3x8x256xf32> to vector<3x3x64xf32>
    %59 = arith.addf %57, %58 : vector<3x3x64xf32>
    %c0_32 = arith.constant 0 : index
    %c0_33 = arith.constant 0 : index
    %c0_34 = arith.constant 0 : index
    %60 = vector.load %arg6[%c0_32, %c0_33, %c0_34] : memref<3x3x64xf32, #tpu.memory_space<vmem>>, vector<3x3x64xf32>
    %61 = arith.addf %60, %59 : vector<3x3x64xf32>
    %c0_35 = arith.constant 0 : index
    %c0_36 = arith.constant 0 : index
    %c0_37 = arith.constant 0 : index
    %62 = vector.load %arg6[%c0_35, %c0_36, %c0_37] : memref<3x3x64xf32, #tpu.memory_space<vmem>>, vector<3x3x64xf32>
    tpu.vector_store %arg6[%c0_35, %c0_36, %c0_37], %61 {strides = array<i32>} : memref<3x3x64xf32, #tpu.memory_space<vmem>>, vector<3x3x64xf32>,
    %c3_i32_38 = arith.constant 3 : i32
    %63 = arith.addi %0, %c3_i32_38 : i32
    %c8_i32_39 = arith.constant 8 : i32
    %64 = arith.muli %63, %c8_i32_39 : i32
    %65 = tpu.assume_multiple %64, 8 : i32
    %c0_40 = arith.constant 0 : index
    %66 = arith.index_cast %65 : i32 to index
    %c0_41 = arith.constant 0 : index
    %67 = vector.load %arg2[%c0_40, %66, %c0_41] : memref<1x48x32xbf16, #tpu.memory_space<vmem>>, vector<1x24x32xbf16>
    %68 = vector.shape_cast %67 : vector<1x24x32xbf16> to vector<24x32xbf16>
    %c3 = arith.constant 3 : index
    %c0_42 = arith.constant 0 : index
    %c0_43 = arith.constant 0 : index
    %69 = vector.load %arg3[%c3, %c0_42, %c0_43] : memref<4x32x256xbf16, #tpu.memory_space<vmem>>, vector<1x32x256xbf16>
    %70 = vector.shape_cast %69 : vector<1x32x256xbf16> to vector<32x256xbf16>
    %cst_44 = arith.constant dense<0.000000e+00> : vector<24x256xf32>
    %71 = tpu.matmul %68, %70, %cst_44 {dimension_numbers = #tpu.dot_dimension_numbers<[1], [0], [0], [1], [0, 0, 1, 1], [], []>} : vector<24x32xbf16>, vector<32x256xbf16>, vector<24x256xf32> -> vector<24x256xf32>
    %72 = vector.shape_cast %71 : vector<24x256xf32> to vector<3x8x256xf32>
    %73 = vector.extract_strided_slice %72 {offsets = [0, 0, 0], sizes = [3, 3, 64], strides = [1, 1, 1]} : vector<3x8x256xf32> to vector<3x3x64xf32>
    %74 = vector.extract_strided_slice %72 {offsets = [0, 1, 64], sizes = [3, 3, 64], strides = [1, 1, 1]} : vector<3x8x256xf32> to vector<3x3x64xf32>
    %75 = arith.addf %73, %74 : vector<3x3x64xf32>
    %76 = vector.extract_strided_slice %72 {offsets = [0, 2, 128], sizes = [3, 3, 64], strides = [1, 1, 1]} : vector<3x8x256xf32> to vector<3x3x64xf32>
    %77 = arith.addf %75, %76 : vector<3x3x64xf32>
    %78 = vector.extract_strided_slice %72 {offsets = [0, 3, 192], sizes = [3, 3, 64], strides = [1, 1, 1]} : vector<3x8x256xf32> to vector<3x3x64xf32>
    %79 = arith.addf %77, %78 : vector<3x3x64xf32>
    %c0_45 = arith.constant 0 : index
    %c0_46 = arith.constant 0 : index
    %c0_47 = arith.constant 0 : index
    %80 = vector.load %arg6[%c0_45, %c0_46, %c0_47] : memref<3x3x64xf32, #tpu.memory_space<vmem>>, vector<3x3x64xf32>
    %81 = arith.addf %80, %79 : vector<3x3x64xf32>
    %c0_48 = arith.constant 0 : index
    %c0_49 = arith.constant 0 : index
    %c0_50 = arith.constant 0 : index
    %82 = vector.load %arg6[%c0_48, %c0_49, %c0_50] : memref<3x3x64xf32, #tpu.memory_space<vmem>>, vector<3x3x64xf32>
    tpu.vector_store %arg6[%c0_48, %c0_49, %c0_50], %81 {strides = array<i32>} : memref<3x3x64xf32, #tpu.memory_space<vmem>>, vector<3x3x64xf32>,
    %c0_51 = arith.constant 0 : index
    %c0_52 = arith.constant 0 : index
    %c0_53 = arith.constant 0 : index
    %83 = vector.load %arg6[%c0_51, %c0_52, %c0_53] : memref<3x3x64xf32, #tpu.memory_space<vmem>>, vector<3x3x64xf32>
    %c0_54 = arith.constant 0 : index
    %c0_55 = arith.constant 0 : index
    %84 = vector.load %arg4[%c0_54, %c0_55] : memref<1x64xf32, #tpu.memory_space<vmem>>, vector<1x64xf32>
    %85 = vector.shape_cast %84 : vector<1x64xf32> to vector<1x1x64xf32>
    %86 = vector.broadcast %85 : vector<1x1x64xf32> to vector<3x3x64xf32>
    %87 = arith.addf %83, %86 : vector<3x3x64xf32>
    %cst_56 = arith.constant dense<0.000000e+00> : vector<3x64xf32>
    %88 = vector.multi_reduction <add>, %87, %cst_56 [0] : vector<3x3x64xf32> to vector<3x64xf32>
    %89 = vector.shape_cast %88 : vector<3x64xf32> to vector<1x3x64xf32>
    %cst_57 = arith.constant dense<0.000000e+00> : vector<1x64xf32>
    %90 = vector.multi_reduction <add>, %89, %cst_57 [1] : vector<1x3x64xf32> to vector<1x64xf32>
    %91 = vector.shape_cast %90 : vector<1x64xf32> to vector<1x1x64xf32>
    %cst_58 = arith.constant 0.111111112 : f32
    %92 = vector.broadcast %cst_58 : f32 to vector<1x1x64xf32>
    %93 = arith.mulf %91, %92 : vector<1x1x64xf32>
    %94 = vector.broadcast %93 : vector<1x1x64xf32> to vector<3x3x64xf32>
    %95 = arith.subf %87, %94 : vector<3x3x64xf32>
    %96 = arith.mulf %95, %95 : vector<3x3x64xf32>
    %cst_59 = arith.constant dense<0.000000e+00> : vector<3x64xf32>
    %97 = vector.multi_reduction <add>, %96, %cst_59 [0] : vector<3x3x64xf32> to vector<3x64xf32>
    %98 = vector.shape_cast %97 : vector<3x64xf32> to vector<1x3x64xf32>
    %cst_60 = arith.constant dense<0.000000e+00> : vector<1x64xf32>
    %99 = vector.multi_reduction <add>, %98, %cst_60 [1] : vector<1x3x64xf32> to vector<1x64xf32>
    %100 = vector.shape_cast %99 : vector<1x64xf32> to vector<1x1x64xf32>
    %cst_61 = arith.constant 0.111111112 : f32
    %101 = vector.broadcast %cst_61 : f32 to vector<1x1x64xf32>
    %102 = arith.mulf %100, %101 : vector<1x1x64xf32>
    %cst_62 = arith.constant 9.99999974E-6 : f32
    %103 = vector.broadcast %cst_62 : f32 to vector<1x1x64xf32>
    %104 = arith.addf %102, %103 : vector<1x1x64xf32>
    %105 = math.rsqrt %104 : vector<1x1x64xf32>
    %106 = vector.broadcast %105 : vector<1x1x64xf32> to vector<3x3x64xf32>
    %107 = arith.mulf %95, %106 : vector<3x3x64xf32>
    %cst_63 = arith.constant 0.000000e+00 : f32
    %108 = vector.broadcast %cst_63 : f32 to vector<3x3x64xf32>
    %109 = arith.cmpf oge, %107, %108 : vector<3x3x64xf32>
    %cst_64 = arith.constant 2.000000e-01 : f32
    %110 = vector.broadcast %cst_64 : f32 to vector<3x3x64xf32>
    %111 = arith.mulf %110, %107 : vector<3x3x64xf32>
    %112 = arith.select %109, %107, %111 : vector<3x3x64xi1>, vector<3x3x64xf32>
    %113 = arith.truncf %112 : vector<3x3x64xf32> to vector<3x3x64xbf16>
    %c0_65 = arith.constant 0 : index
    %c0_66 = arith.constant 0 : index
    %c0_67 = arith.constant 0 : index
    %c0_68 = arith.constant 0 : index
    %114 = vector.load %arg5[%c0_65, %c0_66, %c0_67, %c0_68] : memref<1x3x3x64xbf16, #tpu.memory_space<vmem>>, vector<1x3x3x64xbf16>
    %115 = vector.shape_cast %114 : vector<1x3x3x64xbf16> to vector<3x3x64xbf16>
    %116 = vector.shape_cast %113 : vector<3x3x64xbf16> to vector<1x3x3x64xbf16>
    tpu.vector_store %arg5[%c0_65, %c0_66, %c0_67, %c0_68], %116 {strides = array<i32>} : memref<1x3x3x64xbf16, #tpu.memory_space<vmem>>, vector<1x3x3x64xbf16>,
    return
  }
  func.func @transform_0(%arg0: i32, %arg1: i32) -> (i32, i32, i32) {
    %c0_i32 = arith.constant 0 : i32
    %c0_i32_0 = arith.constant 0 : i32
    %c0_i32_1 = arith.constant 0 : i32
    return %arg0, %c0_i32, %c0_i32_0 : i32, i32, i32
  }
  func.func @transform_1(%arg0: i32, %arg1: i32) -> (i32, i32, i32) {
    %c0_i32 = arith.constant 0 : i32
    %c0_i32_0 = arith.constant 0 : i32
    %c0_i32_1 = arith.constant 0 : i32
    %c0_i32_2 = arith.constant 0 : i32
    return %c0_i32, %c0_i32_0, %c0_i32_1 : i32, i32, i32
  }
  func.func @transform_2(%arg0: i32, %arg1: i32) -> (i32, i32) {
    %c0_i32 = arith.constant 0 : i32
    %c0_i32_0 = arith.constant 0 : i32
    %c0_i32_1 = arith.constant 0 : i32
    return %c0_i32, %c0_i32_0 : i32, i32
  }
  func.func @transform_3(%arg0: i32, %arg1: i32) -> (i32, i32, i32, i32) {
    %c0_i32 = arith.constant 0 : i32
    %c0_i32_0 = arith.constant 0 : i32
    %c0_i32_1 = arith.constant 0 : i32
    return %arg0, %arg1, %c0_i32, %c0_i32_0 : i32, i32, i32, i32
  }
}

module attributes {stable_mosaic.version = 11 : i64} {
  func.func @_conv_kernel(%arg0: i32, %arg1: i32, %arg2: memref<1x40x64xbf16, #tpu.memory_space<vmem>>, %arg3: memref<2x64x64xbf16, #tpu.memory_space<vmem>>, %arg4: memref<1x32xf32, #tpu.memory_space<vmem>>, %arg5: memref<1x4x4x32xbf16, #tpu.memory_space<vmem>>, %arg6: memref<4x4x32xf32, #tpu.memory_space<vmem>>) attributes {dimension_semantics = [#tpu.dimension_semantics<parallel>, #tpu.dimension_semantics<parallel>], iteration_bounds = array<i64: 2, 1>, scalar_prefetch = 0 : i64, scratch_operands = 1 : i64, tpu.core_type = #tpu.core_type<tc>, window_params = [{transform_indices = @transform_0, window_bounds = array<i64: 1, 40, 64>}, {pipeline_mode = #tpu.pipeline_mode<synchronous>, transform_indices = @transform_1, window_bounds = array<i64: 2, 64, 64>}, {pipeline_mode = #tpu.pipeline_mode<synchronous>, transform_indices = @transform_2, window_bounds = array<i64: 1, 32>}, {transform_indices = @transform_3, window_bounds = array<i64: 1, 4, 4, 32>}]} {
    %c4_i32 = arith.constant 4 : i32
    %0 = arith.muli %arg1, %c4_i32 : i32
    %cst = arith.constant 0.000000e+00 : f32
    %1 = vector.broadcast %cst : f32 to vector<4x4x32xf32>
    %c0 = arith.constant 0 : index
    %c0_0 = arith.constant 0 : index
    %c0_1 = arith.constant 0 : index
    %2 = vector.load %arg6[%c0, %c0_0, %c0_1] : memref<4x4x32xf32, #tpu.memory_space<vmem>>, vector<4x4x32xf32>
    tpu.vector_store %arg6[%c0, %c0_0, %c0_1], %1 {strides = array<i32>} : memref<4x4x32xf32, #tpu.memory_space<vmem>>, vector<4x4x32xf32>,
    %c0_i32 = arith.constant 0 : i32
    %3 = arith.addi %0, %c0_i32 : i32
    %c8_i32 = arith.constant 8 : i32
    %4 = arith.muli %3, %c8_i32 : i32
    %5 = tpu.assume_multiple %4, 8 : i32
    %c0_2 = arith.constant 0 : index
    %6 = arith.index_cast %5 : i32 to index
    %c0_3 = arith.constant 0 : index
    %7 = vector.load %arg2[%c0_2, %6, %c0_3] : memref<1x40x64xbf16, #tpu.memory_space<vmem>>, vector<1x32x64xbf16>
    %8 = vector.shape_cast %7 : vector<1x32x64xbf16> to vector<32x64xbf16>
    %c0_4 = arith.constant 0 : index
    %c0_5 = arith.constant 0 : index
    %c0_6 = arith.constant 0 : index
    %9 = vector.load %arg3[%c0_4, %c0_5, %c0_6] : memref<2x64x64xbf16, #tpu.memory_space<vmem>>, vector<1x64x64xbf16>
    %10 = vector.shape_cast %9 : vector<1x64x64xbf16> to vector<64x64xbf16>
    %cst_7 = arith.constant dense<0.000000e+00> : vector<32x64xf32>
    %11 = tpu.matmul %8, %10, %cst_7 {dimension_numbers = #tpu.dot_dimension_numbers<[1], [0], [0], [1], [0, 0, 1, 1], [], []>} : vector<32x64xbf16>, vector<64x64xbf16>, vector<32x64xf32> -> vector<32x64xf32>
    %12 = vector.shape_cast %11 : vector<32x64xf32> to vector<4x8x64xf32>
    %13 = vector.extract_strided_slice %12 {offsets = [0, 0, 0], sizes = [4, 4, 32], strides = [1, 1, 1]} : vector<4x8x64xf32> to vector<4x4x32xf32>
    %14 = vector.extract_strided_slice %12 {offsets = [0, 1, 32], sizes = [4, 4, 32], strides = [1, 1, 1]} : vector<4x8x64xf32> to vector<4x4x32xf32>
    %15 = arith.addf %13, %14 : vector<4x4x32xf32>
    %c0_8 = arith.constant 0 : index
    %c0_9 = arith.constant 0 : index
    %c0_10 = arith.constant 0 : index
    %16 = vector.load %arg6[%c0_8, %c0_9, %c0_10] : memref<4x4x32xf32, #tpu.memory_space<vmem>>, vector<4x4x32xf32>
    %17 = arith.addf %16, %15 : vector<4x4x32xf32>
    %c0_11 = arith.constant 0 : index
    %c0_12 = arith.constant 0 : index
    %c0_13 = arith.constant 0 : index
    %18 = vector.load %arg6[%c0_11, %c0_12, %c0_13] : memref<4x4x32xf32, #tpu.memory_space<vmem>>, vector<4x4x32xf32>
    tpu.vector_store %arg6[%c0_11, %c0_12, %c0_13], %17 {strides = array<i32>} : memref<4x4x32xf32, #tpu.memory_space<vmem>>, vector<4x4x32xf32>,
    %c1_i32 = arith.constant 1 : i32
    %19 = arith.addi %0, %c1_i32 : i32
    %c8_i32_14 = arith.constant 8 : i32
    %20 = arith.muli %19, %c8_i32_14 : i32
    %21 = tpu.assume_multiple %20, 8 : i32
    %c0_15 = arith.constant 0 : index
    %22 = arith.index_cast %21 : i32 to index
    %c0_16 = arith.constant 0 : index
    %23 = vector.load %arg2[%c0_15, %22, %c0_16] : memref<1x40x64xbf16, #tpu.memory_space<vmem>>, vector<1x32x64xbf16>
    %24 = vector.shape_cast %23 : vector<1x32x64xbf16> to vector<32x64xbf16>
    %c1 = arith.constant 1 : index
    %c0_17 = arith.constant 0 : index
    %c0_18 = arith.constant 0 : index
    %25 = vector.load %arg3[%c1, %c0_17, %c0_18] : memref<2x64x64xbf16, #tpu.memory_space<vmem>>, vector<1x64x64xbf16>
    %26 = vector.shape_cast %25 : vector<1x64x64xbf16> to vector<64x64xbf16>
    %cst_19 = arith.constant dense<0.000000e+00> : vector<32x64xf32>
    %27 = tpu.matmul %24, %26, %cst_19 {dimension_numbers = #tpu.dot_dimension_numbers<[1], [0], [0], [1], [0, 0, 1, 1], [], []>} : vector<32x64xbf16>, vector<64x64xbf16>, vector<32x64xf32> -> vector<32x64xf32>
    %28 = vector.shape_cast %27 : vector<32x64xf32> to vector<4x8x64xf32>
    %29 = vector.extract_strided_slice %28 {offsets = [0, 0, 0], sizes = [4, 4, 32], strides = [1, 1, 1]} : vector<4x8x64xf32> to vector<4x4x32xf32>
    %30 = vector.extract_strided_slice %28 {offsets = [0, 1, 32], sizes = [4, 4, 32], strides = [1, 1, 1]} : vector<4x8x64xf32> to vector<4x4x32xf32>
    %31 = arith.addf %29, %30 : vector<4x4x32xf32>
    %c0_20 = arith.constant 0 : index
    %c0_21 = arith.constant 0 : index
    %c0_22 = arith.constant 0 : index
    %32 = vector.load %arg6[%c0_20, %c0_21, %c0_22] : memref<4x4x32xf32, #tpu.memory_space<vmem>>, vector<4x4x32xf32>
    %33 = arith.addf %32, %31 : vector<4x4x32xf32>
    %c0_23 = arith.constant 0 : index
    %c0_24 = arith.constant 0 : index
    %c0_25 = arith.constant 0 : index
    %34 = vector.load %arg6[%c0_23, %c0_24, %c0_25] : memref<4x4x32xf32, #tpu.memory_space<vmem>>, vector<4x4x32xf32>
    tpu.vector_store %arg6[%c0_23, %c0_24, %c0_25], %33 {strides = array<i32>} : memref<4x4x32xf32, #tpu.memory_space<vmem>>, vector<4x4x32xf32>,
    %c0_26 = arith.constant 0 : index
    %c0_27 = arith.constant 0 : index
    %c0_28 = arith.constant 0 : index
    %35 = vector.load %arg6[%c0_26, %c0_27, %c0_28] : memref<4x4x32xf32, #tpu.memory_space<vmem>>, vector<4x4x32xf32>
    %c0_29 = arith.constant 0 : index
    %c0_30 = arith.constant 0 : index
    %36 = vector.load %arg4[%c0_29, %c0_30] : memref<1x32xf32, #tpu.memory_space<vmem>>, vector<1x32xf32>
    %37 = vector.shape_cast %36 : vector<1x32xf32> to vector<1x1x32xf32>
    %38 = vector.broadcast %37 : vector<1x1x32xf32> to vector<4x4x32xf32>
    %39 = arith.addf %35, %38 : vector<4x4x32xf32>
    %cst_31 = arith.constant dense<0.000000e+00> : vector<4x32xf32>
    %40 = vector.multi_reduction <add>, %39, %cst_31 [0] : vector<4x4x32xf32> to vector<4x32xf32>
    %41 = vector.shape_cast %40 : vector<4x32xf32> to vector<1x4x32xf32>
    %cst_32 = arith.constant dense<0.000000e+00> : vector<1x32xf32>
    %42 = vector.multi_reduction <add>, %41, %cst_32 [1] : vector<1x4x32xf32> to vector<1x32xf32>
    %43 = vector.shape_cast %42 : vector<1x32xf32> to vector<1x1x32xf32>
    %cst_33 = arith.constant 6.250000e-02 : f32
    %44 = vector.broadcast %cst_33 : f32 to vector<1x1x32xf32>
    %45 = arith.mulf %43, %44 : vector<1x1x32xf32>
    %46 = vector.broadcast %45 : vector<1x1x32xf32> to vector<4x4x32xf32>
    %47 = arith.subf %39, %46 : vector<4x4x32xf32>
    %48 = arith.mulf %47, %47 : vector<4x4x32xf32>
    %cst_34 = arith.constant dense<0.000000e+00> : vector<4x32xf32>
    %49 = vector.multi_reduction <add>, %48, %cst_34 [0] : vector<4x4x32xf32> to vector<4x32xf32>
    %50 = vector.shape_cast %49 : vector<4x32xf32> to vector<1x4x32xf32>
    %cst_35 = arith.constant dense<0.000000e+00> : vector<1x32xf32>
    %51 = vector.multi_reduction <add>, %50, %cst_35 [1] : vector<1x4x32xf32> to vector<1x32xf32>
    %52 = vector.shape_cast %51 : vector<1x32xf32> to vector<1x1x32xf32>
    %cst_36 = arith.constant 6.250000e-02 : f32
    %53 = vector.broadcast %cst_36 : f32 to vector<1x1x32xf32>
    %54 = arith.mulf %52, %53 : vector<1x1x32xf32>
    %cst_37 = arith.constant 9.99999974E-6 : f32
    %55 = vector.broadcast %cst_37 : f32 to vector<1x1x32xf32>
    %56 = arith.addf %54, %55 : vector<1x1x32xf32>
    %57 = math.rsqrt %56 : vector<1x1x32xf32>
    %58 = vector.broadcast %57 : vector<1x1x32xf32> to vector<4x4x32xf32>
    %59 = arith.mulf %47, %58 : vector<4x4x32xf32>
    %cst_38 = arith.constant 0.000000e+00 : f32
    %60 = vector.broadcast %cst_38 : f32 to vector<4x4x32xf32>
    %61 = arith.cmpf oge, %59, %60 : vector<4x4x32xf32>
    %cst_39 = arith.constant 2.000000e-01 : f32
    %62 = vector.broadcast %cst_39 : f32 to vector<4x4x32xf32>
    %63 = arith.mulf %62, %59 : vector<4x4x32xf32>
    %64 = arith.select %61, %59, %63 : vector<4x4x32xi1>, vector<4x4x32xf32>
    %65 = arith.truncf %64 : vector<4x4x32xf32> to vector<4x4x32xbf16>
    %c0_40 = arith.constant 0 : index
    %c0_41 = arith.constant 0 : index
    %c0_42 = arith.constant 0 : index
    %c0_43 = arith.constant 0 : index
    %66 = vector.load %arg5[%c0_40, %c0_41, %c0_42, %c0_43] : memref<1x4x4x32xbf16, #tpu.memory_space<vmem>>, vector<1x4x4x32xbf16>
    %67 = vector.shape_cast %66 : vector<1x4x4x32xbf16> to vector<4x4x32xbf16>
    %68 = vector.shape_cast %65 : vector<4x4x32xbf16> to vector<1x4x4x32xbf16>
    tpu.vector_store %arg5[%c0_40, %c0_41, %c0_42, %c0_43], %68 {strides = array<i32>} : memref<1x4x4x32xbf16, #tpu.memory_space<vmem>>, vector<1x4x4x32xbf16>,
    return
  }
  func.func @transform_0(%arg0: i32, %arg1: i32) -> (i32, i32, i32) {
    %c0_i32 = arith.constant 0 : i32
    %c0_i32_0 = arith.constant 0 : i32
    %c0_i32_1 = arith.constant 0 : i32
    return %arg0, %c0_i32, %c0_i32_0 : i32, i32, i32
  }
  func.func @transform_1(%arg0: i32, %arg1: i32) -> (i32, i32, i32) {
    %c0_i32 = arith.constant 0 : i32
    %c0_i32_0 = arith.constant 0 : i32
    %c0_i32_1 = arith.constant 0 : i32
    %c0_i32_2 = arith.constant 0 : i32
    return %c0_i32, %c0_i32_0, %c0_i32_1 : i32, i32, i32
  }
  func.func @transform_2(%arg0: i32, %arg1: i32) -> (i32, i32) {
    %c0_i32 = arith.constant 0 : i32
    %c0_i32_0 = arith.constant 0 : i32
    %c0_i32_1 = arith.constant 0 : i32
    return %c0_i32, %c0_i32_0 : i32, i32
  }
  func.func @transform_3(%arg0: i32, %arg1: i32) -> (i32, i32, i32, i32) {
    %c0_i32 = arith.constant 0 : i32
    %c0_i32_0 = arith.constant 0 : i32
    %c0_i32_1 = arith.constant 0 : i32
    return %arg0, %arg1, %c0_i32, %c0_i32_0 : i32, i32, i32, i32
  }
}

module attributes {stable_mosaic.version = 11 : i64} {
  func.func @_conv_kernel(%arg0: i32, %arg1: i32, %arg2: memref<1x40x64xbf16, #tpu.memory_space<vmem>>, %arg3: memref<4x64x4xbf16, #tpu.memory_space<vmem>>, %arg4: memref<1x1xf32, #tpu.memory_space<vmem>>, %arg5: memref<1x2x2x1xf32, #tpu.memory_space<vmem>>, %arg6: memref<2x2x1xf32, #tpu.memory_space<vmem>>) attributes {dimension_semantics = [#tpu.dimension_semantics<parallel>, #tpu.dimension_semantics<parallel>], iteration_bounds = array<i64: 2, 1>, scalar_prefetch = 0 : i64, scratch_operands = 1 : i64, tpu.core_type = #tpu.core_type<tc>, window_params = [{transform_indices = @transform_0, window_bounds = array<i64: 1, 40, 64>}, {pipeline_mode = #tpu.pipeline_mode<synchronous>, transform_indices = @transform_1, window_bounds = array<i64: 4, 64, 4>}, {pipeline_mode = #tpu.pipeline_mode<synchronous>, transform_indices = @transform_2, window_bounds = array<i64: 1, 1>}, {transform_indices = @transform_3, window_bounds = array<i64: 1, 2, 2, 1>}]} {
    %c2_i32 = arith.constant 2 : i32
    %0 = arith.muli %arg1, %c2_i32 : i32
    %cst = arith.constant 0.000000e+00 : f32
    %1 = vector.broadcast %cst : f32 to vector<2x2x1xf32>
    %c0 = arith.constant 0 : index
    %c0_0 = arith.constant 0 : index
    %c0_1 = arith.constant 0 : index
    %2 = vector.load %arg6[%c0, %c0_0, %c0_1] : memref<2x2x1xf32, #tpu.memory_space<vmem>>, vector<2x2x1xf32>
    tpu.vector_store %arg6[%c0, %c0_0, %c0_1], %1 {strides = array<i32>} : memref<2x2x1xf32, #tpu.memory_space<vmem>>, vector<2x2x1xf32>,
    %c0_i32 = arith.constant 0 : i32
    %3 = arith.addi %0, %c0_i32 : i32
    %c8_i32 = arith.constant 8 : i32
    %4 = arith.muli %3, %c8_i32 : i32
    %5 = tpu.assume_multiple %4, 8 : i32
    %c0_2 = arith.constant 0 : index
    %6 = arith.index_cast %5 : i32 to index
    %c0_3 = arith.constant 0 : index
    %7 = vector.load %arg2[%c0_2, %6, %c0_3] : memref<1x40x64xbf16, #tpu.memory_space<vmem>>, vector<1x16x64xbf16>
    %8 = vector.shape_cast %7 : vector<1x16x64xbf16> to vector<16x64xbf16>
    %c0_4 = arith.constant 0 : index
    %c0_5 = arith.constant 0 : index
    %c0_6 = arith.constant 0 : index
    %9 = vector.load %arg3[%c0_4, %c0_5, %c0_6] : memref<4x64x4xbf16, #tpu.memory_space<vmem>>, vector<1x64x4xbf16>
    %10 = vector.shape_cast %9 : vector<1x64x4xbf16> to vector<64x4xbf16>
    %cst_7 = arith.constant dense<0.000000e+00> : vector<16x4xf32>
    %11 = tpu.matmul %8, %10, %cst_7 {dimension_numbers = #tpu.dot_dimension_numbers<[1], [0], [0], [1], [0, 0, 1, 1], [], []>} : vector<16x64xbf16>, vector<64x4xbf16>, vector<16x4xf32> -> vector<16x4xf32>
    %12 = vector.shape_cast %11 : vector<16x4xf32> to vector<2x8x4xf32>
    %13 = vector.extract_strided_slice %12 {offsets = [0, 0, 0], sizes = [2, 2, 1], strides = [1, 1, 1]} : vector<2x8x4xf32> to vector<2x2x1xf32>
    %14 = vector.extract_strided_slice %12 {offsets = [0, 1, 1], sizes = [2, 2, 1], strides = [1, 1, 1]} : vector<2x8x4xf32> to vector<2x2x1xf32>
    %15 = arith.addf %13, %14 : vector<2x2x1xf32>
    %16 = vector.extract_strided_slice %12 {offsets = [0, 2, 2], sizes = [2, 2, 1], strides = [1, 1, 1]} : vector<2x8x4xf32> to vector<2x2x1xf32>
    %17 = arith.addf %15, %16 : vector<2x2x1xf32>
    %18 = vector.extract_strided_slice %12 {offsets = [0, 3, 3], sizes = [2, 2, 1], strides = [1, 1, 1]} : vector<2x8x4xf32> to vector<2x2x1xf32>
    %19 = arith.addf %17, %18 : vector<2x2x1xf32>
    %c0_8 = arith.constant 0 : index
    %c0_9 = arith.constant 0 : index
    %c0_10 = arith.constant 0 : index
    %20 = vector.load %arg6[%c0_8, %c0_9, %c0_10] : memref<2x2x1xf32, #tpu.memory_space<vmem>>, vector<2x2x1xf32>
    %21 = arith.addf %20, %19 : vector<2x2x1xf32>
    %c0_11 = arith.constant 0 : index
    %c0_12 = arith.constant 0 : index
    %c0_13 = arith.constant 0 : index
    %22 = vector.load %arg6[%c0_11, %c0_12, %c0_13] : memref<2x2x1xf32, #tpu.memory_space<vmem>>, vector<2x2x1xf32>
    tpu.vector_store %arg6[%c0_11, %c0_12, %c0_13], %21 {strides = array<i32>} : memref<2x2x1xf32, #tpu.memory_space<vmem>>, vector<2x2x1xf32>,
    %c1_i32 = arith.constant 1 : i32
    %23 = arith.addi %0, %c1_i32 : i32
    %c8_i32_14 = arith.constant 8 : i32
    %24 = arith.muli %23, %c8_i32_14 : i32
    %25 = tpu.assume_multiple %24, 8 : i32
    %c0_15 = arith.constant 0 : index
    %26 = arith.index_cast %25 : i32 to index
    %c0_16 = arith.constant 0 : index
    %27 = vector.load %arg2[%c0_15, %26, %c0_16] : memref<1x40x64xbf16, #tpu.memory_space<vmem>>, vector<1x16x64xbf16>
    %28 = vector.shape_cast %27 : vector<1x16x64xbf16> to vector<16x64xbf16>
    %c1 = arith.constant 1 : index
    %c0_17 = arith.constant 0 : index
    %c0_18 = arith.constant 0 : index
    %29 = vector.load %arg3[%c1, %c0_17, %c0_18] : memref<4x64x4xbf16, #tpu.memory_space<vmem>>, vector<1x64x4xbf16>
    %30 = vector.shape_cast %29 : vector<1x64x4xbf16> to vector<64x4xbf16>
    %cst_19 = arith.constant dense<0.000000e+00> : vector<16x4xf32>
    %31 = tpu.matmul %28, %30, %cst_19 {dimension_numbers = #tpu.dot_dimension_numbers<[1], [0], [0], [1], [0, 0, 1, 1], [], []>} : vector<16x64xbf16>, vector<64x4xbf16>, vector<16x4xf32> -> vector<16x4xf32>
    %32 = vector.shape_cast %31 : vector<16x4xf32> to vector<2x8x4xf32>
    %33 = vector.extract_strided_slice %32 {offsets = [0, 0, 0], sizes = [2, 2, 1], strides = [1, 1, 1]} : vector<2x8x4xf32> to vector<2x2x1xf32>
    %34 = vector.extract_strided_slice %32 {offsets = [0, 1, 1], sizes = [2, 2, 1], strides = [1, 1, 1]} : vector<2x8x4xf32> to vector<2x2x1xf32>
    %35 = arith.addf %33, %34 : vector<2x2x1xf32>
    %36 = vector.extract_strided_slice %32 {offsets = [0, 2, 2], sizes = [2, 2, 1], strides = [1, 1, 1]} : vector<2x8x4xf32> to vector<2x2x1xf32>
    %37 = arith.addf %35, %36 : vector<2x2x1xf32>
    %38 = vector.extract_strided_slice %32 {offsets = [0, 3, 3], sizes = [2, 2, 1], strides = [1, 1, 1]} : vector<2x8x4xf32> to vector<2x2x1xf32>
    %39 = arith.addf %37, %38 : vector<2x2x1xf32>
    %c0_20 = arith.constant 0 : index
    %c0_21 = arith.constant 0 : index
    %c0_22 = arith.constant 0 : index
    %40 = vector.load %arg6[%c0_20, %c0_21, %c0_22] : memref<2x2x1xf32, #tpu.memory_space<vmem>>, vector<2x2x1xf32>
    %41 = arith.addf %40, %39 : vector<2x2x1xf32>
    %c0_23 = arith.constant 0 : index
    %c0_24 = arith.constant 0 : index
    %c0_25 = arith.constant 0 : index
    %42 = vector.load %arg6[%c0_23, %c0_24, %c0_25] : memref<2x2x1xf32, #tpu.memory_space<vmem>>, vector<2x2x1xf32>
    tpu.vector_store %arg6[%c0_23, %c0_24, %c0_25], %41 {strides = array<i32>} : memref<2x2x1xf32, #tpu.memory_space<vmem>>, vector<2x2x1xf32>,
    %c2_i32_26 = arith.constant 2 : i32
    %43 = arith.addi %0, %c2_i32_26 : i32
    %c8_i32_27 = arith.constant 8 : i32
    %44 = arith.muli %43, %c8_i32_27 : i32
    %45 = tpu.assume_multiple %44, 8 : i32
    %c0_28 = arith.constant 0 : index
    %46 = arith.index_cast %45 : i32 to index
    %c0_29 = arith.constant 0 : index
    %47 = vector.load %arg2[%c0_28, %46, %c0_29] : memref<1x40x64xbf16, #tpu.memory_space<vmem>>, vector<1x16x64xbf16>
    %48 = vector.shape_cast %47 : vector<1x16x64xbf16> to vector<16x64xbf16>
    %c2 = arith.constant 2 : index
    %c0_30 = arith.constant 0 : index
    %c0_31 = arith.constant 0 : index
    %49 = vector.load %arg3[%c2, %c0_30, %c0_31] : memref<4x64x4xbf16, #tpu.memory_space<vmem>>, vector<1x64x4xbf16>
    %50 = vector.shape_cast %49 : vector<1x64x4xbf16> to vector<64x4xbf16>
    %cst_32 = arith.constant dense<0.000000e+00> : vector<16x4xf32>
    %51 = tpu.matmul %48, %50, %cst_32 {dimension_numbers = #tpu.dot_dimension_numbers<[1], [0], [0], [1], [0, 0, 1, 1], [], []>} : vector<16x64xbf16>, vector<64x4xbf16>, vector<16x4xf32> -> vector<16x4xf32>
    %52 = vector.shape_cast %51 : vector<16x4xf32> to vector<2x8x4xf32>
    %53 = vector.extract_strided_slice %52 {offsets = [0, 0, 0], sizes = [2, 2, 1], strides = [1, 1, 1]} : vector<2x8x4xf32> to vector<2x2x1xf32>
    %54 = vector.extract_strided_slice %52 {offsets = [0, 1, 1], sizes = [2, 2, 1], strides = [1, 1, 1]} : vector<2x8x4xf32> to vector<2x2x1xf32>
    %55 = arith.addf %53, %54 : vector<2x2x1xf32>
    %56 = vector.extract_strided_slice %52 {offsets = [0, 2, 2], sizes = [2, 2, 1], strides = [1, 1, 1]} : vector<2x8x4xf32> to vector<2x2x1xf32>
    %57 = arith.addf %55, %56 : vector<2x2x1xf32>
    %58 = vector.extract_strided_slice %52 {offsets = [0, 3, 3], sizes = [2, 2, 1], strides = [1, 1, 1]} : vector<2x8x4xf32> to vector<2x2x1xf32>
    %59 = arith.addf %57, %58 : vector<2x2x1xf32>
    %c0_33 = arith.constant 0 : index
    %c0_34 = arith.constant 0 : index
    %c0_35 = arith.constant 0 : index
    %60 = vector.load %arg6[%c0_33, %c0_34, %c0_35] : memref<2x2x1xf32, #tpu.memory_space<vmem>>, vector<2x2x1xf32>
    %61 = arith.addf %60, %59 : vector<2x2x1xf32>
    %c0_36 = arith.constant 0 : index
    %c0_37 = arith.constant 0 : index
    %c0_38 = arith.constant 0 : index
    %62 = vector.load %arg6[%c0_36, %c0_37, %c0_38] : memref<2x2x1xf32, #tpu.memory_space<vmem>>, vector<2x2x1xf32>
    tpu.vector_store %arg6[%c0_36, %c0_37, %c0_38], %61 {strides = array<i32>} : memref<2x2x1xf32, #tpu.memory_space<vmem>>, vector<2x2x1xf32>,
    %c3_i32 = arith.constant 3 : i32
    %63 = arith.addi %0, %c3_i32 : i32
    %c8_i32_39 = arith.constant 8 : i32
    %64 = arith.muli %63, %c8_i32_39 : i32
    %65 = tpu.assume_multiple %64, 8 : i32
    %c0_40 = arith.constant 0 : index
    %66 = arith.index_cast %65 : i32 to index
    %c0_41 = arith.constant 0 : index
    %67 = vector.load %arg2[%c0_40, %66, %c0_41] : memref<1x40x64xbf16, #tpu.memory_space<vmem>>, vector<1x16x64xbf16>
    %68 = vector.shape_cast %67 : vector<1x16x64xbf16> to vector<16x64xbf16>
    %c3 = arith.constant 3 : index
    %c0_42 = arith.constant 0 : index
    %c0_43 = arith.constant 0 : index
    %69 = vector.load %arg3[%c3, %c0_42, %c0_43] : memref<4x64x4xbf16, #tpu.memory_space<vmem>>, vector<1x64x4xbf16>
    %70 = vector.shape_cast %69 : vector<1x64x4xbf16> to vector<64x4xbf16>
    %cst_44 = arith.constant dense<0.000000e+00> : vector<16x4xf32>
    %71 = tpu.matmul %68, %70, %cst_44 {dimension_numbers = #tpu.dot_dimension_numbers<[1], [0], [0], [1], [0, 0, 1, 1], [], []>} : vector<16x64xbf16>, vector<64x4xbf16>, vector<16x4xf32> -> vector<16x4xf32>
    %72 = vector.shape_cast %71 : vector<16x4xf32> to vector<2x8x4xf32>
    %73 = vector.extract_strided_slice %72 {offsets = [0, 0, 0], sizes = [2, 2, 1], strides = [1, 1, 1]} : vector<2x8x4xf32> to vector<2x2x1xf32>
    %74 = vector.extract_strided_slice %72 {offsets = [0, 1, 1], sizes = [2, 2, 1], strides = [1, 1, 1]} : vector<2x8x4xf32> to vector<2x2x1xf32>
    %75 = arith.addf %73, %74 : vector<2x2x1xf32>
    %76 = vector.extract_strided_slice %72 {offsets = [0, 2, 2], sizes = [2, 2, 1], strides = [1, 1, 1]} : vector<2x8x4xf32> to vector<2x2x1xf32>
    %77 = arith.addf %75, %76 : vector<2x2x1xf32>
    %78 = vector.extract_strided_slice %72 {offsets = [0, 3, 3], sizes = [2, 2, 1], strides = [1, 1, 1]} : vector<2x8x4xf32> to vector<2x2x1xf32>
    %79 = arith.addf %77, %78 : vector<2x2x1xf32>
    %c0_45 = arith.constant 0 : index
    %c0_46 = arith.constant 0 : index
    %c0_47 = arith.constant 0 : index
    %80 = vector.load %arg6[%c0_45, %c0_46, %c0_47] : memref<2x2x1xf32, #tpu.memory_space<vmem>>, vector<2x2x1xf32>
    %81 = arith.addf %80, %79 : vector<2x2x1xf32>
    %c0_48 = arith.constant 0 : index
    %c0_49 = arith.constant 0 : index
    %c0_50 = arith.constant 0 : index
    %82 = vector.load %arg6[%c0_48, %c0_49, %c0_50] : memref<2x2x1xf32, #tpu.memory_space<vmem>>, vector<2x2x1xf32>
    tpu.vector_store %arg6[%c0_48, %c0_49, %c0_50], %81 {strides = array<i32>} : memref<2x2x1xf32, #tpu.memory_space<vmem>>, vector<2x2x1xf32>,
    %c0_51 = arith.constant 0 : index
    %c0_52 = arith.constant 0 : index
    %c0_53 = arith.constant 0 : index
    %83 = vector.load %arg6[%c0_51, %c0_52, %c0_53] : memref<2x2x1xf32, #tpu.memory_space<vmem>>, vector<2x2x1xf32>
    %c0_54 = arith.constant 0 : index
    %c0_55 = arith.constant 0 : index
    %84 = vector.load %arg4[%c0_54, %c0_55] : memref<1x1xf32, #tpu.memory_space<vmem>>, vector<1x1xf32>
    %85 = vector.shape_cast %84 : vector<1x1xf32> to vector<1x1x1xf32>
    %86 = vector.broadcast %85 : vector<1x1x1xf32> to vector<2x2x1xf32>
    %87 = arith.addf %83, %86 : vector<2x2x1xf32>
    %c0_56 = arith.constant 0 : index
    %c0_57 = arith.constant 0 : index
    %c0_58 = arith.constant 0 : index
    %c0_59 = arith.constant 0 : index
    %88 = vector.load %arg5[%c0_56, %c0_57, %c0_58, %c0_59] : memref<1x2x2x1xf32, #tpu.memory_space<vmem>>, vector<1x2x2x1xf32>
    %89 = vector.shape_cast %88 : vector<1x2x2x1xf32> to vector<2x2x1xf32>
    %90 = vector.shape_cast %87 : vector<2x2x1xf32> to vector<1x2x2x1xf32>
    tpu.vector_store %arg5[%c0_56, %c0_57, %c0_58, %c0_59], %90 {strides = array<i32>} : memref<1x2x2x1xf32, #tpu.memory_space<vmem>>, vector<1x2x2x1xf32>,
    return
  }
  func.func @transform_0(%arg0: i32, %arg1: i32) -> (i32, i32, i32) {
    %c0_i32 = arith.constant 0 : i32
    %c0_i32_0 = arith.constant 0 : i32
    %c0_i32_1 = arith.constant 0 : i32
    return %arg0, %c0_i32, %c0_i32_0 : i32, i32, i32
  }
  func.func @transform_1(%arg0: i32, %arg1: i32) -> (i32, i32, i32) {
    %c0_i32 = arith.constant 0 : i32
    %c0_i32_0 = arith.constant 0 : i32
    %c0_i32_1 = arith.constant 0 : i32
    %c0_i32_2 = arith.constant 0 : i32
    return %c0_i32, %c0_i32_0, %c0_i32_1 : i32, i32, i32
  }
  func.func @transform_2(%arg0: i32, %arg1: i32) -> (i32, i32) {
    %c0_i32 = arith.constant 0 : i32
    %c0_i32_0 = arith.constant 0 : i32
    %c0_i32_1 = arith.constant 0 : i32
    return %c0_i32, %c0_i32_0 : i32, i32
  }
  func.func @transform_3(%arg0: i32, %arg1: i32) -> (i32, i32, i32, i32) {
    %c0_i32 = arith.constant 0 : i32
    %c0_i32_0 = arith.constant 0 : i32
    %c0_i32_1 = arith.constant 0 : i32
    return %arg0, %arg1, %c0_i32, %c0_i32_0 : i32, i32, i32, i32
  }
}

</mosaic_0001>

<bundles_post_ra>
// kernel: path_discriminator_forward.5
= control target key start
LH: loop header
LB: loop body
LE: loop exit
PB: predicated region body
PF: predicated region fallthrough
CT: control target
= control target key end

     0   :  { %s1666_s12 = smov 0   ;;  %s1668_s13 = smov 0   ;;  %s2079_s0 = inlined_call_operand.vmem [shape: bf16[2,408,16], index: 0, kind: input, shape index: {}]   ;;  %s2080_s1 = inlined_call_operand.vmem [shape: bf16[2,16,16], index: 1, kind: input, shape index: {}]   ;;  %s2081_s2 = inlined_call_operand.vmem [shape: f32[1,8], index: 2, kind: input, shape index: {}]   ;;  %s2082_s3 = inlined_call_operand.vmem [shape: bf16[2,16,16,8], index: 3, kind: output, shape index: {}]  }
   0x1   :  { %s1670_s14 = smov 0   ;;  %s1672_s15 = smov 0  }
   0x2   :  { %s1674_s16 = smov 0  }
   0x3 LB: > { %s22_s17 = sadd.s32 1, %s1634_s14  ;;  %s25_s18 = sadd.s32 1, %s1638_s15  ;;  %s1642_s16 = sphi %s1674_s16, %s13_s16   ;;  %s1638_s15 = sphi %s1672_s15, %s2086_s15   ;;  %s1634_s14 = sphi %s1670_s14, %s2085_s14   ;;  %s1630_s13 = sphi %s1668_s13, %s2084_s13   ;;  %s1626_s12 = sphi %s1666_s12, %s2083_s12  }
   0x4   : > { %p23_p0 = scmp.ge.s32.totalorder %s22_s17, 2  ;;  %p1361_p1 = scmp.ge.s32.totalorder %s1642_s16, 1 }
   0x5   : > { %p151_p2 = scmp.lt.s32.totalorder %s1642_s16, 5 }
   0x6   : > { %s2088_s17 = smov (%p23_p0, %s22_s17), 0  ;;  %s2090_s18 = smov (!%p23_p0, %s25_s18), %s1638_s15 }
   0x7   : > { %p152_p3 = pnand %p1361_p1, %p151_p2  ;;  %p27_p4 = scmp.ge.s32.totalorder %s2090_s18, 2 }
   0x8   : > { %v1578_v0 = vld [vmem:[%s2080_s1] sm:$0xff] (!%p152_p3)   ;;  %p180_p5 = scmp.lt.s32.totalorder (!%p152_p3), %s1630_s13, 1  ;;  %v1579_v1 = vld [vmem:[%s2080_s1 + $0x8] sm:$0xff] (!%p152_p3)   ;;  %s215_s23 = smul.u32 (!%p152_p3), 192, %s1626_s12  ;;  %vm312_vm0 = vcmask (!%p152_p3), 130048   ;;  %vm198_vm1 = vcmask (!%p152_p3), 64512  }
   0x9   : > { %s2092_s18 = smov (%p27_p4, %s2090_s18), 0  ;;  %155 = sbr.rel (%p152_p3) target bundleno = 438 (0x1b6), region = 32 }
   0xa   : > { %1483 = vmatprep.subr.bf16.mxu0 (!%p152_p3), %v1578_v0  ;;  %1509 = vmatprep.subr.bf16.mxu1 (!%p152_p3), %v1579_v1  ;;  %s216_s24 = sshra.s32 (!%p152_p3), %s215_s23, 3  ;;  %s1704_s25 = sshll.u32 (!%p152_p3), %s1626_s12, 3  ;;  %v1644_v26 = vmov (!%p152_p3), 0.0   ;;  %vm502_vm2 = vcmask (!%p152_p3), 1046528   ;;  %vm1246_vm4 = vcmask (!%p152_p3), 60416  }
   0xb   : > { %1484 = vmatpush3.bf16.msra.mxu0 (!%p152_p3), %v1578_v0  ;;  %1510 = vmatpush3.bf16.msra.mxu1 (!%p152_p3), %v1579_v1  ;;  %s1368_s27 = sshll.u32 (!%p152_p3), %s216_s24, 2  ;;  %s655_s28 = sadd.s32 (!%p152_p3), 1, %s1704_s25  ;;  %199 = vst.msk [vmem:[#allocation2] sm:$0xff] (!%p152_p3), %vm198_vm1, %v1644_v26  ;;  %200 = vst.msk [vmem:[#allocation2 + $0x8] sm:$0xff] (!%p152_p3), %vm198_vm1, %v1644_v26 }
   0xc   : > { %s656_s5 = smul.u32 (!%p152_p3), 24, %s655_s28  ;;  %201 = vst.msk [vmem:[#allocation2 + $0x10] sm:$0xff] (!%p152_p3), %vm198_vm1, %v1644_v26  ;;  %202 = vst.msk [vmem:[#allocation2 + $0x18] sm:$0xff] (!%p152_p3), %vm198_vm1, %v1644_v26  ;;  %s1645_s10 = smov (!%p152_p3), 120  }
   0xd   : > { %203 = vst.msk [vmem:[#allocation2 + $0x20] sm:$0xff] (!%p152_p3), %vm198_vm1, %v1644_v26  ;;  %204 = vst.msk [vmem:[#allocation2 + $0x28] sm:$0xff] (!%p152_p3), %vm198_vm1, %v1644_v26  ;;  %p188_p6 = scmp.lt.s32.totalorder (!%p152_p3), %s1704_s25, 15 }
   0xe   : > { %s657_s7 = sshra.s32 (!%p152_p3), %s656_s5, 3  ;;  %205 = vst.msk [vmem:[#allocation2 + $0x30] sm:$0xff] (!%p152_p3), %vm198_vm1, %v1644_v26  ;;  %206 = vst.msk [vmem:[#allocation2 + $0x38] sm:$0xff] (!%p152_p3), %vm198_vm1, %v1644_v26 }
   0xf   : > { %s1394_s8 = sshll.u32 (!%p152_p3), %s657_s7, 2  ;;  %207 = vst.msk [vmem:[#allocation2 + $0x40] sm:$0xff] (!%p152_p3), %vm198_vm1, %v1644_v26  ;;  %208 = vst.msk [vmem:[#allocation2 + $0x48] sm:$0xff] (!%p152_p3), %vm198_vm1, %v1644_v26 }
  0x10   : > { %s2094_s13 = smov (!%p180_p5, %s1630_s13), 1  ;;  %209 = vst.msk [vmem:[#allocation2 + $0x50] sm:$0xff] %vm198_vm1, %v1644_v26  ;;  %210 = vst.msk [vmem:[#allocation2 + $0x58] sm:$0xff] %vm198_vm1, %v1644_v26  ;;  %s2096_s25 = smov (!%p188_p6, %s1704_s25), 15 }
  0x11   : > { %s1535_s26 = smul.u32 204, %s2094_s13  ;;  %211 = vst.msk [vmem:[#allocation2 + $0x60] sm:$0xff] %vm198_vm1, %v1644_v26  ;;  %212 = vst.msk [vmem:[#allocation2 + $0x68] sm:$0xff] %vm198_vm1, %v1644_v26  ;;  %s1364_s11 = sshll.u32 %s2096_s25, 1 }
  0x12   : > { %213 = vst.msk [vmem:[#allocation2 + $0x70] sm:$0xff] %vm198_vm1, %v1644_v26  ;;  %214 = vst.msk [vmem:[#allocation2 + $0x78] sm:$0xff] %vm198_vm1, %v1644_v26  ;;  %s1365_s12 = sshll.u32 %s2094_s13, 5 }
  0x13   : > { %s184_s4 = scalar_lea.vmem %s2079_s0, %s1535_s26  ;;  %s192_s21 = sadd.s32 %s1365_s12, %s1364_s11 }
  0x14   : > { %s1711_s6 = scalar_lea.vmem %s184_s4, %s1368_s27  ;;  %s1716_s9 = scalar_lea.vmem %s184_s4, %s1394_s8 }
  0x15   : > { %v1580_v2 = vld [vmem:[%s1711_s6] sm:$0xff]   ;;  %v1582_v3 = vld [vmem:[%s1711_s6 + $0x8] sm:$0xff]   ;;  %v1584_v4 = vld [vmem:[%s1711_s6 + $0x10] sm:$0xff]   ;;  %s1366_s13 = sshll.u32 %s192_s21, 2 }
  0x16   : > { %1485 = vmatprep.mubr.msk.bf16.mxu0 %vm312_vm0, %v1580_v2  ;;  %v1581_v5 = vld [vmem:[%s1716_s9] sm:$0xff]   ;;  %v1583_v6 = vld [vmem:[%s1716_s9 + $0x8] sm:$0xff]   ;;  %v1585_v7 = vld [vmem:[%s1716_s9 + $0x10] sm:$0xff]   ;;  %s1972_s24 = scalar_lea.vmem %s2082_s3, %s1366_s13 }
  0x17   : > { %1486 = vmatmul.mubr.msk.bf16.vlgmr.msra.gmra.mrb[0].mxu0 %vm312_vm0, %v1582_v3  ;;  %1511 = vmatprep.mubr.msk.bf16.mxu1 %vm312_vm0, %v1581_v5  ;;  %v1586_v8 = vld [vmem:[%s1711_s6 + $0x18] sm:$0xff]   ;;  %v1588_v9 = vld [vmem:[%s1711_s6 + $0x20] sm:$0xff]   ;;  %v1590_v12 = vld [vmem:[%s1711_s6 + $0x28] sm:$0xff]  }
  0x18   : > { %1489 = vmatprep.mubr.msk.bf16.mxu0 %vm312_vm0, %v1584_v4  ;;  %1512 = vmatmul.mubr.msk.bf16.vlgmr.msra.gmra.mrb[0].mxu1 %vm312_vm0, %v1583_v6  ;;  %v1587_v10 = vld [vmem:[%s1716_s9 + $0x18] sm:$0xff]   ;;  %v1589_v11 = vld [vmem:[%s1716_s9 + $0x20] sm:$0xff]   ;;  %v1592_v13 = vld [vmem:[%s1711_s6 + $0x30] sm:$0xff]  }
  0x19   : > { %1515 = vmatprep.mubr.msk.bf16.mxu1 %vm312_vm0, %v1585_v7  ;;  %v1591_v14 = vld [vmem:[%s1716_s9 + $0x28] sm:$0xff]   ;;  %v1594_v15 = vld [vmem:[%s1716_s9 + $0x30] sm:$0xff]   ;;  %v1593_v16 = vld [vmem:[%s1711_s6 + $0x38] sm:$0xff]  }
  0x1a   : > { %v1596_v17 = vld [vmem:[%s1711_s6 + $0x40] sm:$0xff]   ;;  %v1595_v18 = vld [vmem:[%s1716_s9 + $0x38] sm:$0xff]   ;;  %v1597_v20 = vld [vmem:[%s1711_s6 + $0x48] sm:$0xff]  }
  0x1b   : > { %v1598_v19 = vld [vmem:[%s1716_s9 + $0x40] sm:$0xff]   ;;  %v1600_v21 = vld [vmem:[%s1711_s6 + $0x50] sm:$0xff]   ;;  %v1599_v22 = vld [vmem:[%s1716_s9 + $0x48] sm:$0xff]  }
  0x1c   : > { %v1602_v23 = vld [vmem:[%s1716_s9 + $0x50] sm:$0xff]   ;;  %v1601_v24 = vld [vmem:[%s1711_s6 + $0x58] sm:$0xff]  }
  0x1d   : > { %v1603_v25 = vld [vmem:[%s1716_s9 + $0x58] sm:$0xff]  }
  0x1f   : > { %1490 = vmatmul.mubr.msk.bf16.gmra.mrb[4].mxu0 %vm312_vm0, %v1586_v8 }
  0x20   : > { %1493 = vmatprep.mubr.msk.bf16.mxu0 %vm312_vm0, %v1588_v9  ;;  %1516 = vmatmul.mubr.msk.bf16.gmra.mrb[4].mxu1 %vm312_vm0, %v1587_v10 }
  0x21   : > { %1519 = vmatprep.mubr.msk.bf16.mxu1 %vm312_vm0, %v1589_v11 }
  0x27   : > { %1494 = vmatmul.mubr.msk.bf16.gmra.mrb[8].mxu0 %vm312_vm0, %v1590_v12 }
  0x28   : > { %1497 = vmatprep.mubr.msk.bf16.mxu0 %vm312_vm0, %v1592_v13  ;;  %1520 = vmatmul.mubr.msk.bf16.gmra.mrb[8].mxu1 %vm312_vm0, %v1591_v14 }
  0x29   : > { %1523 = vmatprep.mubr.msk.bf16.mxu1 %vm312_vm0, %v1594_v15 }
  0x2f   : > { %1498 = vmatmul.mubr.msk.bf16.gmra.mrb[12].mxu0 %vm312_vm0, %v1593_v16 }
  0x30   : > { %1501 = vmatprep.mubr.msk.bf16.mxu0 %vm312_vm0, %v1596_v17  ;;  %1524 = vmatmul.mubr.msk.bf16.gmra.mrb[12].mxu1 %vm312_vm0, %v1595_v18 }
  0x31   : > { %1527 = vmatprep.mubr.msk.bf16.mxu1 %vm312_vm0, %v1598_v19 }
  0x37   : > { %1502 = vmatmul.mubr.msk.bf16.gmra.mrb[16].mxu0 %vm312_vm0, %v1597_v20 }
  0x38   : > { %1505 = vmatprep.mubr.msk.bf16.mxu0 %vm312_vm0, %v1600_v21  ;;  %1528 = vmatmul.mubr.msk.bf16.gmra.mrb[16].mxu1 %vm312_vm0, %v1599_v22 }
  0x39   : > { %1531 = vmatprep.mubr.msk.bf16.mxu1 %vm312_vm0, %v1602_v23 }
  0x3f   : > { %1506 = vmatmul.mubr.msk.bf16.gmra.mrb[20].mxu0 %vm312_vm0, %v1601_v24 }
  0x40   : > { %1532 = vmatmul.mubr.msk.bf16.gmra.mrb[20].mxu1 %vm312_vm0, %v1603_v25 }
  0xea   : > { %v1487_v27 = vpop.f32.mrb[0].mxu0 }
  0xeb   : > { %v1779_v28 = vpop.f32.mrb[1].mxu0  ;;  %v1513_v30 = vpop.f32.mrb[0].mxu1  ;;  %v506_v32 = vrot.slane %v1487_v27, 1 }
  0xec   : > { %v1781_v29 = vpop.f32.mrb[2].mxu0  ;;  %v503_v33 = vrot.slane %v1779_v28, 1  ;;  %v1786_v34 = vpop.f32.mrb[1].mxu1  ;;  %v946_v36 = vrot.slane %v1513_v30, 1 }
  0xed   : > { %v1783_v31 = vpop.f32.mrb[3].mxu0  ;;  %v943_v37 = vrot.slane %v1786_v34, 1  ;;  %v1790_v38 = vpop.f32.mrb[2].mxu1  ;;  %v508_v47 = vrot.slane %v1781_v29, 1 }
  0xee   : > { %v504_v35 = vrot.slane %v1783_v31, 1  ;;  %v1792_v39 = vpop.f32.mrb[3].mxu1  ;;  %v948_v58 = vrot.slane %v1790_v38, 1 }
  0xef   : > { %v944_v42 = vrot.slane %v1792_v39, 1 }
  0xf0   : > { %v505_v40 = vsel %vm502_vm2, %v503_v33, %v504_v35  ;;  %v507_v41 = vsel %vm502_vm2, %v504_v35, %v506_v32 }
  0xf1   : > { %543 = vrot.lane.b32.xlu0 %v505_v40, %s1645_s10  ;;  %v947_v44 = vsel %vm502_vm2, %v944_v42, %v946_v36  ;;  %v945_v46 = vsel %vm502_vm2, %v943_v37, %v944_v42 }
  0xf2   : > { %v1798_v43 = vpop.f32.mrb[4].mxu0  ;;  %985 = vrot.lane.b32.xlu1 %v947_v44, %s1645_s10 }
  0xf3   : > { %v1801_v45 = vpop.f32.mrb[5].mxu0  ;;  %v513_v50 = vrot.slane %v1798_v43, 1  ;;  %v1810_v51 = vpop.f32.mrb[4].mxu1 }
  0xf4   : > { %v509_v48 = vrot.slane %v1801_v45, 1  ;;  %v1807_v49 = vpop.f32.mrb[6].mxu0  ;;  %v953_v54 = vrot.slane %v1810_v51, 1  ;;  %v1815_v55 = vpop.f32.mrb[5].mxu1 }
  0xf5   : > { %v514_v52 = vrot.slane %v1807_v49, 1  ;;  %545 = vrot.lane.b32.xlu0 %v507_v41, %s1645_s10  ;;  %v402_v53 = vpop.f32.mrb[7].mxu0  ;;  %v949_v59 = vrot.slane %v1815_v55, 1  ;;  %v1820_v60 = vpop.f32.mrb[6].mxu1 }
  0xf6   : > { %v511_v56 = vrot.slane %v402_v53, 1  ;;  %v510_v57 = vsel %vm502_vm2, %v508_v47, %v509_v48  ;;  %v954_v62 = vrot.slane %v1820_v60, 1  ;;  %v843_v63 = vpop.f32.mrb[7].mxu1 }
  0xf7   : > { %v515_v61 = vsel %vm502_vm2, %v513_v50, %v514_v52  ;;  %547 = vrot.lane.b32.xlu1 %v510_v57, %s1645_s10  ;;  %v951_v1 = vrot.slane %v843_v63, 1  ;;  %v950_v2 = vsel %vm502_vm2, %v948_v58, %v949_v59 }
  0xf8   : > { %v512_v0 = vsel %vm502_vm2, %v509_v48, %v511_v56  ;;  %v955_v4 = vsel %vm502_vm2, %v953_v54, %v954_v62 }
  0xf9   : > { %983 = vrot.lane.b32.xlu0 %v945_v46, %s1645_s10  ;;  %v952_v7 = vsel %vm502_vm2, %v949_v59, %v951_v1 }
  0xfa   : > { %v1828_v3 = vpop.f32.mrb[8].mxu0 }
  0xfb   : > { %v519_v5 = vrot.slane %v1828_v3, 1  ;;  %v415_v6 = vpop.f32.mrb[9].mxu0  ;;  %549 = vrot.lane.b32.xlu1 %v512_v0, %s1645_s10  ;;  %v1834_v10 = vpop.f32.mrb[8].mxu1 }
  0xfc   : > { %v516_v8 = vrot.slane %v415_v6, 1  ;;  %v1496_v9 = vpop.f32.mrb[10].mxu0  ;;  %v959_v13 = vrot.slane %v1834_v10, 1  ;;  %v856_v14 = vpop.f32.mrb[9].mxu1 }
  0xfd   : > { %987 = vrot.lane.b32.xlu0 %v950_v2, %s1645_s10  ;;  %v521_v11 = vrot.slane %v1496_v9, 1  ;;  %v1837_v12 = vpop.f32.mrb[11].mxu0  ;;  %v956_v17 = vrot.slane %v856_v14, 1  ;;  %v1522_v18 = vpop.f32.mrb[10].mxu1 }
  0xfe   : > { %v518_v15 = vrot.slane %v1837_v12, 1  ;;  %v517_v16 = vsel %vm502_vm2, %v514_v52, %v516_v8  ;;  %v961_v20 = vrot.slane %v1522_v18, 1  ;;  %v1844_v21 = vpop.f32.mrb[11].mxu1 }
  0xff   : > { %v522_v19 = vsel %vm502_vm2, %v519_v5, %v521_v11  ;;  %989 = vrot.lane.b32.xlu1 %v952_v7, %s1645_s10  ;;  %v958_v23 = vrot.slane %v1844_v21, 1  ;;  %v957_v24 = vsel %vm502_vm2, %v954_v62, %v956_v17 }
 0x100   : > { %v520_v22 = vsel %vm502_vm2, %v518_v15, %v519_v5  ;;  %v962_v26 = vsel %vm502_vm2, %v959_v13, %v961_v20 }
 0x101   : > { %551 = vrot.lane.b32.xlu0 %v515_v61, %s1645_s10  ;;  %v960_v30 = vsel %vm502_vm2, %v958_v23, %v959_v13 }
 0x102   : > { %v1499_v25 = vpop.f32.mrb[12].mxu0 }
 0x103   : > { %v1851_v27 = vpop.f32.mrb[13].mxu0  ;;  %553 = vrot.lane.b32.xlu1 %v517_v16, %s1645_s10  ;;  %v526_v32 = vrot.slane %v1499_v25, 1  ;;  %v1525_v37 = vpop.f32.mrb[12].mxu1 }
 0x104   : > { %v523_v33 = vrot.slane %v1851_v27, 1  ;;  %v1856_v35 = vpop.f32.mrb[14].mxu0  ;;  %v1862_v41 = vpop.f32.mrb[13].mxu1  ;;  %v966_v42 = vrot.slane %v1525_v37, 1 }
 0x105   : > { %991 = vrot.lane.b32.xlu0 %v955_v4, %s1645_s10  ;;  %v1859_v36 = vpop.f32.mrb[15].mxu0  ;;  %v963_v44 = vrot.slane %v1862_v41, 1  ;;  %v1865_v46 = vpop.f32.mrb[14].mxu1  ;;  %v528_v53 = vrot.slane %v1856_v35, 1 }
 0x106   : > { %v524_v40 = vrot.slane %v1859_v36, 1  ;;  %v1868_v47 = vpop.f32.mrb[15].mxu1  ;;  %v968_v63 = vrot.slane %v1865_v46, 1 }
 0x107   : > { %993 = vrot.lane.b32.xlu1 %v957_v24, %s1645_s10  ;;  %v964_v52 = vrot.slane %v1868_v47, 1 }
 0x108   : > { %v525_v48 = vsel %vm502_vm2, %v523_v33, %v524_v40  ;;  %v527_v50 = vsel %vm502_vm2, %v524_v40, %v526_v32 }
 0x109   : > { %555 = vrot.lane.b32.xlu0 %v520_v22, %s1645_s10  ;;  %v965_v58 = vsel %vm502_vm2, %v963_v44, %v964_v52  ;;  %v967_v59 = vsel %vm502_vm2, %v964_v52, %v966_v42 }
 0x10a   : > { %v1875_v54 = vpop.f32.mrb[16].mxu0 }
 0x10b   : > { %v533_v56 = vrot.slane %v1875_v54, 1  ;;  %v1878_v57 = vpop.f32.mrb[17].mxu0  ;;  %557 = vrot.lane.b32.xlu1 %v522_v19, %s1645_s10  ;;  %v1888_v0 = vpop.f32.mrb[16].mxu1 }
 0x10c   : > { %v529_v61 = vrot.slane %v1878_v57, 1  ;;  %v1884_v62 = vpop.f32.mrb[18].mxu0  ;;  %v973_v4 = vrot.slane %v1888_v0, 1  ;;  %v1892_v5 = vpop.f32.mrb[17].mxu1 }
 0x10d   : > { %995 = vrot.lane.b32.xlu0 %v960_v30, %s1645_s10  ;;  %v534_v1 = vrot.slane %v1884_v62, 1  ;;  %v450_v2 = vpop.f32.mrb[19].mxu0  ;;  %v969_v8 = vrot.slane %v1892_v5, 1  ;;  %v1896_v9 = vpop.f32.mrb[18].mxu1 }
 0x10e   : > { %v531_v6 = vrot.slane %v450_v2, 1  ;;  %v530_v7 = vsel %vm502_vm2, %v528_v53, %v529_v61  ;;  %v974_v13 = vrot.slane %v1896_v9, 1  ;;  %v891_v15 = vpop.f32.mrb[19].mxu1 }
 0x10f   : > { %v535_v11 = vsel %vm502_vm2, %v533_v56, %v534_v1  ;;  %997 = vrot.lane.b32.xlu1 %v962_v26, %s1645_s10  ;;  %v971_v16 = vrot.slane %v891_v15, 1  ;;  %v970_v17 = vsel %vm502_vm2, %v968_v63, %v969_v8  ;;  %v609_v15 = vld [vmem:[#allocation2 + $0x10] sm:$0xff] }
 0x110   : > { %v532_v14 = vsel %vm502_vm2, %v529_v61, %v531_v6  ;;  %v975_v19 = vsel %vm502_vm2, %v973_v4, %v974_v13 }
 0x111   : > { %559 = vrot.lane.b32.xlu0 %v525_v48, %s1645_s10  ;;  %v972_v23 = vsel %vm502_vm2, %v969_v8, %v971_v16  ;;  %v608_v8 = vld [vmem:[#allocation2 + $0x8] sm:$0xff] }
 0x112   : > { %v1904_v18 = vpop.f32.mrb[20].mxu0 }
 0x113   : > { %v539_v20 = vrot.slane %v1904_v18, 1  ;;  %v463_v22 = vpop.f32.mrb[21].mxu0  ;;  %561 = vrot.lane.b32.xlu1 %v527_v50, %s1645_s10  ;;  %v1913_v32 = vpop.f32.mrb[20].mxu1 }
 0x114   : > { %v536_v24 = vrot.slane %v463_v22, 1  ;;  %v1508_v25 = vpop.f32.mrb[22].mxu0  ;;  %v979_v37 = vrot.slane %v1913_v32, 1  ;;  %v904_v40 = vpop.f32.mrb[21].mxu1  ;;  %v610_v22 = vld [vmem:[#allocation2 + $0x18] sm:$0xff] }
 0x115   : > { %999 = vrot.lane.b32.xlu0 %v965_v58, %s1645_s10  ;;  %v541_v26 = vrot.slane %v1508_v25, 1  ;;  %v1911_v30 = vpop.f32.mrb[23].mxu0  ;;  %v976_v44 = vrot.slane %v904_v40, 1  ;;  %v1534_v50 = vpop.f32.mrb[22].mxu1 }
 0x116   : > { %v538_v33 = vrot.slane %v1911_v30, 1  ;;  %v537_v42 = vsel %vm502_vm2, %v534_v1, %v536_v24  ;;  %v981_v53 = vrot.slane %v1534_v50, 1  ;;  %v1921_v56 = vpop.f32.mrb[23].mxu1 }
 0x117   : > { %v542_v48 = vsel %vm502_vm2, %v539_v20, %v541_v26  ;;  %1001 = vrot.lane.b32.xlu1 %v967_v59, %s1645_s10  ;;  %v978_v58 = vrot.slane %v1921_v56, 1  ;;  %v977_v61 = vsel %vm502_vm2, %v974_v13, %v976_v44  ;;  %v607_v59 = vld [vmem:[#allocation2] sm:$0xff] }
 0x118   : > { %v540_v52 = vsel %vm502_vm2, %v538_v33, %v539_v20  ;;  %v982_v63 = vsel %vm502_vm2, %v979_v37, %v981_v53 }
 0x119   : > { %563 = vrot.lane.b32.xlu0 %v530_v7, %s1645_s10  ;;  %v980_v1 = vsel %vm502_vm2, %v978_v58, %v979_v37  ;;  %v1959_v58 = vld [vmem:[%s2081_s2] ss:$0 sm:$0xff] }
 0x11b   : > { %565 = vrot.lane.b32.xlu1 %v532_v14, %s1645_s10 }
 0x11d   : > { %567 = vrot.lane.b32.xlu0 %v535_v11, %s1645_s10 }
 0x11f   : > { %569 = vrot.lane.b32.xlu1 %v537_v42, %s1645_s10 }
 0x121   : > { %571 = vrot.lane.b32.xlu0 %v540_v52, %s1645_s10 }
 0x123   : > { %573 = vrot.lane.b32.xlu1 %v542_v48, %s1645_s10 }
 0x125   : > { %1003 = vrot.lane.b32.xlu0 %v970_v17, %s1645_s10 }
 0x127   : > { %1005 = vrot.lane.b32.xlu1 %v972_v23, %s1645_s10 }
 0x129   : > { %1007 = vrot.lane.b32.xlu0 %v975_v19, %s1645_s10 }
 0x12b   : > { %1009 = vrot.lane.b32.xlu1 %v977_v61, %s1645_s10 }
 0x12d   : > { %1011 = vrot.lane.b32.xlu0 %v980_v1, %s1645_s10 }
 0x12f   : > { %1013 = vrot.lane.b32.xlu1 %v982_v63, %s1645_s10 }
 0x163   : > { %v544_v2 = vpop.permute.xlu0 %543 }
 0x164   : > { %v591_v4 = vadd.f32 %v544_v2, %v1779_v28  ;;  %v986_v6 = vpop.permute.xlu1 %985 }
 0x166   : > { %v623_v7 = vadd.f32 %v607_v59, %v591_v4 }
 0x167   : > { %v546_v11 = vpop.permute.xlu0 %545 }
 0x168   : > { %639 = vst.msk [vmem:[#allocation2] sm:$0xff] %vm198_vm1, %v623_v7  ;;  %v592_v13 = vadd.f32 %v546_v11, %v1783_v31 }
 0x169   : > { %v548_v16 = vpop.permute.xlu1 %547 }
 0x16a   : > { %v624_v14 = vadd.f32 %v608_v8, %v592_v13  ;;  %v593_v17 = vadd.f32 %v1781_v29, %v548_v16  ;;  %v1032_v29 = vadd.f32 %v986_v6, %v1792_v39  ;;  %v612_v39 = vld [vmem:[#allocation2 + $0x28] sm:$0xff]  ;;  %v613_v8 = vld [vmem:[#allocation2 + $0x30] sm:$0xff] }
 0x16b   : > { %v984_v19 = vpop.permute.xlu0 %983 }
 0x16c   : > { %640 = vst.msk [vmem:[#allocation2 + $0x8] sm:$0xff] %vm198_vm1, %v624_v14  ;;  %v625_v20 = vadd.f32 %v609_v15, %v593_v17  ;;  %v1031_v28 = vadd.f32 %v984_v19, %v1786_v34  ;;  %v611_v34 = vld [vmem:[#allocation2 + $0x20] sm:$0xff]  ;;  %v614_v19 = vld [vmem:[#allocation2 + $0x38] sm:$0xff] }
 0x16d   : > { %v550_v23 = vpop.permute.xlu1 %549 }
 0x16e   : > { %641 = vst.msk [vmem:[#allocation2 + $0x10] sm:$0xff] %vm198_vm1, %v625_v20  ;;  %v594_v31 = vadd.f32 %v550_v23, %v1801_v45 }
 0x16f   : > { %v1047_v24 = vld [vmem:[#allocation2] sm:$0xff]  ;;  %v988_v25 = vpop.permute.xlu0 %987 }
 0x170   : > { %v1063_v26 = vadd.f32 %v1047_v24, %v1031_v28  ;;  %v626_v33 = vadd.f32 %v610_v22, %v594_v31  ;;  %v1033_v45 = vadd.f32 %v1790_v38, %v988_v25 }
 0x171   : > { %v990_v37 = vpop.permute.xlu1 %989 }
 0x172   : > { %1079 = vst.msk [vmem:[#allocation2] sm:$0xff] %vm198_vm1, %v1063_v26  ;;  %642 = vst.msk [vmem:[#allocation2 + $0x18] sm:$0xff] %vm198_vm1, %v626_v33  ;;  %v1034_v38 = vadd.f32 %v990_v37, %v1815_v55 }
 0x173   : > { %v1048_v40 = vld [vmem:[#allocation2 + $0x8] sm:$0xff]  ;;  %v552_v42 = vpop.permute.xlu0 %551 }
 0x174   : > { %v1064_v44 = vadd.f32 %v1048_v40, %v1032_v29  ;;  %v595_v48 = vadd.f32 %v1798_v43, %v552_v42 }
 0x175   : > { %v1049_v50 = vld [vmem:[#allocation2 + $0x10] sm:$0xff]  ;;  %v554_v53 = vpop.permute.xlu1 %553 }
 0x176   : > { %1080 = vst.msk [vmem:[#allocation2 + $0x8] sm:$0xff] %vm198_vm1, %v1064_v44  ;;  %v627_v52 = vadd.f32 %v611_v34, %v595_v48  ;;  %v1065_v61 = vadd.f32 %v1049_v50, %v1033_v45  ;;  %v596_v63 = vadd.f32 %v1807_v49, %v554_v53  ;;  %v615_v44 = vld [vmem:[#allocation2 + $0x40] sm:$0xff] }
 0x177   : > { %v992_v1 = vpop.permute.xlu0 %991 }
 0x178   : > { %643 = vst.msk [vmem:[#allocation2 + $0x20] sm:$0xff] %vm198_vm1, %v627_v52  ;;  %1081 = vst.msk [vmem:[#allocation2 + $0x10] sm:$0xff] %vm198_vm1, %v1065_v61  ;;  %v628_v59 = vadd.f32 %v612_v39, %v596_v63  ;;  %v1035_v16 = vadd.f32 %v1810_v51, %v992_v1  ;;  %v616_v63 = vld [vmem:[#allocation2 + $0x48] sm:$0xff] }
 0x179   : > { %v1095_v43 = vld [vmem:[#allocation2] sm:$0xff]  ;;  %v1050_v4 = vld [vmem:[#allocation2 + $0x18] sm:$0xff]  ;;  %v994_v6 = vpop.permute.xlu1 %993 }
 0x17a   : > { %v1118_v2 = vadd.f32 %v1959_v58, %v1095_v43  ;;  %v1066_v7 = vadd.f32 %v1050_v4, %v1034_v38  ;;  %644 = vst.msk [vmem:[#allocation2 + $0x28] sm:$0xff] %vm198_vm1, %v628_v59  ;;  %v1036_v51 = vadd.f32 %v1820_v60, %v994_v6 }
 0x17b   : > { %v556_v49 = vpop.permute.xlu0 %555 }
 0x17c   : > { %vm1134_vm3 = vcmp.ge.f32.partialorder %v1118_v2, 0.0  ;;  %v1150_v11 = vmul.f32 0.2, %v1118_v2  ;;  %v597_v13 = vadd.f32 %v556_v49, %v1837_v12  ;;  %1082 = vst.msk [vmem:[#allocation2 + $0x18] sm:$0xff] %vm198_vm1, %v1066_v7 }
 0x17d   : > { %v1096_v14 = vld [vmem:[#allocation2 + $0x8] sm:$0xff]  ;;  %v558_v20 = vpop.permute.xlu1 %557 }
 0x17e   : > { %v1119_v55 = vadd.f32 %v1959_v58, %v1096_v14  ;;  %v1166_v15 = vsel %vm1134_vm3, %v1118_v2, %v1150_v11  ;;  %v629_v17 = vadd.f32 %v613_v8, %v597_v13  ;;  %v598_v22 = vadd.f32 %v1828_v3, %v558_v20  ;;  %v617_v14 = vld [vmem:[#allocation2 + $0x50] sm:$0xff] }
 0x17f   : > { %v1441_v28 = vpack.c.bf16 %v1166_v15, %v1166_v15  ;;  %v1051_v12 = vld [vmem:[#allocation2 + $0x20] sm:$0xff]  ;;  %v996_v23 = vpop.permute.xlu0 %995  ;;  %v1097_v31 = vld [vmem:[#allocation2 + $0x10] sm:$0xff] }
 0x180   : > { %vm1135_vm5 = vcmp.ge.f32.partialorder %v1119_v55, 0.0  ;;  %v1151_v24 = vmul.f32 0.2, %v1119_v55  ;;  %v1067_v25 = vadd.f32 %v1051_v12, %v1035_v16  ;;  %645 = vst.msk [vmem:[#allocation2 + $0x30] sm:$0xff] %vm198_vm1, %v629_v17  ;;  %v1120_v26 = vadd.f32 %v1959_v58, %v1097_v31  ;;  %v618_v12 = vld [vmem:[#allocation2 + $0x58] sm:$0xff] }
 0x181   : > { %1247 = vst.msk [vmem:[%s1972_s24] sm:$0xf] %vm1246_vm4, %v1441_v28  ;;  %v630_v33 = vadd.f32 %v614_v19, %v598_v22  ;;  %v1052_v37 = vld [vmem:[#allocation2 + $0x28] sm:$0xff]  ;;  %v998_v3 = vpop.permute.xlu1 %997  ;;  %v1037_v53 = vadd.f32 %v996_v23, %v1844_v21 }
 0x182   : > { %v1167_v29 = vsel %vm1135_vm5, %v1119_v55, %v1151_v24  ;;  %1083 = vst.msk [vmem:[#allocation2 + $0x20] sm:$0xff] %vm198_vm1, %v1067_v25  ;;  %vm1136_vm6 = vcmp.ge.f32.partialorder %v1120_v26, 0.0  ;;  %v1152_v34 = vmul.f32 0.2, %v1120_v26  ;;  %v1068_v42 = vadd.f32 %v1052_v37, %v1036_v51 }
 0x183   : > { %v1442_v40 = vpack.c.bf16 %v1167_v29, %v1167_v29  ;;  %646 = vst.msk [vmem:[#allocation2 + $0x38] sm:$0xff] %vm198_vm1, %v630_v33  ;;  %v560_v48 = vpop.permute.xlu0 %559  ;;  %v1098_v45 = vld [vmem:[#allocation2 + $0x18] sm:$0xff]  ;;  %v1038_v7 = vadd.f32 %v1834_v10, %v998_v3 }
 0x184   : > { %v599_v50 = vadd.f32 %v560_v48, %v1851_v27  ;;  %v1168_v60 = vsel %vm1136_vm6, %v1120_v26, %v1152_v34  ;;  %v1121_v52 = vadd.f32 %v1959_v58, %v1098_v45  ;;  %1084 = vst.msk [vmem:[#allocation2 + $0x28] sm:$0xff] %vm198_vm1, %v1068_v42  ;;  %v619_v26 = vld [vmem:[#allocation2 + $0x60] sm:$0xff] }
 0x185   : > { %1248 = vst.msk [vmem:[%s1972_s24 + $0x4] sm:$0xf] %vm1246_vm4, %v1442_v40  ;;  %v1443_v39 = vpack.c.bf16 %v1168_v60, %v1168_v60  ;;  %v562_v1 = vpop.permute.xlu1 %561 }
 0x186   : > { %v631_v61 = vadd.f32 %v615_v44, %v599_v50  ;;  %vm1137_vm7 = vcmp.ge.f32.partialorder %v1121_v52, 0.0  ;;  %v1153_v43 = vmul.f32 0.2, %v1121_v52  ;;  %v600_v59 = vadd.f32 %v562_v1, %v1859_v36  ;;  %v620_v44 = vld [vmem:[#allocation2 + $0x68] sm:$0xff]  ;;  %v621_v50 = vld [vmem:[#allocation2 + $0x70] sm:$0xff] }
 0x187   : > { %v1053_v38 = vld [vmem:[#allocation2 + $0x30] sm:$0xff]  ;;  %v1000_v2 = vpop.permute.xlu0 %999  ;;  %1249 = vst.msk [vmem:[%s1972_s24 + $0x8] sm:$0xf] %vm1246_vm4, %v1443_v39 }
 0x188   : > { %v1069_v27 = vadd.f32 %v1053_v38, %v1037_v53  ;;  %647 = vst.msk [vmem:[#allocation2 + $0x40] sm:$0xff] %vm198_vm1, %v631_v61  ;;  %v1169_v4 = vsel %vm1137_vm7, %v1121_v52, %v1153_v43  ;;  %v632_v21 = vadd.f32 %v616_v63, %v600_v59  ;;  %v1039_v20 = vadd.f32 %v1000_v2, %v1862_v41 }
 0x189   : > { %v1099_v6 = vld [vmem:[#allocation2 + $0x20] sm:$0xff]  ;;  %v1444_v8 = vpack.c.bf16 %v1169_v4, %v1169_v4  ;;  %v1002_v13 = vpop.permute.xlu1 %1001 }
 0x18a   : > { %v1122_v49 = vadd.f32 %v1959_v58, %v1099_v6  ;;  %1085 = vst.msk [vmem:[#allocation2 + $0x30] sm:$0xff] %vm198_vm1, %v1069_v27  ;;  %v1054_v11 = vld [vmem:[#allocation2 + $0x38] sm:$0xff]  ;;  %648 = vst.msk [vmem:[#allocation2 + $0x48] sm:$0xff] %vm198_vm1, %v632_v21  ;;  %v1040_v37 = vadd.f32 %v1002_v13, %v1868_v47 }
 0x18b   : > { %v1070_v36 = vadd.f32 %v1054_v11, %v1038_v7  ;;  %v564_v55 = vpop.permute.xlu0 %563  ;;  %1250 = vst.msk [vmem:[%s1972_s24 + $0xc] sm:$0xf] %vm1246_vm4, %v1444_v8  ;;  %v1100_v16 = vld [vmem:[#allocation2 + $0x28] sm:$0xff] }
 0x18c   : > { %vm1138_vm8 = vcmp.ge.f32.partialorder %v1122_v49, 0.0  ;;  %v1154_v15 = vmul.f32 0.2, %v1122_v49  ;;  %v601_v10 = vadd.f32 %v1856_v35, %v564_v55  ;;  %v1123_v17 = vadd.f32 %v1959_v58, %v1100_v16 }
 0x18d   : > { %1086 = vst.msk [vmem:[#allocation2 + $0x38] sm:$0xff] %vm198_vm1, %v1070_v36  ;;  %v566_v22 = vpop.permute.xlu1 %565 }
 0x18e   : > { %v1170_v19 = vsel %vm1138_vm8, %v1122_v49, %v1154_v15  ;;  %v633_v28 = vadd.f32 %v617_v14, %v601_v10  ;;  %vm1139_vm9 = vcmp.ge.f32.partialorder %v1123_v17, 0.0  ;;  %v1155_v24 = vmul.f32 0.2, %v1123_v17 }
 0x18f   : > { %v1445_v23 = vpack.c.bf16 %v1170_v19, %v1170_v19  ;;  %v1055_v31 = vld [vmem:[#allocation2 + $0x40] sm:$0xff]  ;;  %v602_v25 = vadd.f32 %v566_v22, %v1878_v57  ;;  %v568_v51 = vpop.permute.xlu0 %567 }
 0x190   : > { %v1071_v35 = vadd.f32 %v1055_v31, %v1039_v20  ;;  %649 = vst.msk [vmem:[#allocation2 + $0x50] sm:$0xff] %vm198_vm1, %v633_v28  ;;  %v603_v33 = vadd.f32 %v1875_v54, %v568_v51  ;;  %v1171_v29 = vsel %vm1139_vm9, %v1123_v17, %v1155_v24 }
 0x191   : > { %1251 = vst.msk [vmem:[%s1972_s24 + $0x10] sm:$0xf] %vm1246_vm4, %v1445_v23  ;;  %v1101_v41 = vld [vmem:[#allocation2 + $0x30] sm:$0xff]  ;;  %v634_v3 = vadd.f32 %v618_v12, %v602_v25  ;;  %v1446_v40 = vpack.c.bf16 %v1171_v29, %v1171_v29  ;;  %v1056_v57 = vld [vmem:[#allocation2 + $0x48] sm:$0xff]  ;;  %v570_v48 = vpop.permute.xlu1 %569 }
 0x192   : > { %v1124_v34 = vadd.f32 %v1959_v58, %v1101_v41  ;;  %1087 = vst.msk [vmem:[#allocation2 + $0x40] sm:$0xff] %vm198_vm1, %v1071_v35  ;;  %v635_v42 = vadd.f32 %v619_v26, %v603_v33  ;;  %v1072_v45 = vadd.f32 %v1056_v57, %v1040_v37  ;;  %v604_v54 = vadd.f32 %v1884_v62, %v570_v48  ;;  %v622_v62 = vld [vmem:[#allocation2 + $0x78] sm:$0xff] }
 0x193   : > { %650 = vst.msk [vmem:[#allocation2 + $0x58] sm:$0xff] %vm198_vm1, %v634_v3  ;;  %v572_v60 = vpop.permute.xlu0 %571 }
 0x194   : > { %1252 = vst.msk [vmem:[%s1972_s24 + $0x14] sm:$0xf] %vm1246_vm4, %v1446_v40  ;;  %vm1140_vm10 = vcmp.ge.f32.partialorder %v1124_v34, 0.0  ;;  %v1156_v47 = vmul.f32 0.2, %v1124_v34  ;;  %v1102_v52 = vld [vmem:[#allocation2 + $0x38] sm:$0xff]  ;;  %v605_v39 = vadd.f32 %v572_v60, %v1911_v30  ;;  %v636_v61 = vadd.f32 %v620_v44, %v604_v54 }
 0x195   : > { %651 = vst.msk [vmem:[#allocation2 + $0x60] sm:$0xff] %vm198_vm1, %v635_v42  ;;  %v1125_v53 = vadd.f32 %v1959_v58, %v1102_v52  ;;  %1088 = vst.msk [vmem:[#allocation2 + $0x48] sm:$0xff] %vm198_vm1, %v1072_v45  ;;  %v574_v43 = vpop.permute.xlu1 %573 }
 0x196   : > { %v1172_v63 = vsel %vm1140_vm10, %v1124_v34, %v1156_v47  ;;  %v637_v1 = vadd.f32 %v621_v50, %v605_v39  ;;  %652 = vst.msk [vmem:[#allocation2 + $0x68] sm:$0xff] %vm198_vm1, %v636_v61  ;;  %v606_v2 = vadd.f32 %v1904_v18, %v574_v43 }
 0x197   : > { %v1447_v38 = vpack.c.bf16 %v1172_v63, %v1172_v63  ;;  %vm1141_vm11 = vcmp.ge.f32.partialorder %v1125_v53, 0.0  ;;  %v1157_v59 = vmul.f32 0.2, %v1125_v53  ;;  %v1004_v27 = vpop.permute.xlu0 %1003  ;;  %v1057_v21 = vld [vmem:[#allocation2 + $0x50] sm:$0xff] }
 0x198   : > { %653 = vst.msk [vmem:[#allocation2 + $0x70] sm:$0xff] %vm198_vm1, %v637_v1  ;;  %v1041_v30 = vadd.f32 %v1865_v46, %v1004_v27  ;;  %v638_v7 = vadd.f32 %v622_v62, %v606_v2 }
 0x199   : > { %1253 = vst.msk [vmem:[%s1972_s24 + $0x18] sm:$0xf] %vm1246_vm4, %v1447_v38  ;;  %v1173_v4 = vsel %vm1141_vm11, %v1125_v53, %v1157_v59  ;;  %v1103_v6 = vld [vmem:[#allocation2 + $0x40] sm:$0xff]  ;;  %v1006_v13 = vpop.permute.xlu1 %1005 }
 0x19a   : > { %v1448_v8 = vpack.c.bf16 %v1173_v4, %v1173_v4  ;;  %v1126_v49 = vadd.f32 %v1959_v58, %v1103_v6  ;;  %v1073_v11 = vadd.f32 %v1057_v21, %v1041_v30  ;;  %654 = vst.msk [vmem:[#allocation2 + $0x78] sm:$0xff] %vm198_vm1, %v638_v7  ;;  %v1042_v18 = vadd.f32 %v1006_v13, %v1892_v5  ;;  %v1058_v55 = vld [vmem:[#allocation2 + $0x58] sm:$0xff] }
 0x19b   : > { %v1008_v36 = vpop.permute.xlu0 %1007 }
 0x19c   : > { %1254 = vst.msk [vmem:[%s1972_s24 + $0x1c] sm:$0xf] %vm1246_vm4, %v1448_v8  ;;  %vm1142_vm12 = vcmp.ge.f32.partialorder %v1126_v49, 0.0  ;;  %v1158_v46 = vmul.f32 0.2, %v1126_v49  ;;  %v1104_v14 = vld [vmem:[#allocation2 + $0x48] sm:$0xff]  ;;  %v1043_v15 = vadd.f32 %v1888_v0, %v1008_v36  ;;  %v1074_v10 = vadd.f32 %v1058_v55, %v1042_v18 }
 0x19d   : > { %1089 = vst.msk [vmem:[#allocation2 + $0x50] sm:$0xff] %vm198_vm1, %v1073_v11  ;;  %v1127_v16 = vadd.f32 %v1959_v58, %v1104_v14  ;;  %v1059_v17 = vld [vmem:[#allocation2 + $0x60] sm:$0xff]  ;;  %v1010_v28 = vpop.permute.xlu1 %1009  ;;  %v1060_v0 = vld [vmem:[#allocation2 + $0x68] sm:$0xff] }
 0x19e   : > { %v1174_v19 = vsel %vm1142_vm12, %v1126_v49, %v1158_v46  ;;  %v1075_v20 = vadd.f32 %v1059_v17, %v1043_v15  ;;  %1090 = vst.msk [vmem:[#allocation2 + $0x58] sm:$0xff] %vm198_vm1, %v1074_v10  ;;  %v1044_v22 = vadd.f32 %v1896_v9, %v1010_v28 }
 0x19f   : > { %v1449_v5 = vpack.c.bf16 %v1174_v19, %v1174_v19  ;;  %vm1143_vm13 = vcmp.ge.f32.partialorder %v1127_v16, 0.0  ;;  %v1159_v12 = vmul.f32 0.2, %v1127_v16  ;;  %v1012_v23 = vpop.permute.xlu0 %1011  ;;  %v1061_v26 = vld [vmem:[#allocation2 + $0x70] sm:$0xff] }
 0x1a0   : > { %1091 = vst.msk [vmem:[#allocation2 + $0x60] sm:$0xff] %vm198_vm1, %v1075_v20  ;;  %v1045_v24 = vadd.f32 %v1012_v23, %v1921_v56  ;;  %v1076_v25 = vadd.f32 %v1060_v0, %v1044_v22 }
 0x1a1   : > { %1255 = vst.msk [vmem:[%s1972_s24 + $0x20] sm:$0xf] %vm1246_vm4, %v1449_v5  ;;  %v1175_v31 = vsel %vm1143_vm13, %v1127_v16, %v1159_v12  ;;  %v1014_v33 = vpop.permute.xlu1 %1013  ;;  %v1062_v56 = vld [vmem:[#allocation2 + $0x78] sm:$0xff] }
 0x1a2   : > { %v1450_v51 = vpack.c.bf16 %v1175_v31, %v1175_v31  ;;  %v1077_v35 = vadd.f32 %v1061_v26, %v1045_v24  ;;  %1092 = vst.msk [vmem:[#allocation2 + $0x68] sm:$0xff] %vm198_vm1, %v1076_v25  ;;  %v1046_v41 = vadd.f32 %v1913_v32, %v1014_v33 }
 0x1a4   : > { %v1105_v29 = vld [vmem:[#allocation2 + $0x50] sm:$0xff]  ;;  %1256 = vst.msk [vmem:[%s1972_s24 + $0x24] sm:$0xf] %vm1246_vm4, %v1450_v51  ;;  %v1078_v37 = vadd.f32 %v1062_v56, %v1046_v41 }
 0x1a5   : > { %v1128_v9 = vadd.f32 %v1959_v58, %v1105_v29  ;;  %1093 = vst.msk [vmem:[#allocation2 + $0x70] sm:$0xff] %vm198_vm1, %v1077_v35  ;;  %v1106_v40 = vld [vmem:[#allocation2 + $0x58] sm:$0xff] }
 0x1a6   : > { %v1129_v34 = vadd.f32 %v1959_v58, %v1106_v40  ;;  %1094 = vst.msk [vmem:[#allocation2 + $0x78] sm:$0xff] %vm198_vm1, %v1078_v37 }
 0x1a7   : > { %vm1144_vm14 = vcmp.ge.f32.partialorder %v1128_v9, 0.0  ;;  %v1160_v3 = vmul.f32 0.2, %v1128_v9  ;;  %v1107_v57 = vld [vmem:[#allocation2 + $0x60] sm:$0xff] }
 0x1a8   : > { %v1130_v32 = vadd.f32 %v1959_v58, %v1107_v57  ;;  %vm1145_vm15 = vcmp.ge.f32.partialorder %v1129_v34, 0.0  ;;  %v1161_v48 = vmul.f32 0.2, %v1129_v34 }
 0x1a9   : > { %v1176_v42 = vsel %vm1144_vm14, %v1128_v9, %v1160_v3  ;;  %v1108_v54 = vld [vmem:[#allocation2 + $0x68] sm:$0xff] }
 0x1aa   : > { %v1451_v44 = vpack.c.bf16 %v1176_v42, %v1176_v42  ;;  %vm1146_vm0 = vcmp.ge.f32.partialorder %v1130_v32, 0.0  ;;  %v1162_v45 = vmul.f32 0.2, %v1130_v32  ;;  %v1177_v50 = vsel %vm1145_vm15, %v1129_v34, %v1161_v48 }
 0x1ab   : > { %v1131_v60 = vadd.f32 %v1959_v58, %v1108_v54  ;;  %v1452_v52 = vpack.c.bf16 %v1177_v50, %v1177_v50 }
 0x1ac   : > { %1257 = vst.msk [vmem:[%s1972_s24 + $0x28] sm:$0xf] %vm1246_vm4, %v1451_v44  ;;  %v1109_v47 = vld [vmem:[#allocation2 + $0x70] sm:$0xff]  ;;  %v1178_v39 = vsel %vm1146_vm0, %v1130_v32, %v1162_v45 }
 0x1ad   : > { %v1132_v53 = vadd.f32 %v1959_v58, %v1109_v47  ;;  %v1453_v61 = vpack.c.bf16 %v1178_v39, %v1178_v39  ;;  %vm1147_vm1 = vcmp.ge.f32.partialorder %v1131_v60, 0.0  ;;  %v1163_v63 = vmul.f32 0.2, %v1131_v60  ;;  %1258 = vst.msk [vmem:[%s1972_s24 + $0x2c] sm:$0xf] %vm1246_vm4, %v1452_v52  ;;  %v1110_v62 = vld [vmem:[#allocation2 + $0x78] sm:$0xff] }
 0x1ae   : > { %v1133_v38 = vadd.f32 %v1959_v58, %v1110_v62 }
 0x1af   : > { %vm1148_vm2 = vcmp.ge.f32.partialorder %v1132_v53, 0.0  ;;  %v1164_v1 = vmul.f32 0.2, %v1132_v53  ;;  %1259 = vst.msk [vmem:[%s1972_s24 + $0x30] sm:$0xf] %vm1246_vm4, %v1453_v61  ;;  %v1179_v43 = vsel %vm1147_vm1, %v1131_v60, %v1163_v63 }
 0x1b0   : > { %v1454_v59 = vpack.c.bf16 %v1179_v43, %v1179_v43  ;;  %vm1149_vm3 = vcmp.ge.f32.partialorder %v1133_v38, 0.0  ;;  %v1165_v30 = vmul.f32 0.2, %v1133_v38 }
 0x1b1   : > { %v1180_v2 = vsel %vm1148_vm2, %v1132_v53, %v1164_v1 }
 0x1b2   : > { %v1455_v27 = vpack.c.bf16 %v1180_v2, %v1180_v2  ;;  %1260 = vst.msk [vmem:[%s1972_s24 + $0x34] sm:$0xf] %vm1246_vm4, %v1454_v59  ;;  %v1181_v4 = vsel %vm1149_vm3, %v1133_v38, %v1165_v30 }
 0x1b3   : > { %v1456_v6 = vpack.c.bf16 %v1181_v4, %v1181_v4 }
 0x1b4   : > { %1261 = vst.msk [vmem:[%s1972_s24 + $0x38] sm:$0xf] %vm1246_vm4, %v1455_v27 }
 0x1b5   : > { %1262 = vst.msk [vmem:[%s1972_s24 + $0x3c] sm:$0xf] %vm1246_vm4, %v1456_v6 }
 0x1b6 PF: > { %s13_s16 = sadd.s32 1, %s1642_s16   ;;  %s2083_s12 = smov %s1634_s14 }
 0x1b7   : > { %p10_p7 = scmp.ge.s32.totalorder %s13_s16, 6   ;;  %s2084_s13 = smov %s1638_s15 }
 0x1b8   : > { %s2085_s14 = smov %s2088_s17  ;;  %s2086_s15 = smov %s2092_s18 }
 0x1b9   :  { %12 = sbr.rel (!%p10_p7) target bundleno = 3 (0x3), region = 65 }

// kernel: path_discriminator_forward.6
= control target key start
LH: loop header
LB: loop body
LE: loop exit
PB: predicated region body
PF: predicated region fallthrough
CT: control target
= control target key end

     0   :  { %s1241_s12 = smov 0   ;;  %s1243_s13 = smov 0   ;;  %s1481_s0 = inlined_call_operand.vmem [shape: bf16[2,144,32], index: 0, kind: input, shape index: {}]   ;;  %s1482_s1 = inlined_call_operand.vmem [shape: bf16[2,32,32], index: 1, kind: input, shape index: {}]   ;;  %s1483_s2 = inlined_call_operand.vmem [shape: f32[1,16], index: 2, kind: input, shape index: {}]   ;;  %s1484_s3 = inlined_call_operand.vmem [shape: bf16[2,8,8,16], index: 3, kind: output, shape index: {}]  }
   0x1   :  { %s1245_s14 = smov 0  }
   0x2 LB: > { %s25_s15 = sadd.s32 1, %s1213_s13  ;;  %p1022_p0 = scmp.ge.s32.totalorder %s1217_s14, 1  ;;  %s1217_s14 = sphi %s1245_s14, %s13_s14   ;;  %s1213_s13 = sphi %s1243_s13, %s1486_s13   ;;  %s1209_s12 = sphi %s1241_s12, %s1485_s12  }
   0x3   : > { %p27_p1 = scmp.ge.s32.totalorder %s25_s15, 2  ;;  %p151_p2 = scmp.lt.s32.totalorder %s1217_s14, 3 }
   0x5   : > { %s1488_s15 = smov (%p27_p1, %s25_s15), 0  ;;  %p152_p3 = pnand %p1022_p0, %p151_p2 }
   0x6   : > { %v1173_v0 = vld [vmem:[%s1482_s1] sm:$0xff] (!%p152_p3)   ;;  %p179_p4 = scmp.lt.s32.totalorder (!%p152_p3), %s1209_s12, 1  ;;  %v1174_v1 = vld [vmem:[%s1482_s1 + $0x10] sm:$0xff] (!%p152_p3)   ;;  %v1175_v2 = vld [vmem:[%s1482_s1 + $0x8] sm:$0xff] (!%p152_p3)   ;;  %vm282_vm0 = vcmask (!%p152_p3), 261120   ;;  %vm196_vm1 = vcmask (!%p152_p3), 130048  }
   0x7   : > { %155 = sbr.rel (%p152_p3) target bundleno = 484 (0x1e4), region = 32  ;;  %1106 = vmatprep.subr.bf16.mxu0 (!%p152_p3), %v1173_v0  ;;  %1126 = vmatprep.subr.bf16.mxu1 (!%p152_p3), %v1174_v1  ;;  %v1176_v3 = vld [vmem:[%s1482_s1 + $0x18] sm:$0xff] (!%p152_p3)   ;;  %v1219_v20 = vmov (!%p152_p3), 0.0   ;;  %vm420_vm2 = vcmask (!%p152_p3), 1046528   ;;  %s1220_s28 = smov (!%p152_p3), 112   ;;  %vm924_vm3 = vcmask (!%p152_p3), 125952  }
   0x8   : > { %1107 = vmatpush3.bf16.msra.mxu0 (!%p152_p3), %v1173_v0  ;;  %1127 = vmatpush3.bf16.msra.mxu1 (!%p152_p3), %v1174_v1  ;;  %198 = vst.msk [vmem:[#allocation2 + $0x8] sm:$0xff] (!%p152_p3), %vm196_vm1, %v1219_v20  ;;  %197 = vst.msk [vmem:[#allocation2] sm:$0xff] (!%p152_p3), %vm196_vm1, %v1219_v20 }
   0x9   : > { %1108 = vmatprep.subr.bf16.mxu0 (!%p152_p3), %v1175_v2  ;;  %1128 = vmatprep.subr.bf16.mxu1 (!%p152_p3), %v1176_v3  ;;  %199 = vst.msk [vmem:[#allocation2 + $0x10] sm:$0xff] (!%p152_p3), %vm196_vm1, %v1219_v20  ;;  %200 = vst.msk [vmem:[#allocation2 + $0x18] sm:$0xff] (!%p152_p3), %vm196_vm1, %v1219_v20 }
   0xa   : > { %201 = vst.msk [vmem:[#allocation2 + $0x20] sm:$0xff] (!%p152_p3), %vm196_vm1, %v1219_v20  ;;  %202 = vst.msk [vmem:[#allocation2 + $0x28] sm:$0xff] (!%p152_p3), %vm196_vm1, %v1219_v20 }
   0xb   : > { %203 = vst.msk [vmem:[#allocation2 + $0x30] sm:$0xff] (!%p152_p3), %vm196_vm1, %v1219_v20  ;;  %204 = vst.msk [vmem:[#allocation2 + $0x38] sm:$0xff] (!%p152_p3), %vm196_vm1, %v1219_v20 }
   0xc   : > { %1109 = vmatpush3.bf16.msra.mxu0 (!%p152_p3), %v1175_v2  ;;  %1129 = vmatpush3.bf16.msra.mxu1 (!%p152_p3), %v1176_v3 }
   0xe   : > { %s1490_s12 = smov (!%p179_p4, %s1209_s12), 1 }
   0xf   : > { %s1146_s24 = smul.u32 72, %s1490_s12  ;;  %s1085_s4 = sshll.u32 %s1490_s12, 5 }
  0x10   : > { %s192_s7 = scalar_lea.vmem %s1484_s3, %s1085_s4 }
  0x11   : > { %s1277_s27 = scalar_lea.vmem %s1481_s0, %s1146_s24 }
  0x12   : > { %v1177_v4 = vld [vmem:[%s1277_s27] sm:$0xff]   ;;  %v1178_v5 = vld [vmem:[%s1277_s27 + $0x8] sm:$0xff]   ;;  %v1180_v7 = vld [vmem:[%s1277_s27 + $0x10] sm:$0xff]  }
  0x13   : > { %1110 = vmatprep.mubr.msk.bf16.mxu0 %vm282_vm0, %v1177_v4  ;;  %v1179_v6 = vld [vmem:[%s1277_s27 + $0x8] sm:$0xff]   ;;  %1130 = vmatprep.mubr.msk.bf16.mxu1 %vm282_vm0, %v1178_v5  ;;  %v1181_v8 = vld [vmem:[%s1277_s27 + $0x10] sm:$0xff]   ;;  %v1182_v9 = vld [vmem:[%s1277_s27 + $0x18] sm:$0xff]  }
  0x14   : > { %1111 = vmatmul.mubr.msk.bf16.vlgmr.msra.gmra.mrb[0].mxu0 %vm282_vm0, %v1179_v6  ;;  %1131 = vmatmul.mubr.msk.bf16.vlgmr.msra.gmra.mrb[0].mxu1 %vm282_vm0, %v1180_v7  ;;  %v1183_v10 = vld [vmem:[%s1277_s27 + $0x20] sm:$0xff]   ;;  %v1185_v11 = vld [vmem:[%s1277_s27 + $0x18] sm:$0xff]   ;;  %v1189_v13 = vld [vmem:[%s1277_s27 + $0x28] sm:$0xff]  }
  0x15   : > { %1114 = vmatprep.mubr.msk.bf16.mxu0 %vm282_vm0, %v1181_v8  ;;  %v1186_v12 = vld [vmem:[%s1277_s27 + $0x20] sm:$0xff]   ;;  %1134 = vmatprep.mubr.msk.bf16.mxu1 %vm282_vm0, %v1185_v11  ;;  %v1184_v14 = vld [vmem:[%s1277_s27 + $0x28] sm:$0xff]   ;;  %v1187_v15 = vld [vmem:[%s1277_s27 + $0x30] sm:$0xff]  }
  0x16   : > { %v1190_v16 = vld [vmem:[%s1277_s27 + $0x30] sm:$0xff]   ;;  %v1191_v17 = vld [vmem:[%s1277_s27 + $0x38] sm:$0xff]   ;;  %v1192_v19 = vld [vmem:[%s1277_s27 + $0x40] sm:$0xff]  }
  0x17   : > { %v1188_v18 = vld [vmem:[%s1277_s27 + $0x38] sm:$0xff]  }
  0x1c   : > { %1115 = vmatmul.mubr.msk.bf16.gmra.mrb[4].mxu0 %vm282_vm0, %v1182_v9  ;;  %1135 = vmatmul.mubr.msk.bf16.gmra.mrb[4].mxu1 %vm282_vm0, %v1186_v12 }
  0x1d   : > { %1118 = vmatprep.mubr.msk.bf16.mxu0 %vm282_vm0, %v1183_v10  ;;  %1138 = vmatprep.mubr.msk.bf16.mxu1 %vm282_vm0, %v1189_v13 }
  0x24   : > { %1119 = vmatmul.mubr.msk.bf16.gmra.mrb[8].mxu0 %vm282_vm0, %v1184_v14  ;;  %1139 = vmatmul.mubr.msk.bf16.gmra.mrb[8].mxu1 %vm282_vm0, %v1190_v16 }
  0x25   : > { %1122 = vmatprep.mubr.msk.bf16.mxu0 %vm282_vm0, %v1187_v15  ;;  %1142 = vmatprep.mubr.msk.bf16.mxu1 %vm282_vm0, %v1191_v17 }
  0x2c   : > { %1123 = vmatmul.mubr.msk.bf16.gmra.mrb[12].mxu0 %vm282_vm0, %v1188_v18  ;;  %1143 = vmatmul.mubr.msk.bf16.gmra.mrb[12].mxu1 %vm282_vm0, %v1192_v19 }
  0xe7   : > { %v1319_v21 = vpop.f32.mrb[0].mxu0  ;;  %v1321_v22 = vpop.f32.mrb[0].mxu1 }
  0xe8   : > { %v1323_v23 = vpop.f32.mrb[1].mxu0  ;;  %v720_v24 = vrot.slane %v1321_v22, 1  ;;  %v1326_v25 = vpop.f32.mrb[1].mxu1  ;;  %v424_v27 = vrot.slane %v1319_v21, 1 }
  0xe9   : > { %v1113_v26 = vpop.f32.mrb[2].mxu0  ;;  %v717_v28 = vrot.slane %v1326_v25, 1  ;;  %v1133_v30 = vpop.f32.mrb[2].mxu1  ;;  %v421_v32 = vrot.slane %v1323_v23, 1 }
  0xea   : > { %v425_v29 = vrot.slane %v1113_v26, 1  ;;  %v344_v31 = vpop.f32.mrb[3].mxu0  ;;  %v721_v33 = vrot.slane %v1133_v30, 1  ;;  %v641_v35 = vpop.f32.mrb[3].mxu1 }
  0xeb   : > { %v422_v34 = vrot.slane %v344_v31, 1  ;;  %v718_v36 = vrot.slane %v641_v35, 1 }
  0xec   : > { %v426_v37 = vsel %vm420_vm2, %v424_v27, %v425_v29  ;;  %v722_v38 = vsel %vm420_vm2, %v720_v24, %v721_v33 }
  0xed   : > { %447 = vrot.lane.b32.xlu0 %v426_v37, %s1220_s28  ;;  %v423_v39 = vsel %vm420_vm2, %v421_v32, %v422_v34  ;;  %v719_v40 = vsel %vm420_vm2, %v717_v28, %v718_v36 }
  0xee   : > { %741 = vrot.lane.b32.xlu1 %v719_v40, %s1220_s28 }
  0xef   : > { %v1337_v41 = vpop.f32.mrb[4].mxu0  ;;  %v1341_v43 = vpop.f32.mrb[4].mxu1 }
  0xf0   : > { %v1339_v42 = vpop.f32.mrb[5].mxu0  ;;  %v726_v45 = vrot.slane %v1341_v43, 1  ;;  %v1345_v46 = vpop.f32.mrb[5].mxu1  ;;  %v430_v47 = vrot.slane %v1337_v41, 1 }
  0xf1   : > { %743 = vrot.lane.b32.xlu0 %v722_v38, %s1220_s28  ;;  %v1117_v44 = vpop.f32.mrb[6].mxu0  ;;  %v723_v50 = vrot.slane %v1345_v46, 1  ;;  %v1137_v51 = vpop.f32.mrb[6].mxu1  ;;  %v427_v52 = vrot.slane %v1339_v42, 1 }
  0xf2   : > { %v431_v48 = vrot.slane %v1117_v44, 1  ;;  %v360_v49 = vpop.f32.mrb[7].mxu0  ;;  %v727_v54 = vrot.slane %v1137_v51, 1  ;;  %v657_v55 = vpop.f32.mrb[7].mxu1  ;;  %v478_v44 = vld [vmem:[#allocation2 + $0x8] sm:$0xff]  ;;  %v477_v51 = vld [vmem:[#allocation2] sm:$0xff] }
  0xf3   : > { %v428_v53 = vrot.slane %v360_v49, 1  ;;  %v724_v57 = vrot.slane %v657_v55, 1 }
  0xf4   : > { %v432_v56 = vsel %vm420_vm2, %v430_v47, %v431_v48  ;;  %v728_v59 = vsel %vm420_vm2, %v726_v45, %v727_v54 }
  0xf5   : > { %445 = vrot.lane.b32.xlu0 %v423_v39, %s1220_s28  ;;  %451 = vrot.lane.b32.xlu1 %v432_v56, %s1220_s28  ;;  %v429_v58 = vsel %vm420_vm2, %v427_v52, %v428_v53  ;;  %v725_v60 = vsel %vm420_vm2, %v723_v50, %v724_v57  ;;  %v480_v53 = vld [vmem:[#allocation2 + $0x18] sm:$0xff] }
  0xf7   : > { %v1356_v61 = vpop.f32.mrb[8].mxu0  ;;  %v1360_v63 = vpop.f32.mrb[8].mxu1 }
  0xf8   : > { %v1358_v62 = vpop.f32.mrb[9].mxu0  ;;  %v732_v1 = vrot.slane %v1360_v63, 1  ;;  %v1364_v2 = vpop.f32.mrb[9].mxu1  ;;  %v436_v3 = vrot.slane %v1356_v61, 1 }
  0xf9   : > { %449 = vrot.lane.b32.xlu1 %v429_v58, %s1220_s28  ;;  %v1121_v0 = vpop.f32.mrb[10].mxu0  ;;  %v729_v6 = vrot.slane %v1364_v2, 1  ;;  %v1141_v7 = vpop.f32.mrb[10].mxu1  ;;  %v433_v8 = vrot.slane %v1358_v62, 1 }
  0xfa   : > { %v437_v4 = vrot.slane %v1121_v0, 1  ;;  %v376_v5 = vpop.f32.mrb[11].mxu0  ;;  %v733_v10 = vrot.slane %v1141_v7, 1  ;;  %v673_v11 = vpop.f32.mrb[11].mxu1  ;;  %v479_v0 = vld [vmem:[#allocation2 + $0x10] sm:$0xff] }
  0xfb   : > { %v434_v9 = vrot.slane %v376_v5, 1  ;;  %v730_v13 = vrot.slane %v673_v11, 1 }
  0xfc   : > { %v438_v12 = vsel %vm420_vm2, %v436_v3, %v437_v4  ;;  %v734_v15 = vsel %vm420_vm2, %v732_v1, %v733_v10 }
  0xfd   : > { %455 = vrot.lane.b32.xlu1 %v438_v12, %s1220_s28  ;;  %v435_v14 = vsel %vm420_vm2, %v433_v8, %v434_v9  ;;  %v731_v16 = vsel %vm420_vm2, %v729_v6, %v730_v13 }
  0xfe   : > { %453 = vrot.lane.b32.xlu0 %v435_v14, %s1220_s28  ;;  %v483_v14 = vld [vmem:[#allocation2 + $0x30] sm:$0xff] }
  0xff   : > { %v1375_v17 = vpop.f32.mrb[12].mxu0  ;;  %v1379_v19 = vpop.f32.mrb[12].mxu1 }
 0x100   : > { %v1377_v18 = vpop.f32.mrb[13].mxu0  ;;  %v738_v24 = vrot.slane %v1379_v19, 1  ;;  %v1382_v26 = vpop.f32.mrb[13].mxu1  ;;  %v442_v27 = vrot.slane %v1375_v17, 1 }
 0x101   : > { %v1125_v20 = vpop.f32.mrb[14].mxu0  ;;  %v735_v30 = vrot.slane %v1382_v26, 1  ;;  %v1145_v31 = vpop.f32.mrb[14].mxu1  ;;  %v439_v32 = vrot.slane %v1377_v18, 1 }
 0x102   : > { %v443_v28 = vrot.slane %v1125_v20, 1  ;;  %v392_v29 = vpop.f32.mrb[15].mxu0  ;;  %v739_v34 = vrot.slane %v1145_v31, 1  ;;  %v689_v35 = vpop.f32.mrb[15].mxu1 }
 0x103   : > { %v440_v33 = vrot.slane %v392_v29, 1  ;;  %v736_v37 = vrot.slane %v689_v35, 1 }
 0x104   : > { %v444_v36 = vsel %vm420_vm2, %v442_v27, %v443_v28  ;;  %v740_v39 = vsel %vm420_vm2, %v738_v24, %v739_v34 }
 0x105   : > { %459 = vrot.lane.b32.xlu1 %v444_v36, %s1220_s28  ;;  %v441_v38 = vsel %vm420_vm2, %v439_v32, %v440_v33  ;;  %v737_v40 = vsel %vm420_vm2, %v735_v30, %v736_v37  ;;  %v1082_v36 = vld [vmem:[%s1483_s2] ss:$0 sm:$0xff] }
 0x106   : > { %457 = vrot.lane.b32.xlu0 %v441_v38, %s1220_s28 }
 0x109   : > { %747 = vrot.lane.b32.xlu1 %v728_v59, %s1220_s28 }
 0x10a   : > { %745 = vrot.lane.b32.xlu0 %v725_v60, %s1220_s28 }
 0x10d   : > { %751 = vrot.lane.b32.xlu1 %v734_v15, %s1220_s28 }
 0x10e   : > { %749 = vrot.lane.b32.xlu0 %v731_v16, %s1220_s28 }
 0x111   : > { %755 = vrot.lane.b32.xlu1 %v740_v39, %s1220_s28 }
 0x112   : > { %753 = vrot.lane.b32.xlu0 %v737_v40, %s1220_s28 }
 0x15f   : > { %v448_v45 = vpop.permute.xlu0 %447 }
 0x160   : > { %v470_v47 = vadd.f32 %v1319_v21, %v448_v45  ;;  %v742_v49 = vpop.permute.xlu1 %741 }
 0x161   : > { %v765_v8 = vadd.f32 %v742_v49, %v1326_v25 }
 0x162   : > { %v486_v48 = vadd.f32 %v478_v44, %v470_v47 }
 0x163   : > { %v744_v50 = vpop.permute.xlu0 %743 }
 0x164   : > { %494 = vst.msk [vmem:[#allocation2 + $0x8] sm:$0xff] %vm196_vm1, %v486_v48  ;;  %v766_v57 = vadd.f32 %v1321_v22, %v744_v50 }
 0x167   : > { %v446_v52 = vpop.permute.xlu0 %445  ;;  %v452_v54 = vpop.permute.xlu1 %451 }
 0x168   : > { %v469_v55 = vadd.f32 %v446_v52, %v1323_v23  ;;  %v472_v56 = vadd.f32 %v1337_v41, %v452_v54  ;;  %v482_v23 = vld [vmem:[#allocation2 + $0x28] sm:$0xff]  ;;  %v481_v41 = vld [vmem:[#allocation2 + $0x20] sm:$0xff] }
 0x16a   : > { %v485_v58 = vadd.f32 %v477_v51, %v469_v55  ;;  %v488_v59 = vadd.f32 %v480_v53, %v472_v56 }
 0x16b   : > { %v774_v60 = vld [vmem:[#allocation2 + $0x8] sm:$0xff]  ;;  %v450_v21 = vpop.permute.xlu1 %449 }
 0x16c   : > { %v782_v1 = vadd.f32 %v774_v60, %v766_v57  ;;  %493 = vst.msk [vmem:[#allocation2] sm:$0xff] %vm196_vm1, %v485_v58  ;;  %496 = vst.msk [vmem:[#allocation2 + $0x18] sm:$0xff] %vm196_vm1, %v488_v59  ;;  %v471_v3 = vadd.f32 %v450_v21, %v1339_v42  ;;  %v484_v42 = vld [vmem:[#allocation2 + $0x38] sm:$0xff] }
 0x16e   : > { %790 = vst.msk [vmem:[#allocation2 + $0x8] sm:$0xff] %vm196_vm1, %v782_v1  ;;  %v487_v4 = vadd.f32 %v479_v0, %v471_v3 }
 0x16f   : > { %v456_v5 = vpop.permute.xlu1 %455 }
 0x170   : > { %495 = vst.msk [vmem:[#allocation2 + $0x10] sm:$0xff] %vm196_vm1, %v487_v4  ;;  %v474_v22 = vadd.f32 %v1356_v61, %v456_v5  ;;  %v454_v6 = vpop.permute.xlu0 %453 }
 0x171   : > { %v473_v7 = vadd.f32 %v454_v6, %v1358_v62 }
 0x172   : > { %v490_v9 = vadd.f32 %v482_v23, %v474_v22 }
 0x173   : > { %v773_v10 = vld [vmem:[#allocation2] sm:$0xff]  ;;  %v489_v11 = vadd.f32 %v481_v41, %v473_v7  ;;  %v776_v28 = vld [vmem:[#allocation2 + $0x18] sm:$0xff] }
 0x174   : > { %v781_v12 = vadd.f32 %v773_v10, %v765_v8  ;;  %498 = vst.msk [vmem:[#allocation2 + $0x28] sm:$0xff] %vm196_vm1, %v490_v9 }
 0x175   : > { %497 = vst.msk [vmem:[#allocation2 + $0x20] sm:$0xff] %vm196_vm1, %v489_v11 }
 0x176   : > { %789 = vst.msk [vmem:[#allocation2] sm:$0xff] %vm196_vm1, %v781_v12 }
 0x177   : > { %v460_v13 = vpop.permute.xlu1 %459  ;;  %v775_v31 = vld [vmem:[#allocation2 + $0x10] sm:$0xff] }
 0x178   : > { %v476_v61 = vadd.f32 %v1375_v17, %v460_v13  ;;  %v458_v15 = vpop.permute.xlu0 %457 }
 0x179   : > { %v475_v62 = vadd.f32 %v458_v15, %v1377_v18 }
 0x17a   : > { %v492_v16 = vadd.f32 %v484_v42, %v476_v61 }
 0x17b   : > { %v491_v25 = vadd.f32 %v483_v14, %v475_v62  ;;  %v748_v20 = vpop.permute.xlu1 %747  ;;  %v778_v35 = vld [vmem:[#allocation2 + $0x28] sm:$0xff] }
 0x17c   : > { %500 = vst.msk [vmem:[#allocation2 + $0x38] sm:$0xff] %vm196_vm1, %v492_v16  ;;  %v768_v24 = vadd.f32 %v1341_v43, %v748_v20  ;;  %v746_v27 = vpop.permute.xlu0 %745  ;;  %v777_v38 = vld [vmem:[#allocation2 + $0x20] sm:$0xff] }
 0x17d   : > { %499 = vst.msk [vmem:[#allocation2 + $0x30] sm:$0xff] %vm196_vm1, %v491_v25  ;;  %v767_v29 = vadd.f32 %v746_v27, %v1345_v46  ;;  %v797_v33 = vld [vmem:[#allocation2] sm:$0xff]  ;;  %v798_v46 = vld [vmem:[#allocation2 + $0x8] sm:$0xff] }
 0x17e   : > { %v784_v30 = vadd.f32 %v776_v28, %v768_v24  ;;  %v812_v39 = vadd.f32 %v1082_v36, %v797_v33  ;;  %v813_v47 = vadd.f32 %v1082_v36, %v798_v46 }
 0x17f   : > { %v783_v17 = vadd.f32 %v775_v31, %v767_v29  ;;  %v752_v32 = vpop.permute.xlu1 %751 }
 0x180   : > { %792 = vst.msk [vmem:[#allocation2 + $0x18] sm:$0xff] %vm196_vm1, %v784_v30  ;;  %v770_v18 = vadd.f32 %v1360_v63, %v752_v32  ;;  %v750_v34 = vpop.permute.xlu0 %749  ;;  %v820_v52 = vsel %vm196_vm1, %v812_v39, 0.0  ;;  %v821_v55 = vsel %vm196_vm1, %v813_v47, 0.0 }
 0x181   : > { %791 = vst.msk [vmem:[#allocation2 + $0x10] sm:$0xff] %vm196_vm1, %v783_v17  ;;  %v769_v43 = vadd.f32 %v750_v34, %v1364_v2  ;;  %v822_v57 = vadd.f32 %v821_v55, %v820_v52 }
 0x182   : > { %v786_v37 = vadd.f32 %v778_v35, %v770_v18 }
 0x183   : > { %v785_v40 = vadd.f32 %v777_v38, %v769_v43  ;;  %v756_v44 = vpop.permute.xlu1 %755  ;;  %v780_v48 = vld [vmem:[#allocation2 + $0x38] sm:$0xff] }
 0x184   : > { %794 = vst.msk [vmem:[#allocation2 + $0x28] sm:$0xff] %vm196_vm1, %v786_v37  ;;  %v772_v63 = vadd.f32 %v1379_v19, %v756_v44  ;;  %v754_v45 = vpop.permute.xlu0 %753  ;;  %v779_v50 = vld [vmem:[#allocation2 + $0x30] sm:$0xff] }
 0x185   : > { %793 = vst.msk [vmem:[#allocation2 + $0x20] sm:$0xff] %vm196_vm1, %v785_v40  ;;  %v771_v2 = vadd.f32 %v754_v45, %v1382_v26 }
 0x186   : > { %v788_v49 = vadd.f32 %v780_v48, %v772_v63 }
 0x187   : > { %v800_v51 = vld [vmem:[#allocation2 + $0x18] sm:$0xff]  ;;  %v787_v53 = vadd.f32 %v779_v50, %v771_v2 }
 0x188   : > { %v799_v54 = vld [vmem:[#allocation2 + $0x10] sm:$0xff]  ;;  %796 = vst.msk [vmem:[#allocation2 + $0x38] sm:$0xff] %vm196_vm1, %v788_v49  ;;  %v815_v56 = vadd.f32 %v1082_v36, %v800_v51 }
 0x189   : > { %v814_v19 = vadd.f32 %v1082_v36, %v799_v54  ;;  %795 = vst.msk [vmem:[#allocation2 + $0x30] sm:$0xff] %vm196_vm1, %v787_v53 }
 0x18a   : > { %v825_v0 = vsel %vm196_vm1, %v815_v56, 0.0 }
 0x18b   : > { %v823_v58 = vsel %vm196_vm1, %v814_v19, 0.0  ;;  %v802_v59 = vld [vmem:[#allocation2 + $0x28] sm:$0xff] }
 0x18c   : > { %v824_v26 = vadd.f32 %v823_v58, %v822_v57  ;;  %v801_v60 = vld [vmem:[#allocation2 + $0x20] sm:$0xff]  ;;  %v817_v21 = vadd.f32 %v1082_v36, %v802_v59 }
 0x18d   : > { %v816_v1 = vadd.f32 %v1082_v36, %v801_v60 }
 0x18e   : > { %v826_v3 = vadd.f32 %v825_v0, %v824_v26  ;;  %v829_v41 = vsel %vm196_vm1, %v817_v21, 0.0 }
 0x18f   : > { %v827_v4 = vsel %vm196_vm1, %v816_v1, 0.0  ;;  %v804_v23 = vld [vmem:[#allocation2 + $0x38] sm:$0xff] }
 0x190   : > { %v828_v5 = vadd.f32 %v827_v4, %v826_v3  ;;  %v803_v22 = vld [vmem:[#allocation2 + $0x30] sm:$0xff]  ;;  %v819_v6 = vadd.f32 %v1082_v36, %v804_v23 }
 0x191   : > { %v818_v7 = vadd.f32 %v1082_v36, %v803_v22 }
 0x192   : > { %v830_v8 = vadd.f32 %v829_v41, %v828_v5  ;;  %v833_v11 = vsel %vm196_vm1, %v819_v6, 0.0 }
 0x193   : > { %v831_v9 = vsel %vm196_vm1, %v818_v7, 0.0 }
 0x194   : > { %v832_v10 = vadd.f32 %v831_v9, %v830_v8 }
 0x196   : > { %v834_v12 = vadd.f32 %v833_v11, %v832_v10 }
 0x198   : > { %v835_v42 = vsel %vm196_vm1, %v834_v12, 0.0 }
 0x199   : > { %v836_v13 = vrot.slane %v835_v42, 4 }
 0x19b   : > { %v837_v61 = vadd.f32 %v836_v13, %v835_v42 }
 0x19d   : > { %v838_v14 = vrot.slane %v837_v61, 2 }
 0x19f   : > { %v839_v15 = vadd.f32 %v838_v14, %v837_v61 }
 0x1a1   : > { %v840_v62 = vrot.slane %v839_v15, 1 }
 0x1a3   : > { %v841_v16 = vadd.f32 %v840_v62, %v839_v15 }
 0x1a5   : > { %v842_v25 = vmul.f32 0.015625, %v841_v16 }
 0x1a7   : > { %v843_v20 = vsub.f32 %v812_v39, %v842_v25  ;;  %v844_v24 = vsub.f32 %v813_v47, %v842_v25  ;;  %v845_v27 = vsub.f32 %v814_v19, %v842_v25  ;;  %v846_v28 = vsub.f32 %v815_v56, %v842_v25 }
 0x1a8   : > { %v847_v29 = vsub.f32 %v816_v1, %v842_v25  ;;  %v848_v32 = vsub.f32 %v817_v21, %v842_v25  ;;  %v849_v43 = vsub.f32 %v818_v7, %v842_v25  ;;  %v850_v38 = vsub.f32 %v819_v6, %v842_v25 }
 0x1a9   : > { %v851_v30 = vmul.f32 %v843_v20, %v843_v20  ;;  %v852_v31 = vmul.f32 %v844_v24, %v844_v24  ;;  %v853_v17 = vmul.f32 %v845_v27, %v845_v27  ;;  %v854_v33 = vmul.f32 %v846_v28, %v846_v28 }
 0x1aa   : > { %v855_v36 = vmul.f32 %v847_v29, %v847_v29  ;;  %v856_v39 = vmul.f32 %v848_v32, %v848_v32  ;;  %v857_v63 = vmul.f32 %v849_v43, %v849_v43  ;;  %v858_v48 = vmul.f32 %v850_v38, %v850_v38 }
 0x1ab   : > { %v859_v18 = vsel %vm196_vm1, %v851_v30, 0.0  ;;  %v860_v34 = vsel %vm196_vm1, %v852_v31, 0.0  ;;  %v862_v46 = vsel %vm196_vm1, %v853_v17, 0.0  ;;  %v864_v40 = vsel %vm196_vm1, %v854_v33, 0.0 }
 0x1ac   : > { %v861_v35 = vadd.f32 %v860_v34, %v859_v18  ;;  %v866_v45 = vsel %vm196_vm1, %v855_v36, 0.0  ;;  %v868_v2 = vsel %vm196_vm1, %v856_v39, 0.0  ;;  %v870_v50 = vsel %vm196_vm1, %v857_v63, 0.0 }
 0x1ad   : > { %v872_v52 = vsel %vm196_vm1, %v858_v48, 0.0 }
 0x1ae   : > { %v863_v37 = vadd.f32 %v862_v46, %v861_v35 }
 0x1b0   : > { %v865_v44 = vadd.f32 %v864_v40, %v863_v37 }
 0x1b2   : > { %v867_v47 = vadd.f32 %v866_v45, %v865_v44 }
 0x1b4   : > { %v869_v49 = vadd.f32 %v868_v2, %v867_v47 }
 0x1b6   : > { %v871_v51 = vadd.f32 %v870_v50, %v869_v49 }
 0x1b8   : > { %v873_v53 = vadd.f32 %v872_v52, %v871_v51 }
 0x1ba   : > { %v874_v54 = vsel %vm196_vm1, %v873_v53, 0.0 }
 0x1bb   : > { %v875_v55 = vrot.slane %v874_v54, 4 }
 0x1bd   : > { %v876_v56 = vadd.f32 %v875_v55, %v874_v54 }
 0x1bf   : > { %v877_v19 = vrot.slane %v876_v56, 2 }
 0x1c1   : > { %v878_v57 = vadd.f32 %v877_v19, %v876_v56 }
 0x1c3   : > { %v879_v58 = vrot.slane %v878_v57, 1 }
 0x1c5   : > { %v880_v59 = vadd.f32 %v879_v58, %v878_v57 }
 0x1c7   : > { %v881_v26 = vmul.f32 0.015625, %v880_v59 }
 0x1c9   : > { %v882_v60 = vadd.f32 1e-05, %v881_v26 }
 0x1cb   : > { %1193 = vrsqrt.f32 %v882_v60 }
 0x1d5   : > { %v1194_v0 = vpop.eup %1193 }
 0x1d6   : > { %v884_v21 = vmul.f32 %v1194_v0, %v843_v20  ;;  %v885_v1 = vmul.f32 %v1194_v0, %v844_v24  ;;  %v886_v3 = vmul.f32 %v1194_v0, %v845_v27  ;;  %v887_v4 = vmul.f32 %v1194_v0, %v846_v28 }
 0x1d7   : > { %v888_v23 = vmul.f32 %v1194_v0, %v847_v29  ;;  %v889_v5 = vmul.f32 %v1194_v0, %v848_v32  ;;  %v890_v22 = vmul.f32 %v1194_v0, %v849_v43  ;;  %v891_v41 = vmul.f32 %v1194_v0, %v850_v38 }
 0x1d8   : > { %vm892_vm4 = vcmp.ge.f32.partialorder %v884_v21, 0.0  ;;  %vm893_vm5 = vcmp.ge.f32.partialorder %v885_v1, 0.0  ;;  %vm894_vm6 = vcmp.ge.f32.partialorder %v886_v3, 0.0  ;;  %vm895_vm7 = vcmp.ge.f32.partialorder %v887_v4, 0.0 }
 0x1d9   : > { %vm896_vm8 = vcmp.ge.f32.partialorder %v888_v23, 0.0  ;;  %vm897_vm9 = vcmp.ge.f32.partialorder %v889_v5, 0.0  ;;  %vm898_vm10 = vcmp.ge.f32.partialorder %v890_v22, 0.0  ;;  %vm899_vm11 = vcmp.ge.f32.partialorder %v891_v41, 0.0 }
 0x1da   : > { %v900_v6 = vmul.f32 0.2, %v884_v21  ;;  %v901_v7 = vmul.f32 0.2, %v885_v1  ;;  %v902_v8 = vmul.f32 0.2, %v886_v3 }
 0x1db   : > { %v903_v9 = vmul.f32 0.2, %v887_v4  ;;  %v904_v10 = vmul.f32 0.2, %v888_v23  ;;  %v905_v11 = vmul.f32 0.2, %v889_v5 }
 0x1dc   : > { %v906_v12 = vmul.f32 0.2, %v890_v22  ;;  %v907_v42 = vmul.f32 0.2, %v891_v41  ;;  %v908_v13 = vsel %vm892_vm4, %v884_v21, %v900_v6  ;;  %v909_v61 = vsel %vm893_vm5, %v885_v1, %v901_v7 }
 0x1dd   : > { %v910_v14 = vsel %vm894_vm6, %v886_v3, %v902_v8  ;;  %v911_v15 = vsel %vm895_vm7, %v887_v4, %v903_v9  ;;  %v912_v62 = vsel %vm896_vm8, %v888_v23, %v904_v10  ;;  %v913_v16 = vsel %vm897_vm9, %v889_v5, %v905_v11 }
 0x1de   : > { %v914_v25 = vsel %vm898_vm10, %v890_v22, %v906_v12  ;;  %v915_v20 = vsel %vm899_vm11, %v891_v41, %v907_v42  ;;  %v916_v24 = vpack.c.bf16 %v908_v13, %v908_v13  ;;  %v917_v27 = vpack.c.bf16 %v909_v61, %v909_v61 }
 0x1df   : > { %v918_v28 = vpack.c.bf16 %v910_v14, %v910_v14  ;;  %v919_v29 = vpack.c.bf16 %v911_v15, %v911_v15  ;;  %v920_v30 = vpack.c.bf16 %v912_v62, %v912_v62  ;;  %v921_v31 = vpack.c.bf16 %v913_v16, %v913_v16 }
 0x1e0   : > { %v922_v17 = vpack.c.bf16 %v914_v25, %v914_v25  ;;  %v923_v32 = vpack.c.bf16 %v915_v20, %v915_v20  ;;  %925 = vst.msk [vmem:[%s192_s7] sm:$0xf] %vm924_vm3, %v916_v24  ;;  %926 = vst.msk [vmem:[%s192_s7 + $0x4] sm:$0xf] %vm924_vm3, %v917_v27 }
 0x1e1   : > { %927 = vst.msk [vmem:[%s192_s7 + $0x8] sm:$0xf] %vm924_vm3, %v918_v28  ;;  %928 = vst.msk [vmem:[%s192_s7 + $0xc] sm:$0xf] %vm924_vm3, %v919_v29 }
 0x1e2   : > { %929 = vst.msk [vmem:[%s192_s7 + $0x10] sm:$0xf] %vm924_vm3, %v920_v30  ;;  %930 = vst.msk [vmem:[%s192_s7 + $0x14] sm:$0xf] %vm924_vm3, %v921_v31 }
 0x1e3   : > { %931 = vst.msk [vmem:[%s192_s7 + $0x18] sm:$0xf] %vm924_vm3, %v922_v17  ;;  %932 = vst.msk [vmem:[%s192_s7 + $0x1c] sm:$0xf] %vm924_vm3, %v923_v32 }
 0x1e4 PF: > { %s13_s14 = sadd.s32 1, %s1217_s14   ;;  %s1485_s12 = smov %s1213_s13 }
 0x1e5   : > { %p10_p5 = scmp.ge.s32.totalorder %s13_s14, 4   ;;  %s1486_s13 = smov %s1488_s15 }
 0x1e7   :  { %12 = sbr.rel (!%p10_p5) target bundleno = 2 (0x2), region = 65 }

// kernel: path_discriminator_forward.7
= control target key start
LH: loop header
LB: loop body
LE: loop exit
PB: predicated region body
PF: predicated region fallthrough
CT: control target
= control target key end

     0   :  { %s816_s12 = smov 0   ;;  %s818_s13 = smov 0   ;;  %s906_s0 = inlined_call_operand.vmem [shape: bf16[2,40,64], index: 0, kind: input, shape index: {}]   ;;  %s907_s1 = inlined_call_operand.vmem [shape: bf16[2,64,64], index: 1, kind: input, shape index: {}]   ;;  %s908_s2 = inlined_call_operand.vmem [shape: f32[1,32], index: 2, kind: input, shape index: {}]   ;;  %s909_s3 = inlined_call_operand.vmem [shape: bf16[2,4,4,32], index: 3, kind: output, shape index: {}]  }
   0x1   :  { %s820_s14 = smov 0  }
   0x2 LB: > { %s25_s15 = sadd.s32 1, %s788_s13  ;;  %p657_p0 = scmp.ge.s32.totalorder %s792_s14, 1  ;;  %s792_s14 = sphi %s820_s14, %s13_s14   ;;  %s788_s13 = sphi %s818_s13, %s911_s13   ;;  %s784_s12 = sphi %s816_s12, %s910_s12  }
   0x3   : > { %p27_p1 = scmp.ge.s32.totalorder %s25_s15, 2  ;;  %p151_p2 = scmp.lt.s32.totalorder %s792_s14, 3 }
   0x5   : > { %s913_s15 = smov (%p27_p1, %s25_s15), 0  ;;  %p152_p3 = pnand %p657_p0, %p151_p2 }
   0x6   : > { %v756_v0 = vld [vmem:[%s907_s1] sm:$0xff] (!%p152_p3)   ;;  %p179_p4 = scmp.lt.s32.totalorder (!%p152_p3), %s784_s12, 1  ;;  %v757_v1 = vld [vmem:[%s907_s1 + $0x8] sm:$0xff] (!%p152_p3)   ;;  %v759_v3 = vld [vmem:[%s907_s1 + $0x10] sm:$0xff] (!%p152_p3)   ;;  %vm252_vm0 = vcmask (!%p152_p3), 523264   ;;  %vm196_vm1 = vcmask (!%p152_p3), 257024  }
   0x7   : > { %155 = sbr.rel (%p152_p3) target bundleno = 452 (0x1c4), region = 32  ;;  %705 = vmatprep.subr.bf16.mxu0 (!%p152_p3), %v756_v0  ;;  %v758_v2 = vld [vmem:[%s907_s1 + $0x20] sm:$0xff] (!%p152_p3)   ;;  %v760_v4 = vld [vmem:[%s907_s1 + $0x28] sm:$0xff] (!%p152_p3)   ;;  %v762_v5 = vld [vmem:[%s907_s1 + $0x30] sm:$0xff] (!%p152_p3)   ;;  %v794_v12 = vmov (!%p152_p3), 0.0   ;;  %s795_s9 = smov (!%p152_p3), 96  }
   0x8   : > { %706 = vmatpush3.bf16.msra.mxu0 (!%p152_p3), %v756_v0  ;;  %717 = vmatprep.subr.bf16.mxu1 (!%p152_p3), %v758_v2  ;;  %v761_v7 = vld [vmem:[%s907_s1 + $0x18] sm:$0xff] (!%p152_p3)   ;;  %199 = vst.msk [vmem:[#allocation2 + $0x8] sm:$0xf] (!%p152_p3), %vm196_vm1, %v794_v12  ;;  %197 = vst.msk [vmem:[#allocation2] sm:$0xf] (!%p152_p3), %vm196_vm1, %v794_v12  ;;  %vm563_vm6 = vcmask (!%p152_p3), 254976  }
   0x9   : > { %707 = vmatprep.subr.bf16.mxu0 (!%p152_p3), %v757_v1  ;;  %718 = vmatpush3.bf16.msra.mxu1 (!%p152_p3), %v758_v2  ;;  %v765_v8 = vld [vmem:[%s907_s1 + $0x38] sm:$0xff] (!%p152_p3)   ;;  %198 = vst.msk [vmem:[#allocation2 + $0x4] sm:$0xf] (!%p152_p3), %vm196_vm1, %v794_v12  ;;  %200 = vst.msk [vmem:[#allocation2 + $0xc] sm:$0xf] (!%p152_p3), %vm196_vm1, %v794_v12 }
   0xa   : > { %719 = vmatprep.subr.bf16.mxu1 (!%p152_p3), %v760_v4  ;;  %v689_v61 = vld [vmem:[%s908_s2] ss:$0 sm:$0xff] (!%p152_p3) }
   0xc   : > { %708 = vmatpush3.bf16.msra.mxu0 (!%p152_p3), %v757_v1 }
   0xd   : > { %709 = vmatprep.subr.bf16.mxu0 (!%p152_p3), %v759_v3  ;;  %720 = vmatpush3.bf16.msra.mxu1 (!%p152_p3), %v760_v4 }
   0xe   : > { %s915_s12 = smov (!%p179_p4, %s784_s12), 1  ;;  %721 = vmatprep.subr.bf16.mxu1 %v762_v5 }
   0xf   : > { %s729_s26 = smul.u32 20, %s915_s12  ;;  %v334_v29 = vld [vmem:[#allocation2 + $0x8] sm:$0xf]  ;;  %v332_v32 = vld [vmem:[#allocation2] sm:$0xf]  ;;  %s692_s16 = sshll.u32 %s915_s12, 3 }
  0x10   : > { %710 = vmatpush3.bf16.msra.mxu0 %v759_v3  ;;  %v335_v37 = vld [vmem:[#allocation2 + $0xc] sm:$0xf]  ;;  %v333_v40 = vld [vmem:[#allocation2 + $0x4] sm:$0xf]  ;;  %s192_s19 = scalar_lea.vmem %s909_s3, %s692_s16 }
  0x11   : > { %s183_s4 = scalar_lea.vmem %s906_s0, %s729_s26  ;;  %711 = vmatprep.subr.bf16.mxu0 %v761_v7  ;;  %722 = vmatpush3.bf16.msra.mxu1 %v762_v5 }
  0x12   : > { %v763_v6 = vld [vmem:[%s183_s4] sm:$0xff]   ;;  %v764_v10 = vld [vmem:[%s183_s4 + $0x8] sm:$0xff]   ;;  %723 = vmatprep.subr.bf16.mxu1 %v765_v8 }
  0x13   : > { %713 = vmatprep.mubr.msk.bf16.mxu0 %vm252_vm0, %v763_v6  ;;  %v766_v9 = vld [vmem:[%s183_s4 + $0x4] sm:$0xff]   ;;  %v767_v11 = vld [vmem:[%s183_s4 + $0xc] sm:$0xff]  }
  0x14   : > { %725 = vmatprep.mubr.msk.bf16.mxu1 %vm252_vm0, %v766_v9  ;;  %712 = vmatpush3.bf16.msra.mxu0 %v761_v7 }
  0x15   : > { %724 = vmatpush3.bf16.msra.mxu1 %v765_v8 }
  0x17   : > { %714 = vmatmul.mubr.msk.bf16.vlgmr.msra.gmra.mrb[0].mxu0 %vm252_vm0, %v764_v10 }
  0x18   : > { %726 = vmatmul.mubr.msk.bf16.vlgmr.msra.gmra.mrb[0].mxu1 %vm252_vm0, %v767_v11 }
  0xea   : > { %v715_v13 = vpop.f32.mrb[0].mxu0 }
  0xeb   : > { %v293_v14 = vpop.f32.mrb[1].mxu0  ;;  %v314_v15 = vrot.slane %v715_v13, 1  ;;  %v727_v18 = vpop.f32.mrb[0].mxu1 }
  0xec   : > { %v716_v16 = vpop.f32.mrb[2].mxu0  ;;  %v312_v17 = vrot.slane %v293_v14, 1  ;;  %v437_v20 = vpop.f32.mrb[1].mxu1  ;;  %v458_v28 = vrot.slane %v727_v18, 1 }
  0xed   : > { %320 = vrot.lane.b32.xlu1 %v314_v15, %s795_s9  ;;  %v296_v19 = vpop.f32.mrb[3].mxu0  ;;  %v728_v21 = vpop.f32.mrb[2].mxu1  ;;  %v315_v22 = vrot.slane %v716_v16, 1  ;;  %v456_v26 = vrot.slane %v437_v20, 1 }
  0xee   : > { %316 = vrot.lane.b32.xlu0 %v312_v17, %s795_s9  ;;  %v440_v23 = vpop.f32.mrb[3].mxu1  ;;  %v313_v24 = vrot.slane %v296_v19, 1  ;;  %v459_v27 = vrot.slane %v728_v21, 1 }
  0xef   : > { %v457_v25 = vrot.slane %v440_v23, 1 }
  0xf1   : > { %322 = vrot.lane.b32.xlu1 %v315_v22, %s795_s9 }
  0xf2   : > { %318 = vrot.lane.b32.xlu0 %v313_v24, %s795_s9 }
  0xf5   : > { %462 = vrot.lane.b32.xlu1 %v457_v25, %s795_s9 }
  0xf6   : > { %460 = vrot.lane.b32.xlu0 %v456_v26, %s795_s9 }
  0xf9   : > { %466 = vrot.lane.b32.xlu1 %v459_v27, %s795_s9 }
  0xfa   : > { %464 = vrot.lane.b32.xlu0 %v458_v28, %s795_s9 }
 0x15f   : > { %v321_v30 = vpop.permute.xlu1 %320 }
 0x160   : > { %v330_v31 = vadd.f32 %v715_v13, %v321_v30  ;;  %v317_v33 = vpop.permute.xlu0 %316 }
 0x161   : > { %v328_v34 = vadd.f32 %v317_v33, %v293_v14 }
 0x162   : > { %v338_v35 = vadd.f32 %v334_v29, %v330_v31 }
 0x163   : > { %v336_v36 = vadd.f32 %v332_v32, %v328_v34  ;;  %v323_v38 = vpop.permute.xlu1 %322 }
 0x164   : > { %342 = vst.msk [vmem:[#allocation2 + $0x8] sm:$0xf] %vm196_vm1, %v338_v35  ;;  %v331_v39 = vadd.f32 %v716_v16, %v323_v38  ;;  %v319_v41 = vpop.permute.xlu0 %318 }
 0x165   : > { %340 = vst.msk [vmem:[#allocation2] sm:$0xf] %vm196_vm1, %v336_v36  ;;  %v329_v42 = vadd.f32 %v319_v41, %v296_v19 }
 0x166   : > { %v339_v43 = vadd.f32 %v335_v37, %v331_v39 }
 0x167   : > { %v337_v44 = vadd.f32 %v333_v40, %v329_v42  ;;  %v463_v45 = vpop.permute.xlu1 %462 }
 0x168   : > { %343 = vst.msk [vmem:[#allocation2 + $0xc] sm:$0xf] %vm196_vm1, %v339_v43  ;;  %v461_v46 = vpop.permute.xlu0 %460  ;;  %v473_v55 = vadd.f32 %v463_v45, %v440_v23 }
 0x169   : > { %341 = vst.msk [vmem:[#allocation2 + $0x4] sm:$0xf] %vm196_vm1, %v337_v44  ;;  %v472_v47 = vadd.f32 %v461_v46, %v437_v20 }
 0x16b   : > { %v467_v48 = vpop.permute.xlu1 %466  ;;  %v478_v54 = vld [vmem:[#allocation2 + $0x8] sm:$0xf] }
 0x16c   : > { %v476_v49 = vld [vmem:[#allocation2] sm:$0xf]  ;;  %v465_v50 = vpop.permute.xlu0 %464  ;;  %v475_v53 = vadd.f32 %v728_v21, %v467_v48 }
 0x16d   : > { %v480_v51 = vadd.f32 %v476_v49, %v472_v47  ;;  %v474_v52 = vadd.f32 %v727_v18, %v465_v50 }
 0x16f   : > { %484 = vst.msk [vmem:[#allocation2] sm:$0xf] %vm196_vm1, %v480_v51  ;;  %v479_v56 = vld [vmem:[#allocation2 + $0xc] sm:$0xf]  ;;  %v482_v57 = vadd.f32 %v478_v54, %v474_v52 }
 0x170   : > { %v477_v58 = vld [vmem:[#allocation2 + $0x4] sm:$0xf]  ;;  %v483_v59 = vadd.f32 %v479_v56, %v475_v53 }
 0x171   : > { %v481_v60 = vadd.f32 %v477_v58, %v473_v55  ;;  %486 = vst.msk [vmem:[#allocation2 + $0x8] sm:$0xf] %vm196_vm1, %v482_v57 }
 0x172   : > { %487 = vst.msk [vmem:[#allocation2 + $0xc] sm:$0xf] %vm196_vm1, %v483_v59 }
 0x173   : > { %485 = vst.msk [vmem:[#allocation2 + $0x4] sm:$0xf] %vm196_vm1, %v481_v60 }
 0x176   : > { %v488_v62 = vld [vmem:[#allocation2] sm:$0xf] }
 0x177   : > { %v499_v0 = vadd.f32 %v689_v61, %v488_v62 }
 0x178   : > { %v490_v63 = vld [vmem:[#allocation2 + $0x8] sm:$0xf] }
 0x179   : > { %v491_v2 = vld [vmem:[#allocation2 + $0xc] sm:$0xf]  ;;  %v501_v4 = vadd.f32 %v689_v61, %v490_v63  ;;  %v503_v6 = vsel %vm196_vm1, %v499_v0, 0.0 }
 0x17a   : > { %v489_v1 = vld [vmem:[#allocation2 + $0x4] sm:$0xf]  ;;  %v502_v7 = vadd.f32 %v689_v61, %v491_v2 }
 0x17b   : > { %v500_v3 = vadd.f32 %v689_v61, %v489_v1  ;;  %v506_v9 = vsel %vm196_vm1, %v501_v4, 0.0 }
 0x17c   : > { %v508_v11 = vsel %vm196_vm1, %v502_v7, 0.0 }
 0x17d   : > { %v504_v5 = vsel %vm196_vm1, %v500_v3, 0.0 }
 0x17e   : > { %v505_v8 = vadd.f32 %v504_v5, %v503_v6 }
 0x180   : > { %v507_v10 = vadd.f32 %v506_v9, %v505_v8 }
 0x182   : > { %v509_v12 = vadd.f32 %v508_v11, %v507_v10 }
 0x184   : > { %v510_v13 = vsel %vm196_vm1, %v509_v12, 0.0 }
 0x185   : > { %v511_v14 = vrot.slane %v510_v13, 4 }
 0x187   : > { %v512_v15 = vadd.f32 %v511_v14, %v510_v13 }
 0x189   : > { %v513_v16 = vrot.slane %v512_v15, 2 }
 0x18b   : > { %v514_v17 = vadd.f32 %v513_v16, %v512_v15 }
 0x18d   : > { %v515_v18 = vrot.slane %v514_v17, 1 }
 0x18f   : > { %v516_v19 = vadd.f32 %v515_v18, %v514_v17 }
 0x191   : > { %v517_v20 = vmul.f32 0.0625, %v516_v19 }
 0x193   : > { %v518_v21 = vsub.f32 %v499_v0, %v517_v20  ;;  %v519_v22 = vsub.f32 %v500_v3, %v517_v20  ;;  %v520_v23 = vsub.f32 %v501_v4, %v517_v20  ;;  %v521_v24 = vsub.f32 %v502_v7, %v517_v20 }
 0x195   : > { %v522_v25 = vmul.f32 %v518_v21, %v518_v21  ;;  %v523_v26 = vmul.f32 %v519_v22, %v519_v22  ;;  %v524_v27 = vmul.f32 %v520_v23, %v520_v23  ;;  %v525_v28 = vmul.f32 %v521_v24, %v521_v24 }
 0x197   : > { %v526_v29 = vsel %vm196_vm1, %v522_v25, 0.0  ;;  %v527_v30 = vsel %vm196_vm1, %v523_v26, 0.0  ;;  %v529_v32 = vsel %vm196_vm1, %v524_v27, 0.0  ;;  %v531_v34 = vsel %vm196_vm1, %v525_v28, 0.0 }
 0x198   : > { %v528_v31 = vadd.f32 %v527_v30, %v526_v29 }
 0x19a   : > { %v530_v33 = vadd.f32 %v529_v32, %v528_v31 }
 0x19c   : > { %v532_v35 = vadd.f32 %v531_v34, %v530_v33 }
 0x19e   : > { %v533_v36 = vsel %vm196_vm1, %v532_v35, 0.0 }
 0x19f   : > { %v534_v37 = vrot.slane %v533_v36, 4 }
 0x1a1   : > { %v535_v38 = vadd.f32 %v534_v37, %v533_v36 }
 0x1a3   : > { %v536_v39 = vrot.slane %v535_v38, 2 }
 0x1a5   : > { %v537_v40 = vadd.f32 %v536_v39, %v535_v38 }
 0x1a7   : > { %v538_v41 = vrot.slane %v537_v40, 1 }
 0x1a9   : > { %v539_v42 = vadd.f32 %v538_v41, %v537_v40 }
 0x1ab   : > { %v540_v43 = vmul.f32 0.0625, %v539_v42 }
 0x1ad   : > { %v541_v44 = vadd.f32 1e-05, %v540_v43 }
 0x1af   : > { %768 = vrsqrt.f32 %v541_v44 }
 0x1b9   : > { %v769_v45 = vpop.eup %768 }
 0x1ba   : > { %v543_v46 = vmul.f32 %v769_v45, %v518_v21  ;;  %v544_v47 = vmul.f32 %v769_v45, %v519_v22  ;;  %v545_v48 = vmul.f32 %v769_v45, %v520_v23  ;;  %v546_v49 = vmul.f32 %v769_v45, %v521_v24 }
 0x1bc   : > { %vm547_vm2 = vcmp.ge.f32.partialorder %v543_v46, 0.0  ;;  %vm548_vm3 = vcmp.ge.f32.partialorder %v544_v47, 0.0  ;;  %vm549_vm4 = vcmp.ge.f32.partialorder %v545_v48, 0.0  ;;  %vm550_vm5 = vcmp.ge.f32.partialorder %v546_v49, 0.0 }
 0x1bd   : > { %v551_v50 = vmul.f32 0.2, %v543_v46  ;;  %v552_v51 = vmul.f32 0.2, %v544_v47  ;;  %v553_v52 = vmul.f32 0.2, %v545_v48 }
 0x1be   : > { %v554_v53 = vmul.f32 0.2, %v546_v49 }
 0x1bf   : > { %v555_v54 = vsel %vm547_vm2, %v543_v46, %v551_v50  ;;  %v556_v55 = vsel %vm548_vm3, %v544_v47, %v552_v51  ;;  %v557_v56 = vsel %vm549_vm4, %v545_v48, %v553_v52 }
 0x1c0   : > { %v558_v57 = vsel %vm550_vm5, %v546_v49, %v554_v53  ;;  %v559_v58 = vpack.c.bf16 %v555_v54, %v555_v54  ;;  %v560_v59 = vpack.c.bf16 %v556_v55, %v556_v55  ;;  %v561_v60 = vpack.c.bf16 %v557_v56, %v557_v56 }
 0x1c1   : > { %v562_v61 = vpack.c.bf16 %v558_v57, %v558_v57 }
 0x1c2   : > { %564 = vst.msk [vmem:[%s192_s19] sm:$0x3] %vm563_vm6, %v559_v58  ;;  %565 = vst.msk [vmem:[%s192_s19 + $0x2] sm:$0x3] %vm563_vm6, %v560_v59 }
 0x1c3   : > { %566 = vst.msk [vmem:[%s192_s19 + $0x4] sm:$0x3] %vm563_vm6, %v561_v60  ;;  %567 = vst.msk [vmem:[%s192_s19 + $0x6] sm:$0x3] %vm563_vm6, %v562_v61 }
 0x1c4 PF: > { %s13_s14 = sadd.s32 1, %s792_s14   ;;  %s910_s12 = smov %s788_s13 }
 0x1c5   : > { %p10_p5 = scmp.ge.s32.totalorder %s13_s14, 4   ;;  %s911_s13 = smov %s913_s15 }
 0x1c7   :  { %12 = sbr.rel (!%p10_p5) target bundleno = 2 (0x2), region = 65 }

// kernel: path_discriminator_forward.8
= control target key start
LH: loop header
LB: loop body
LE: loop exit
PB: predicated region body
PF: predicated region fallthrough
CT: control target
= control target key end

     0   :  { %s1147_s12 = smov 0   ;;  %s1149_s13 = smov 0   ;;  %s1396_s0 = inlined_call_operand.vmem [shape: bf16[2,48,32], index: 0, kind: input, shape index: {}]   ;;  %s1397_s1 = inlined_call_operand.vmem [shape: bf16[4,32,256], index: 1, kind: input, shape index: {}]   ;;  %s1398_s2 = inlined_call_operand.vmem [shape: f32[1,64], index: 2, kind: input, shape index: {}]   ;;  %s1399_s3 = inlined_call_operand.vmem [shape: bf16[2,3,3,64], index: 3, kind: output, shape index: {}]  }
   0x1   :  { %s1151_s14 = smov 0  }
   0x2 LB: > { %s25_s15 = sadd.s32 1, %s1118_s13  ;;  %p978_p0 = scmp.ge.s32.totalorder %s1122_s14, 1  ;;  %s1122_s14 = sphi %s1151_s14, %s13_s14   ;;  %s1118_s13 = sphi %s1149_s13, %s1401_s13   ;;  %s1114_s12 = sphi %s1147_s12, %s1400_s12  }
   0x3   : > { %p27_p1 = scmp.ge.s32.totalorder %s25_s15, 2  ;;  %p151_p2 = scmp.lt.s32.totalorder %s1122_s14, 3 }
   0x5   : > { %s1403_s15 = smov (%p27_p1, %s25_s15), 0  ;;  %p152_p3 = pnand %p978_p0, %p151_p2 }
   0x6   : > { %v1066_v0 = vld [vmem:[%s1397_s1 + $0x4] ss:$8 sps:$4 sm:$0xff] (!%p152_p3)   ;;  %p179_p4 = scmp.lt.s32.totalorder (!%p152_p3), %s1114_s12, 1  ;;  %v1068_v1 = vld [vmem:[%s1397_s1] ss:$8 sps:$4 sm:$0xff] (!%p152_p3)   ;;  %v1124_v2 = vmov (!%p152_p3), 0  }
   0x7   : > { %155 = sbr.rel (%p152_p3) target bundleno = 473 (0x1d9), region = 32  ;;  %279 = vmatprep.mubr.bf16.mxu0 (!%p152_p3), %v1124_v2  ;;  %432 = vmatprep.mubr.bf16.mxu1 (!%p152_p3), %v1124_v2  ;;  %v1069_v3 = vld [vmem:[%s1397_s1 + $0x24] ss:$8 sps:$4 sm:$0xff] (!%p152_p3)   ;;  %v1071_v4 = vld [vmem:[%s1397_s1 + $0x20] ss:$8 sps:$4 sm:$0xff] (!%p152_p3)   ;;  %vm240_vm0 = vcmask (!%p152_p3), 261120  }
   0x8   : > { %247 = vmatprep.subr.bf16.mxu0 (!%p152_p3), %v1066_v0  ;;  %v1072_v5 = vld [vmem:[%s1397_s1 + $0x14] ss:$8 sps:$4 sm:$0xff] (!%p152_p3)   ;;  %v1074_v6 = vld [vmem:[%s1397_s1 + $0x10] ss:$8 sps:$4 sm:$0xff] (!%p152_p3)   ;;  %400 = vmatprep.subr.bf16.mxu1 (!%p152_p3), %v1069_v3  ;;  %v1080_v9 = vld [vmem:[%s1397_s1 + $0x40] ss:$8 sps:$4 sm:$0xff] (!%p152_p3)  }
   0x9   : > { %248 = vmatpush1.bf16.msra.mxu0 (!%p152_p3), %v1068_v1  ;;  %v1075_v7 = vld [vmem:[%s1397_s1 + $0x34] ss:$8 sps:$4 sm:$0xff] (!%p152_p3)   ;;  %401 = vmatpush1.bf16.msra.mxu1 (!%p152_p3), %v1071_v4  ;;  %v1077_v8 = vld [vmem:[%s1397_s1 + $0x30] ss:$8 sps:$4 sm:$0xff] (!%p152_p3)   ;;  %v1082_v10 = vld [vmem:[%s1397_s1 + $0x44] ss:$8 sps:$4 sm:$0xff] (!%p152_p3)  }
   0xa   : > { %249 = vmatprep.subr.bf16.mxu0 (!%p152_p3), %v1072_v5  ;;  %402 = vmatprep.subr.bf16.mxu1 (!%p152_p3), %v1075_v7  ;;  %v1085_v13 = vld [vmem:[%s1397_s1 + $0x50] ss:$8 sps:$4 sm:$0xff] (!%p152_p3)   ;;  %v1087_v14 = vld [vmem:[%s1397_s1 + $0x54] ss:$8 sps:$4 sm:$0xff] (!%p152_p3)   ;;  %v1088_v15 = vld [vmem:[%s1397_s1 + $0x60] ss:$8 sps:$4 sm:$0xff] (!%p152_p3)  }
   0xb   : > { %v1090_v16 = vld [vmem:[%s1397_s1 + $0x64] ss:$8 sps:$4 sm:$0xff] (!%p152_p3)   ;;  %v1094_v18 = vld [vmem:[%s1397_s1 + $0x74] ss:$8 sps:$4 sm:$0xff] (!%p152_p3)   ;;  %v1092_v20 = vld [vmem:[%s1397_s1 + $0x70] ss:$8 sps:$4 sm:$0xff] (!%p152_p3)  }
   0xc   : > { %vm196_vm1 = vcmask (!%p152_p3), 518144   ;;  %v1125_v25 = vmov (!%p152_p3), 0.0   ;;  %s1126_s29 = smov (!%p152_p3), 64   ;;  %vm873_vm2 = vcmask (!%p152_p3), 517120   ;;  %vm874_vm3 = vsmask.f32 (!%p152_p3), 1280 }
   0xd   : > { %250 = vmatpush1.bf16.msra.mxu0 (!%p152_p3), %v1074_v6  ;;  %403 = vmatpush1.bf16.msra.mxu1 (!%p152_p3), %v1077_v8  ;;  %197 = vst.msk [vmem:[#allocation2] sm:$0x7] (!%p152_p3), %vm196_vm1, %v1125_v25  ;;  %198 = vst.msk [vmem:[#allocation2 + $0x4] sm:$0x7] (!%p152_p3), %vm196_vm1, %v1125_v25 }
   0xe   : > { %s1405_s12 = smov (!%p179_p4, %s1114_s12), 1  ;;  %553 = vmatprep.subr.bf16.mxu0 %v1082_v10  ;;  %706 = vmatprep.subr.bf16.mxu1 %v1090_v16  ;;  %199 = vst.msk [vmem:[#allocation2 + $0x8] sm:$0x7] %vm196_vm1, %v1125_v25  ;;  %vm875_vm7 = vmand %vm873_vm2, %vm874_vm3 }
   0xf   : > { %s1037_s30 = smul.u32 24, %s1405_s12 }
  0x10   : > { %s1038_s5 = smul.u32 6, %s1405_s12 }
  0x11   : > { %s1195_s8 = scalar_lea.vmem %s1396_s0, %s1037_s30 }
  0x12   : > { %v1078_v11 = vld [vmem:[%s1195_s8] sm:$0xff]   ;;  %v1083_v17 = vld [vmem:[%s1195_s8 + $0x8] ss:$0 sps:$4 sm:$0xff]   ;;  %v1084_v19 = vld [vmem:[%s1195_s8 + $0xc] ss:$0 sps:$4 sm:$0xff]  }
  0x13   : > { %v1079_v12 = vld [vmem:[%s1195_s8 + $0x4] sm:$0xff]   ;;  %987 = vmatmul.mubr.msk.bf16.vlgmr.msra.gmra.mrb[0].mxu0 %vm240_vm0, %v1078_v11  ;;  %v1096_v22 = vld [vmem:[%s1195_s8 + $0xc] sm:$0xff]   ;;  %v1097_v24 = vld [vmem:[%s1195_s8 + $0x14] ss:$0 sps:$4 sm:$0xff]  }
  0x14   : > { %289 = vmatprep.mubr.bf16.mxu0 %v1124_v2  ;;  %554 = vmatpush1.bf16.msra.mxu0 %v1080_v9  ;;  %v1091_v21 = vld [vmem:[%s1195_s8 + $0x8] sm:$0xff]   ;;  %v1095_v23 = vld [vmem:[%s1195_s8 + $0x10] ss:$0 sps:$4 sm:$0xff]   ;;  %s192_s8 = scalar_lea.vmem %s1399_s3, %s1038_s5 }
  0x15   : > { %1002 = vmatmul.mubr.msk.bf16.vlgmr.msra.gmra.mrb[0].mxu1 %vm240_vm0, %v1079_v12  ;;  %555 = vmatprep.subr.bf16.mxu0 %v1087_v14 }
  0x16   : > { %442 = vmatprep.mubr.bf16.mxu1 %v1124_v2  ;;  %707 = vmatpush1.bf16.msra.mxu1 %v1088_v15 }
  0x17   : > { %708 = vmatprep.subr.bf16.mxu1 %v1094_v18 }
  0x18   : > { %556 = vmatpush1.bf16.msra.mxu0 %v1085_v13 }
  0x1a   : > { %709 = vmatpush1.bf16.msra.mxu1 %v1092_v20 }
  0x1b   : > { %988 = vmatmul.mubr.msk.bf16.gmra.mrb[4].mxu0 %vm240_vm0, %v1083_v17 }
  0x1c   : > { %585 = vmatprep.mubr.bf16.mxu0 %v1124_v2 }
  0x1d   : > { %1003 = vmatmul.mubr.msk.bf16.gmra.mrb[4].mxu1 %vm240_vm0, %v1084_v19 }
  0x1e   : > { %738 = vmatprep.mubr.bf16.mxu1 %v1124_v2 }
  0x23   : > { %1017 = vmatmul.mubr.msk.bf16.vlgmr.msra.gmra.mrb[8].mxu0 %vm240_vm0, %v1091_v21 }
  0x24   : > { %595 = vmatprep.mubr.bf16.mxu0 %v1124_v2 }
  0x25   : > { %1032 = vmatmul.mubr.msk.bf16.vlgmr.msra.gmra.mrb[8].mxu1 %vm240_vm0, %v1096_v22 }
  0x26   : > { %748 = vmatprep.mubr.bf16.mxu1 %v1124_v2 }
  0x2b   : > { %1018 = vmatmul.mubr.msk.bf16.gmra.mrb[12].mxu0 %vm240_vm0, %v1095_v23  ;;  %v343_v23 = vld [vmem:[#allocation2] sm:$0x7] }
  0x2d   : > { %1033 = vmatmul.mubr.msk.bf16.gmra.mrb[12].mxu1 %vm240_vm0, %v1097_v24 }
  0xe6   : > { %v1240_v26 = vpop.f32.mrb[0].mxu0 }
  0xe7   : > { %v1242_v27 = vpop.f32.mrb[1].mxu0  ;;  %v301_v28 = vrot.slane %v1240_v26, 1 }
  0xe8   : > { %v1245_v29 = vpop.f32.mrb[0].mxu1  ;;  %v1247_v30 = vpop.f32.mrb[2].mxu0  ;;  %v328_v31 = vrot.slane %v1242_v27, 3  ;;  %v319_v19 = vrot.slane %v1242_v27, 2 }
  0xe9   : > { %v454_v32 = vrot.slane %v1245_v29, 1  ;;  %v1251_v33 = vpop.f32.mrb[1].mxu1  ;;  %304 = vrot.lane.b32.xlu0 %v301_v28, %s1126_s29  ;;  %v1254_v34 = vpop.f32.mrb[3].mxu0  ;;  %v302_v39 = vrot.slane %v1247_v30, 1 }
  0xea   : > { %v1256_v35 = vpop.f32.mrb[2].mxu1  ;;  %331 = vrot.lane.b32.xlu1 %v328_v31, %s1126_s29  ;;  %v329_v47 = vrot.slane %v1254_v34, 3  ;;  %v481_v53 = vrot.slane %v1251_v33, 3  ;;  %v472_v25 = vrot.slane %v1251_v33, 2 }
  0xeb   : > { %v455_v36 = vrot.slane %v1256_v35, 1  ;;  %v1260_v37 = vpop.f32.mrb[3].mxu1 }
  0xec   : > { %v482_v59 = vrot.slane %v1260_v37, 3 }
  0xed   : > { %457 = vrot.lane.b32.xlu0 %v454_v32, %s1126_s29 }
  0xee   : > { %459 = vrot.lane.b32.xlu1 %v455_v36, %s1126_s29  ;;  %v1264_v38 = vpop.f32.mrb[4].mxu0  ;;  %v473_v36 = vrot.slane %v1260_v37, 2 }
  0xef   : > { %v303_v40 = vrot.slane %v1264_v38, 1  ;;  %v1268_v41 = vpop.f32.mrb[5].mxu0 }
  0xf0   : > { %v295_v42 = vpop.f32.mrb[6].mxu0  ;;  %v1270_v43 = vpop.f32.mrb[4].mxu1  ;;  %v330_v49 = vrot.slane %v1268_v41, 3  ;;  %v321_v33 = vrot.slane %v1268_v41, 2 }
  0xf1   : > { %306 = vrot.lane.b32.xlu0 %v302_v39, %s1126_s29  ;;  %v296_v44 = vpop.f32.mrb[7].mxu0  ;;  %v1273_v45 = vpop.f32.mrb[5].mxu1  ;;  %v456_v50 = vrot.slane %v1270_v43, 1 }
  0xf2   : > { %308 = vrot.lane.b32.xlu1 %v303_v40, %s1126_s29  ;;  %v448_v46 = vpop.f32.mrb[6].mxu1  ;;  %v483_v61 = vrot.slane %v1273_v45, 3 }
  0xf3   : > { %v449_v48 = vpop.f32.mrb[7].mxu1 }
  0xf5   : > { %333 = vrot.lane.b32.xlu0 %v329_v47, %s1126_s29 }
  0xf6   : > { %335 = vrot.lane.b32.xlu1 %v330_v49, %s1126_s29  ;;  %v1281_v51 = vpop.f32.mrb[8].mxu0  ;;  %v344_v49 = vld [vmem:[#allocation2 + $0x4] sm:$0x7] }
  0xf7   : > { %v1283_v52 = vpop.f32.mrb[9].mxu0  ;;  %v607_v62 = vrot.slane %v1281_v51, 1 }
  0xf8   : > { %v1286_v54 = vpop.f32.mrb[10].mxu0  ;;  %v1288_v55 = vpop.f32.mrb[8].mxu1  ;;  %v634_v63 = vrot.slane %v1283_v52, 3 }
  0xf9   : > { %461 = vrot.lane.b32.xlu0 %v456_v50, %s1126_s29  ;;  %v1291_v56 = vpop.f32.mrb[11].mxu0  ;;  %v1293_v57 = vpop.f32.mrb[9].mxu1  ;;  %v608_v9 = vrot.slane %v1286_v54, 1  ;;  %v760_v12 = vrot.slane %v1288_v55, 1 }
  0xfa   : > { %484 = vrot.lane.b32.xlu1 %v481_v53, %s1126_s29  ;;  %v1296_v58 = vpop.f32.mrb[10].mxu1  ;;  %v635_v7 = vrot.slane %v1291_v56, 3  ;;  %v787_v15 = vrot.slane %v1293_v57, 3  ;;  %v345_v53 = vld [vmem:[#allocation2 + $0x8] sm:$0x7] }
  0xfb   : > { %v1299_v60 = vpop.f32.mrb[11].mxu1  ;;  %v761_v13 = vrot.slane %v1296_v58, 1 }
  0xfc   : > { %v788_v16 = vrot.slane %v1299_v60, 3 }
  0xfd   : > { %486 = vrot.lane.b32.xlu0 %v482_v59, %s1126_s29 }
  0xfe   : > { %488 = vrot.lane.b32.xlu1 %v483_v61, %s1126_s29  ;;  %v1306_v0 = vpop.f32.mrb[12].mxu0 }
  0xff   : > { %v1308_v1 = vpop.f32.mrb[13].mxu0  ;;  %v609_v10 = vrot.slane %v1306_v0, 1 }
 0x100   : > { %v601_v2 = vpop.f32.mrb[14].mxu0  ;;  %v1310_v3 = vpop.f32.mrb[12].mxu1  ;;  %v636_v11 = vrot.slane %v1308_v1, 3 }
 0x101   : > { %610 = vrot.lane.b32.xlu0 %v607_v62, %s1126_s29  ;;  %v602_v4 = vpop.f32.mrb[15].mxu0  ;;  %v1313_v5 = vpop.f32.mrb[13].mxu1  ;;  %v762_v14 = vrot.slane %v1310_v3, 1  ;;  %v474_v2 = vrot.slane %v1273_v45, 2  ;;  %v625_v45 = vrot.slane %v1283_v52, 2 }
 0x102   : > { %637 = vrot.lane.b32.xlu1 %v634_v63, %s1126_s29  ;;  %v754_v6 = vpop.f32.mrb[14].mxu1  ;;  %v789_v17 = vrot.slane %v1313_v5, 3 }
 0x103   : > { %v755_v8 = vpop.f32.mrb[15].mxu1 }
 0x105   : > { %639 = vrot.lane.b32.xlu0 %v635_v7, %s1126_s29 }
 0x106   : > { %612 = vrot.lane.b32.xlu1 %v608_v9, %s1126_s29 }
 0x109   : > { %614 = vrot.lane.b32.xlu0 %v609_v10, %s1126_s29 }
 0x10a   : > { %641 = vrot.lane.b32.xlu1 %v636_v11, %s1126_s29 }
 0x10d   : > { %763 = vrot.lane.b32.xlu0 %v760_v12, %s1126_s29 }
 0x10e   : > { %765 = vrot.lane.b32.xlu1 %v761_v13, %s1126_s29 }
 0x111   : > { %767 = vrot.lane.b32.xlu0 %v762_v14, %s1126_s29 }
 0x112   : > { %790 = vrot.lane.b32.xlu1 %v787_v15, %s1126_s29 }
 0x115   : > { %792 = vrot.lane.b32.xlu0 %v788_v16, %s1126_s29 }
 0x116   : > { %794 = vrot.lane.b32.xlu1 %v789_v17, %s1126_s29 }
 0x15b   : > { %v305_v18 = vpop.permute.xlu0 %304 }
 0x15c   : > { %v313_v20 = vadd.f32 %v305_v18, %v1240_v26  ;;  %v332_v21 = vpop.permute.xlu1 %331  ;;  %v320_v26 = vrot.slane %v1254_v34, 2 }
 0x15e   : > { %v325_v22 = vadd.f32 %v319_v19, %v313_v20 }
 0x15f   : > { %v458_v24 = vpop.permute.xlu0 %457 }
 0x160   : > { %v340_v28 = vadd.f32 %v332_v21, %v325_v22  ;;  %v466_v31 = vadd.f32 %v458_v24, %v1245_v29  ;;  %v460_v32 = vpop.permute.xlu1 %459 }
 0x161   : > { %v467_v39 = vadd.f32 %v460_v32, %v1256_v35 }
 0x162   : > { %v346_v40 = vadd.f32 %v343_v23, %v340_v28  ;;  %v478_v42 = vadd.f32 %v472_v25, %v466_v31  ;;  %v626_v23 = vrot.slane %v1291_v56, 2 }
 0x163   : > { %v307_v44 = vpop.permute.xlu0 %306  ;;  %v479_v27 = vadd.f32 %v473_v36, %v467_v39 }
 0x164   : > { %349 = vst.msk [vmem:[#allocation2] sm:$0x7] %vm196_vm1, %v346_v40  ;;  %v314_v46 = vadd.f32 %v307_v44, %v1247_v30  ;;  %v309_v47 = vpop.permute.xlu1 %308 }
 0x165   : > { %v315_v29 = vadd.f32 %v309_v47, %v1264_v38 }
 0x166   : > { %v326_v48 = vadd.f32 %v320_v26, %v314_v46  ;;  %v779_v46 = vrot.slane %v1299_v60, 2 }
 0x167   : > { %v334_v37 = vpop.permute.xlu0 %333  ;;  %v327_v50 = vadd.f32 %v321_v33, %v315_v29 }
 0x168   : > { %v341_v35 = vadd.f32 %v334_v37, %v326_v48  ;;  %v336_v59 = vpop.permute.xlu1 %335 }
 0x169   : > { %v342_v61 = vadd.f32 %v336_v59, %v327_v50 }
 0x16a   : > { %v347_v62 = vadd.f32 %v344_v49, %v341_v35  ;;  %v780_v49 = vrot.slane %v1313_v5, 2 }
 0x16b   : > { %v348_v63 = vadd.f32 %v345_v53, %v342_v61  ;;  %v462_v34 = vpop.permute.xlu0 %461  ;;  %v496_v4 = vld [vmem:[#allocation2] sm:$0x7] }
 0x16c   : > { %350 = vst.msk [vmem:[#allocation2 + $0x4] sm:$0x7] %vm196_vm1, %v347_v62  ;;  %v468_v30 = vadd.f32 %v462_v34, %v1270_v43  ;;  %v485_v41 = vpop.permute.xlu1 %484 }
 0x16d   : > { %351 = vst.msk [vmem:[#allocation2 + $0x8] sm:$0x7] %vm196_vm1, %v348_v63  ;;  %v493_v38 = vadd.f32 %v485_v41, %v478_v42 }
 0x16e   : > { %v480_v6 = vadd.f32 %v474_v2, %v468_v30 }
 0x16f   : > { %v499_v7 = vadd.f32 %v496_v4, %v493_v38  ;;  %v487_v8 = vpop.permute.xlu0 %486 }
 0x170   : > { %v489_v9 = vpop.permute.xlu1 %488  ;;  %v494_v10 = vadd.f32 %v487_v8, %v479_v27  ;;  %v778_v27 = vrot.slane %v1293_v57, 2 }
 0x171   : > { %502 = vst.msk [vmem:[#allocation2] sm:$0x7] %vm196_vm1, %v499_v7  ;;  %v495_v12 = vadd.f32 %v489_v9, %v480_v6 }
 0x173   : > { %v497_v11 = vld [vmem:[#allocation2 + $0x4] sm:$0x7]  ;;  %v611_v13 = vpop.permute.xlu0 %610 }
 0x174   : > { %v500_v14 = vadd.f32 %v497_v11, %v494_v10  ;;  %v498_v15 = vld [vmem:[#allocation2 + $0x8] sm:$0x7]  ;;  %v619_v43 = vadd.f32 %v611_v13, %v1281_v51  ;;  %v638_v16 = vpop.permute.xlu1 %637  ;;  %v627_v51 = vrot.slane %v1308_v1, 2 }
 0x175   : > { %v501_v17 = vadd.f32 %v498_v15, %v495_v12 }
 0x176   : > { %503 = vst.msk [vmem:[#allocation2 + $0x4] sm:$0x7] %vm196_vm1, %v500_v14  ;;  %v631_v18 = vadd.f32 %v625_v45, %v619_v43 }
 0x177   : > { %504 = vst.msk [vmem:[#allocation2 + $0x8] sm:$0x7] %vm196_vm1, %v501_v17  ;;  %v640_v19 = vpop.permute.xlu0 %639 }
 0x178   : > { %v649_v20 = vld [vmem:[#allocation2] sm:$0x7]  ;;  %v646_v21 = vadd.f32 %v638_v16, %v631_v18  ;;  %v613_v22 = vpop.permute.xlu1 %612 }
 0x179   : > { %v620_v24 = vadd.f32 %v613_v22, %v1286_v54 }
 0x17a   : > { %v652_v52 = vadd.f32 %v649_v20, %v646_v21 }
 0x17b   : > { %v632_v25 = vadd.f32 %v626_v23, %v620_v24  ;;  %v615_v28 = vpop.permute.xlu0 %614 }
 0x17c   : > { %655 = vst.msk [vmem:[#allocation2] sm:$0x7] %vm196_vm1, %v652_v52  ;;  %v621_v31 = vadd.f32 %v615_v28, %v1306_v0  ;;  %v642_v32 = vpop.permute.xlu1 %641 }
 0x17d   : > { %v650_v36 = vld [vmem:[#allocation2 + $0x4] sm:$0x7]  ;;  %v647_v39 = vadd.f32 %v640_v19, %v632_v25 }
 0x17e   : > { %v633_v40 = vadd.f32 %v627_v51, %v621_v31  ;;  %v651_v1 = vld [vmem:[#allocation2 + $0x8] sm:$0x7] }
 0x17f   : > { %v653_v42 = vadd.f32 %v650_v36, %v647_v39  ;;  %v764_v44 = vpop.permute.xlu0 %763 }
 0x180   : > { %v648_v56 = vadd.f32 %v642_v32, %v633_v40  ;;  %v772_v54 = vadd.f32 %v764_v44, %v1288_v55  ;;  %v766_v26 = vpop.permute.xlu1 %765 }
 0x181   : > { %656 = vst.msk [vmem:[#allocation2 + $0x4] sm:$0x7] %vm196_vm1, %v653_v42  ;;  %v773_v47 = vadd.f32 %v766_v26, %v1296_v58 }
 0x182   : > { %v654_v0 = vadd.f32 %v651_v1, %v648_v56  ;;  %v784_v33 = vadd.f32 %v778_v27, %v772_v54 }
 0x183   : > { %v768_v29 = vpop.permute.xlu0 %767  ;;  %v785_v48 = vadd.f32 %v779_v46, %v773_v47  ;;  %v802_v50 = vld [vmem:[#allocation2] sm:$0x7] }
 0x184   : > { %657 = vst.msk [vmem:[#allocation2 + $0x8] sm:$0x7] %vm196_vm1, %v654_v0  ;;  %v774_v57 = vadd.f32 %v768_v29, %v1310_v3  ;;  %v791_v37 = vpop.permute.xlu1 %790  ;;  %v1034_v3 = vld [vmem:[%s1398_s2] ss:$0 sm:$0xff] }
 0x185   : > { %v799_v55 = vadd.f32 %v791_v37, %v784_v33  ;;  %v876_v29 = vld [vmem:[%s192_s8] sm:$0x3] }
 0x186   : > { %v786_v35 = vadd.f32 %v780_v49, %v774_v57  ;;  %v879_v49 = vld [vmem:[%s192_s8 + $0x2] sm:$0x3]  ;;  %v882_v57 = vld [vmem:[%s192_s8 + $0x4] sm:$0x3] }
 0x187   : > { %v805_v60 = vadd.f32 %v802_v50, %v799_v55  ;;  %v793_v53 = vpop.permute.xlu0 %792 }
 0x188   : > { %v803_v59 = vld [vmem:[#allocation2 + $0x4] sm:$0x7]  ;;  %v800_v61 = vadd.f32 %v793_v53, %v785_v48  ;;  %v795_v62 = vpop.permute.xlu1 %794 }
 0x189   : > { %808 = vst.msk [vmem:[#allocation2] sm:$0x7] %vm196_vm1, %v805_v60  ;;  %v801_v58 = vadd.f32 %v795_v62, %v786_v35 }
 0x18a   : > { %v806_v63 = vadd.f32 %v803_v59, %v800_v61 }
 0x18b   : > { %v804_v34 = vld [vmem:[#allocation2 + $0x8] sm:$0x7] }
 0x18c   : > { %809 = vst.msk [vmem:[#allocation2 + $0x4] sm:$0x7] %vm196_vm1, %v806_v63  ;;  %v807_v5 = vadd.f32 %v804_v34, %v801_v58 }
 0x18e   : > { %810 = vst.msk [vmem:[#allocation2 + $0x8] sm:$0x7] %vm196_vm1, %v807_v5 }
 0x190   : > { %v811_v2 = vld [vmem:[#allocation2] sm:$0x7] }
 0x191   : > { %v821_v30 = vadd.f32 %v1034_v3, %v811_v2 }
 0x193   : > { %v812_v41 = vld [vmem:[#allocation2 + $0x4] sm:$0x7]  ;;  %v824_v6 = vsel %vm196_vm1, %v821_v30, 0.0 }
 0x194   : > { %v822_v38 = vadd.f32 %v1034_v3, %v812_v41 }
 0x195   : > { %v813_v4 = vld [vmem:[#allocation2 + $0x8] sm:$0x7] }
 0x196   : > { %v825_v7 = vsel %vm196_vm1, %v822_v38, 0.0  ;;  %v823_v8 = vadd.f32 %v1034_v3, %v813_v4 }
 0x197   : > { %v826_v9 = vadd.f32 %v825_v7, %v824_v6 }
 0x198   : > { %v827_v10 = vsel %vm196_vm1, %v823_v8, 0.0 }
 0x199   : > { %v828_v11 = vadd.f32 %v827_v10, %v826_v9 }
 0x19b   : > { %v829_v12 = vsel %vm196_vm1, %v828_v11, 0.0 }
 0x19c   : > { %v830_v13 = vrot.slane %v829_v12, 4 }
 0x19e   : > { %v831_v45 = vadd.f32 %v830_v13, %v829_v12 }
 0x1a0   : > { %v832_v14 = vrot.slane %v831_v45, 2 }
 0x1a2   : > { %v833_v15 = vadd.f32 %v832_v14, %v831_v45 }
 0x1a4   : > { %v834_v43 = vrot.slane %v833_v15, 1 }
 0x1a6   : > { %v835_v16 = vadd.f32 %v834_v43, %v833_v15 }
 0x1a8   : > { %v836_v17 = vmul.f32 0.11111111, %v835_v16 }
 0x1aa   : > { %v837_v18 = vsub.f32 %v821_v30, %v836_v17  ;;  %v838_v19 = vsub.f32 %v822_v38, %v836_v17  ;;  %v839_v20 = vsub.f32 %v823_v8, %v836_v17 }
 0x1ac   : > { %v840_v21 = vmul.f32 %v837_v18, %v837_v18  ;;  %v841_v22 = vmul.f32 %v838_v19, %v838_v19  ;;  %v842_v23 = vmul.f32 %v839_v20, %v839_v20 }
 0x1ae   : > { %v843_v24 = vsel %vm196_vm1, %v840_v21, 0.0  ;;  %v844_v52 = vsel %vm196_vm1, %v841_v22, 0.0  ;;  %v846_v28 = vsel %vm196_vm1, %v842_v23, 0.0 }
 0x1af   : > { %v845_v25 = vadd.f32 %v844_v52, %v843_v24 }
 0x1b1   : > { %v847_v51 = vadd.f32 %v846_v28, %v845_v25 }
 0x1b3   : > { %v848_v31 = vsel %vm196_vm1, %v847_v51, 0.0 }
 0x1b4   : > { %v849_v32 = vrot.slane %v848_v31, 4 }
 0x1b6   : > { %v850_v36 = vadd.f32 %v849_v32, %v848_v31 }
 0x1b8   : > { %v851_v39 = vrot.slane %v850_v36, 2 }
 0x1ba   : > { %v852_v40 = vadd.f32 %v851_v39, %v850_v36 }
 0x1bc   : > { %v853_v42 = vrot.slane %v852_v40, 1 }
 0x1be   : > { %v854_v44 = vadd.f32 %v853_v42, %v852_v40 }
 0x1c0   : > { %v855_v27 = vmul.f32 0.11111111, %v854_v44 }
 0x1c2   : > { %v856_v56 = vadd.f32 1e-05, %v855_v27 }
 0x1c4   : > { %1098 = vrsqrt.f32 %v856_v56 }
 0x1ce   : > { %v1099_v54 = vpop.eup %1098 }
 0x1cf   : > { %v858_v26 = vmul.f32 %v1099_v54, %v837_v18  ;;  %v859_v46 = vmul.f32 %v1099_v54, %v838_v19  ;;  %v860_v1 = vmul.f32 %v1099_v54, %v839_v20 }
 0x1d1   : > { %vm861_vm4 = vcmp.ge.f32.partialorder %v858_v26, 0.0  ;;  %vm862_vm5 = vcmp.ge.f32.partialorder %v859_v46, 0.0  ;;  %vm863_vm6 = vcmp.ge.f32.partialorder %v860_v1, 0.0  ;;  %v864_v47 = vmul.f32 0.2, %v858_v26 }
 0x1d2   : > { %v865_v0 = vmul.f32 0.2, %v859_v46  ;;  %v866_v33 = vmul.f32 0.2, %v860_v1 }
 0x1d3   : > { %v867_v48 = vsel %vm861_vm4, %v858_v26, %v864_v47 }
 0x1d4   : > { %v868_v37 = vsel %vm862_vm5, %v859_v46, %v865_v0  ;;  %v869_v55 = vsel %vm863_vm6, %v860_v1, %v866_v33  ;;  %v870_v50 = vpack.c.bf16 %v867_v48, %v867_v48 }
 0x1d5   : > { %v871_v35 = vpack.c.bf16 %v868_v37, %v868_v37  ;;  %v872_v60 = vpack.c.bf16 %v869_v55, %v869_v55 }
 0x1d6   : > { %v877_v53 = vsel %vm875_vm7, %v870_v50, %v876_v29 }
 0x1d7   : > { %878 = vst [vmem:[%s192_s8] sm:$0x3] %v877_v53  ;;  %v880_v59 = vsel %vm875_vm7, %v871_v35, %v879_v49  ;;  %v883_v61 = vsel %vm875_vm7, %v872_v60, %v882_v57 }
 0x1d8   : > { %881 = vst [vmem:[%s192_s8 + $0x2] sm:$0x3] %v880_v59  ;;  %884 = vst [vmem:[%s192_s8 + $0x4] sm:$0x3] %v883_v61 }
 0x1d9 PF: > { %s13_s14 = sadd.s32 1, %s1122_s14   ;;  %s1400_s12 = smov %s1118_s13 }
 0x1da   : > { %p10_p5 = scmp.ge.s32.totalorder %s13_s14, 4   ;;  %s1401_s13 = smov %s1403_s15 }
 0x1dc   :  { %12 = sbr.rel (!%p10_p5) target bundleno = 2 (0x2), region = 69 }

// kernel: path_discriminator_forward.9
= control target key start
LH: loop header
LB: loop body
LE: loop exit
PB: predicated region body
PF: predicated region fallthrough
CT: control target
= control target key end

     0   :  { %s1050_s14 = smov 0   ;;  %s1052_s15 = smov 0   ;;  %s1255_s0 = inlined_call_operand.vmem [shape: bf16[2,40,64], index: 0, kind: input, shape index: {}]   ;;  %s1256_s1 = inlined_call_operand.vmem [shape: bf16[4,64,4], index: 1, kind: input, shape index: {}]   ;;  %s1257_s2 = inlined_call_operand.<no memory space> [shape: f32[1,1], index: 2, kind: input, shape index: {}]   ;;  %s1258_s3 = inlined_call_operand.vmem [shape: f32[2,2,2,1], index: 3, kind: output, shape index: {}]  }
   0x1   :  { %v8_v0 = vstv %s1257_s2  ;;  %s1054_s16 = smov 0  }
   0x2   :  { %9 = vst [vmem:[#allocation3] sm:$0x1] %v8_v0 }
   0x3 LB: > { %s27_s2 = sadd.s32 1, %s1016_s15  ;;  %p818_p0 = scmp.ge.s32.totalorder %s1020_s16, 1  ;;  %s1020_s16 = sphi %s1054_s16, %s15_s16   ;;  %s1016_s15 = sphi %s1052_s15, %s1260_s15   ;;  %s1012_s14 = sphi %s1050_s14, %s1259_s14  }
   0x4   : > { %p29_p1 = scmp.ge.s32.totalorder %s27_s2, 2  ;;  %p153_p2 = scmp.lt.s32.totalorder %s1020_s16, 3 }
   0x6   : > { %s1262_s2 = smov (%p29_p1, %s27_s2), 0  ;;  %p154_p3 = pnand %p818_p0, %p153_p2 }
   0x7   : > { %v978_v1 = vld [vmem:[%s1256_s1] sm:$0xff] (!%p154_p3)   ;;  %v1022_v2 = vmov (!%p154_p3), 0.0   ;;  %v979_v3 = vld [vmem:[%s1256_s1 + $0x8] sm:$0xff] (!%p154_p3)   ;;  %vm1023_vm0 = vmmov (!%p154_p3), 0   ;;  %p181_p4 = scmp.lt.s32.totalorder (!%p154_p3), %s1012_s14, 1  ;;  %v981_v6 = vld [vmem:[%s1256_s1 + $0x10] sm:$0xff] (!%p154_p3)  }
   0x8   : > { %157 = sbr.rel (%p154_p3) target bundleno = 412 (0x19c), region = 32  ;;  %900 = vmatprep.subr.bf16.mxu0 (!%p154_p3), %v1022_v2  ;;  %912 = vmatprep.subr.bf16.mxu1 (!%p154_p3), %v1022_v2  ;;  %v980_v4 = vld [vmem:[%s1256_s1 + $0x20] sm:$0xff] (!%p154_p3)   ;;  %v982_v5 = vld [vmem:[%s1256_s1 + $0x28] sm:$0xff] (!%p154_p3)   ;;  %v985_v7 = vld [vmem:[%s1256_s1 + $0x30] sm:$0xff] (!%p154_p3)   ;;  %vm245_vm1 = vcmask (!%p154_p3), 523264   ;;  %vm198_vm2 = vcmask (!%p154_p3), 1024  }
   0x9   : > { %901 = vmatpush3.bf16.msra.mxu0 (!%p154_p3), %v978_v1  ;;  %908 = vmatprep.mubr.msk.bf16.mxu0 (!%p154_p3), %vm1023_vm0, %v1022_v2  ;;  %v983_v8 = vld [vmem:[%s1256_s1 + $0x18] sm:$0xff] (!%p154_p3)   ;;  %v987_v11 = vld [vmem:[%s1256_s1 + $0x40] sm:$0xff] (!%p154_p3)   ;;  %v989_v14 = vld [vmem:[%s1256_s1 + $0x48] sm:$0xff] (!%p154_p3)   ;;  %199 = vst.msk [vmem:[#allocation2] sm:$0x3] (!%p154_p3), %vm198_vm2, %v1022_v2  ;;  %s1024_s29 = smov (!%p154_p3), 126  }
   0xa   : > { %902 = vmatprep.subr.bf16.mxu0 (!%p154_p3), %v1022_v2  ;;  %920 = vmatprep.mubr.msk.bf16.mxu1 (!%p154_p3), %vm1023_vm0, %v1022_v2  ;;  %v986_v9 = vld [vmem:[%s1256_s1 + $0x38] sm:$0xff] (!%p154_p3)   ;;  %v992_v13 = vld [vmem:[%s1256_s1 + $0x60] sm:$0xff] (!%p154_p3)   ;;  %v994_v15 = vld [vmem:[%s1256_s1 + $0x68] sm:$0xff] (!%p154_p3)   ;;  %200 = vst.msk [vmem:[#allocation2 + $0x2] sm:$0x3] (!%p154_p3), %vm198_vm2, %v1022_v2  ;;  %s1026_s4 = smov (!%p154_p3), 125  }
   0xb   : > { %913 = vmatpush3.bf16.msra.mxu1 (!%p154_p3), %v980_v4  ;;  %v990_v16 = vld [vmem:[%s1256_s1 + $0x50] sm:$0xff] (!%p154_p3)   ;;  %v991_v18 = vld [vmem:[%s1256_s1 + $0x58] sm:$0xff] (!%p154_p3)  }
   0xc   : > { %914 = vmatprep.subr.bf16.mxu1 (!%p154_p3), %v1022_v2  ;;  %v995_v17 = vld [vmem:[%s1256_s1 + $0x70] sm:$0xff] (!%p154_p3)   ;;  %v996_v19 = vld [vmem:[%s1256_s1 + $0x78] sm:$0xff] (!%p154_p3)  }
   0xd   : > { %903 = vmatpush3.bf16.msra.mxu0 (!%p154_p3), %v979_v3 }
   0xe   : > { %904 = vmatprep.subr.bf16.mxu0 (!%p154_p3), %v1022_v2 }
   0xf   : > { %s1264_s14 = smov (!%p181_p4, %s1012_s14), 1  ;;  %915 = vmatpush3.bf16.msra.mxu1 %v982_v5 }
  0x10   : > { %s948_s27 = smul.u32 20, %s1264_s14  ;;  %916 = vmatprep.subr.bf16.mxu1 %v1022_v2  ;;  %s879_s5 = sshll.u32 %s1264_s14, 2 }
  0x11   : > { %905 = vmatpush3.bf16.msra.mxu0 %v981_v6  ;;  %s194_s8 = scalar_lea.vmem %s1258_s3, %s879_s5 }
  0x12   : > { %s1098_s30 = scalar_lea.vmem %s1255_s0, %s948_s27  ;;  %906 = vmatprep.subr.bf16.mxu0 %v1022_v2 }
  0x13   : > { %917 = vmatpush3.bf16.msra.mxu1 %v985_v7  ;;  %v984_v10 = vld [vmem:[%s1098_s30] sm:$0xff]   ;;  %v993_v20 = vld [vmem:[%s1098_s30 + $0x8] sm:$0xff]  }
  0x14   : > { %918 = vmatprep.subr.bf16.mxu1 %v1022_v2  ;;  %v988_v12 = vld [vmem:[%s1098_s30 + $0x4] sm:$0xff]   ;;  %v997_v21 = vld [vmem:[%s1098_s30 + $0xc] sm:$0xff]   ;;  %s1025_s30 = smov 127  }
  0x15   : > { %907 = vmatpush3.bf16.msra.mxu0 %v983_v8 }
  0x16   : > { %924 = vmatprep.subr.bf16.mxu0 %v1022_v2 }
  0x17   : > { %919 = vmatpush3.bf16.msra.mxu1 %v986_v9 }
  0x18   : > { %909 = vmatmul.mubr.msk.bf16.vlgmr.msra.gmra.mrb[0].mxu0 %vm245_vm1, %v984_v10  ;;  %936 = vmatprep.subr.bf16.mxu1 %v1022_v2 }
  0x19   : > { %925 = vmatpush3.bf16.msra.mxu0 %v987_v11  ;;  %932 = vmatprep.mubr.msk.bf16.mxu0 %vm1023_vm0, %v1022_v2  ;;  %v323_v11 = vld [vmem:[#allocation2 + $0x2] sm:$0x3] }
  0x1a   : > { %921 = vmatmul.mubr.msk.bf16.vlgmr.msra.gmra.mrb[0].mxu1 %vm245_vm1, %v988_v12  ;;  %926 = vmatprep.subr.bf16.mxu0 %v1022_v2 }
  0x1b   : > { %937 = vmatpush3.bf16.msra.mxu1 %v992_v13  ;;  %944 = vmatprep.mubr.msk.bf16.mxu1 %vm1023_vm0, %v1022_v2 }
  0x1c   : > { %938 = vmatprep.subr.bf16.mxu1 %v1022_v2 }
  0x1d   : > { %927 = vmatpush3.bf16.msra.mxu0 %v989_v14 }
  0x1e   : > { %928 = vmatprep.subr.bf16.mxu0 %v1022_v2 }
  0x1f   : > { %939 = vmatpush3.bf16.msra.mxu1 %v994_v15 }
  0x20   : > { %940 = vmatprep.subr.bf16.mxu1 %v1022_v2 }
  0x21   : > { %929 = vmatpush3.bf16.msra.mxu0 %v990_v16 }
  0x22   : > { %930 = vmatprep.subr.bf16.mxu0 %v1022_v2 }
  0x23   : > { %941 = vmatpush3.bf16.msra.mxu1 %v995_v17 }
  0x24   : > { %942 = vmatprep.subr.bf16.mxu1 %v1022_v2  ;;  %v322_v2 = vld [vmem:[#allocation2] sm:$0x3] }
  0x25   : > { %931 = vmatpush3.bf16.msra.mxu0 %v991_v18 }
  0x27   : > { %943 = vmatpush3.bf16.msra.mxu1 %v996_v19 }
  0x28   : > { %933 = vmatmul.mubr.msk.bf16.vlgmr.msra.gmra.mrb[4].mxu0 %vm245_vm1, %v993_v20 }
  0x2a   : > { %945 = vmatmul.mubr.msk.bf16.vlgmr.msra.gmra.mrb[4].mxu1 %vm245_vm1, %v997_v21 }
  0xeb   : > { %v1160_v22 = vpop.f32.mrb[0].mxu0 }
  0xec   : > { %v910_v23 = vpop.f32.mrb[1].mxu0  ;;  %v302_v24 = vrot.slane %v1160_v22, 2  ;;  %v292_v25 = vrot.slane %v1160_v22, 1  ;;  %v312_v31 = vrot.slane %v1160_v22, 3 }
  0xed   : > { %v1164_v26 = vpop.f32.mrb[2].mxu0  ;;  %v1166_v27 = vpop.f32.mrb[0].mxu1 }
  0xee   : > { %304 = vrot.lane.b32.xlu1 %v302_v24, %s1024_s29  ;;  %294 = vrot.lane.b32.xlu0 %v292_v25, %s1025_s30  ;;  %v911_v28 = vpop.f32.mrb[3].mxu0  ;;  %v922_v29 = vpop.f32.mrb[1].mxu1  ;;  %v303_v32 = vrot.slane %v1164_v26, 2  ;;  %v313_v34 = vrot.slane %v1164_v26, 3  ;;  %v293_v35 = vrot.slane %v1164_v26, 1  ;;  %v420_v37 = vrot.slane %v1166_v27, 1 }
  0xef   : > { %v1170_v30 = vpop.f32.mrb[2].mxu1  ;;  %v430_v40 = vrot.slane %v1166_v27, 2  ;;  %v440_v48 = vrot.slane %v1166_v27, 3 }
  0xf0   : > { %v923_v33 = vpop.f32.mrb[3].mxu1  ;;  %v421_v36 = vrot.slane %v1170_v30, 1  ;;  %v431_v39 = vrot.slane %v1170_v30, 2  ;;  %v441_v47 = vrot.slane %v1170_v30, 3 }
  0xf2   : > { %314 = vrot.lane.b32.xlu0 %v312_v31, %s1026_s4  ;;  %306 = vrot.lane.b32.xlu1 %v303_v32, %s1024_s29 }
  0xf6   : > { %316 = vrot.lane.b32.xlu1 %v313_v34, %s1026_s4  ;;  %296 = vrot.lane.b32.xlu0 %v293_v35, %s1025_s30 }
  0xfa   : > { %424 = vrot.lane.b32.xlu1 %v421_v36, %s1025_s30  ;;  %422 = vrot.lane.b32.xlu0 %v420_v37, %s1025_s30 }
  0xfb   : > { %v1184_v38 = vpop.f32.mrb[4].mxu0 }
  0xfc   : > { %v934_v41 = vpop.f32.mrb[5].mxu0  ;;  %v548_v50 = vrot.slane %v1184_v38, 1  ;;  %v558_v52 = vrot.slane %v1184_v38, 2  ;;  %v568_v54 = vrot.slane %v1184_v38, 3 }
  0xfd   : > { %v1188_v42 = vpop.f32.mrb[6].mxu0  ;;  %v1190_v43 = vpop.f32.mrb[4].mxu1 }
  0xfe   : > { %434 = vrot.lane.b32.xlu1 %v431_v39, %s1024_s29  ;;  %432 = vrot.lane.b32.xlu0 %v430_v40, %s1024_s29  ;;  %v935_v44 = vpop.f32.mrb[7].mxu0  ;;  %v946_v45 = vpop.f32.mrb[5].mxu1  ;;  %v549_v51 = vrot.slane %v1188_v42, 1  ;;  %v559_v53 = vrot.slane %v1188_v42, 2  ;;  %v569_v55 = vrot.slane %v1188_v42, 3  ;;  %v676_v56 = vrot.slane %v1190_v43, 1 }
  0xff   : > { %v1194_v46 = vpop.f32.mrb[6].mxu1  ;;  %v686_v58 = vrot.slane %v1190_v43, 2  ;;  %v696_v60 = vrot.slane %v1190_v43, 3 }
 0x100   : > { %v947_v49 = vpop.f32.mrb[7].mxu1  ;;  %v677_v57 = vrot.slane %v1194_v46, 1  ;;  %v687_v59 = vrot.slane %v1194_v46, 2  ;;  %v697_v61 = vrot.slane %v1194_v46, 3 }
 0x102   : > { %444 = vrot.lane.b32.xlu1 %v441_v47, %s1026_s4  ;;  %442 = vrot.lane.b32.xlu0 %v440_v48, %s1026_s4 }
 0x106   : > { %550 = vrot.lane.b32.xlu0 %v548_v50, %s1025_s30  ;;  %552 = vrot.lane.b32.xlu1 %v549_v51, %s1025_s30 }
 0x10a   : > { %560 = vrot.lane.b32.xlu0 %v558_v52, %s1024_s29  ;;  %562 = vrot.lane.b32.xlu1 %v559_v53, %s1024_s29 }
 0x10e   : > { %570 = vrot.lane.b32.xlu0 %v568_v54, %s1026_s4  ;;  %572 = vrot.lane.b32.xlu1 %v569_v55, %s1026_s4 }
 0x112   : > { %678 = vrot.lane.b32.xlu0 %v676_v56, %s1025_s30  ;;  %680 = vrot.lane.b32.xlu1 %v677_v57, %s1025_s30 }
 0x116   : > { %688 = vrot.lane.b32.xlu0 %v686_v58, %s1024_s29  ;;  %690 = vrot.lane.b32.xlu1 %v687_v59, %s1024_s29 }
 0x11a   : > { %698 = vrot.lane.b32.xlu0 %v696_v60, %s1026_s4  ;;  %700 = vrot.lane.b32.xlu1 %v697_v61, %s1026_s4 }
 0x160   : > { %v305_v62 = vpop.permute.xlu1 %304  ;;  %v295_v63 = vpop.permute.xlu0 %294 }
 0x161   : > { %v300_v0 = vadd.f32 %v295_v63, %v1160_v22 }
 0x163   : > { %v310_v1 = vadd.f32 %v305_v62, %v300_v0  ;;  %v876_v0 = vld [vmem:[#allocation3] ss:$0 sm:$0xff] }
 0x164   : > { %v315_v3 = vpop.permute.xlu0 %314  ;;  %v307_v4 = vpop.permute.xlu1 %306 }
 0x165   : > { %v320_v5 = vadd.f32 %v315_v3, %v310_v1 }
 0x167   : > { %v324_v6 = vadd.f32 %v322_v2, %v320_v5 }
 0x168   : > { %v317_v7 = vpop.permute.xlu1 %316  ;;  %v297_v8 = vpop.permute.xlu0 %296 }
 0x169   : > { %326 = vst.msk [vmem:[#allocation2] sm:$0x3] %vm198_vm2, %v324_v6  ;;  %v301_v9 = vadd.f32 %v297_v8, %v1164_v26 }
 0x16b   : > { %v311_v10 = vadd.f32 %v307_v4, %v301_v9 }
 0x16c   : > { %v425_v12 = vpop.permute.xlu1 %424  ;;  %v423_v13 = vpop.permute.xlu0 %422 }
 0x16d   : > { %v321_v14 = vadd.f32 %v317_v7, %v311_v10  ;;  %v428_v18 = vadd.f32 %v423_v13, %v1166_v27  ;;  %v429_v19 = vadd.f32 %v425_v12, %v1170_v30 }
 0x16f   : > { %v325_v15 = vadd.f32 %v323_v11, %v321_v14 }
 0x170   : > { %v435_v16 = vpop.permute.xlu1 %434  ;;  %v433_v17 = vpop.permute.xlu0 %432  ;;  %v450_v25 = vld [vmem:[#allocation2] sm:$0x3] }
 0x171   : > { %327 = vst.msk [vmem:[#allocation2 + $0x2] sm:$0x3] %vm198_vm2, %v325_v15  ;;  %v438_v20 = vadd.f32 %v433_v17, %v428_v18  ;;  %v439_v23 = vadd.f32 %v435_v16, %v429_v19 }
 0x174   : > { %v445_v21 = vpop.permute.xlu1 %444  ;;  %v443_v22 = vpop.permute.xlu0 %442 }
 0x175   : > { %v448_v24 = vadd.f32 %v443_v22, %v438_v20  ;;  %v449_v26 = vadd.f32 %v445_v21, %v439_v23 }
 0x177   : > { %v452_v28 = vadd.f32 %v450_v25, %v448_v24 }
 0x178   : > { %v451_v29 = vld [vmem:[#allocation2 + $0x2] sm:$0x3]  ;;  %v551_v31 = vpop.permute.xlu0 %550  ;;  %v553_v32 = vpop.permute.xlu1 %552 }
 0x179   : > { %v453_v33 = vadd.f32 %v451_v29, %v449_v26  ;;  %454 = vst.msk [vmem:[#allocation2] sm:$0x3] %vm198_vm2, %v452_v28  ;;  %v556_v30 = vadd.f32 %v551_v31, %v1184_v38  ;;  %v557_v35 = vadd.f32 %v553_v32, %v1188_v42 }
 0x17b   : > { %455 = vst.msk [vmem:[#allocation2 + $0x2] sm:$0x3] %vm198_vm2, %v453_v33 }
 0x17c   : > { %v561_v34 = vpop.permute.xlu0 %560  ;;  %v563_v27 = vpop.permute.xlu1 %562 }
 0x17d   : > { %v566_v36 = vadd.f32 %v561_v34, %v556_v30  ;;  %v567_v37 = vadd.f32 %v563_v27, %v557_v35 }
 0x180   : > { %v571_v39 = vpop.permute.xlu0 %570  ;;  %v573_v40 = vpop.permute.xlu1 %572  ;;  %v578_v45 = vld [vmem:[#allocation2] sm:$0x3] }
 0x181   : > { %v576_v41 = vadd.f32 %v571_v39, %v566_v36  ;;  %v577_v44 = vadd.f32 %v573_v40, %v567_v37 }
 0x182   : > { %v579_v47 = vld [vmem:[#allocation2 + $0x2] sm:$0x3] }
 0x183   : > { %v580_v48 = vadd.f32 %v578_v45, %v576_v41  ;;  %v581_v49 = vadd.f32 %v579_v47, %v577_v44 }
 0x184   : > { %v679_v50 = vpop.permute.xlu0 %678  ;;  %v681_v51 = vpop.permute.xlu1 %680 }
 0x185   : > { %582 = vst.msk [vmem:[#allocation2] sm:$0x3] %vm198_vm2, %v580_v48  ;;  %583 = vst.msk [vmem:[#allocation2 + $0x2] sm:$0x3] %vm198_vm2, %v581_v49  ;;  %v684_v42 = vadd.f32 %v679_v50, %v1190_v43  ;;  %v685_v53 = vadd.f32 %v681_v51, %v1194_v46 }
 0x188   : > { %v689_v52 = vpop.permute.xlu0 %688  ;;  %v691_v38 = vpop.permute.xlu1 %690 }
 0x189   : > { %v694_v54 = vadd.f32 %v689_v52, %v684_v42  ;;  %v695_v55 = vadd.f32 %v691_v38, %v685_v53 }
 0x18c   : > { %v699_v56 = vpop.permute.xlu0 %698  ;;  %v701_v57 = vpop.permute.xlu1 %700  ;;  %v706_v60 = vld [vmem:[#allocation2] sm:$0x3]  ;;  %v707_v61 = vld [vmem:[#allocation2 + $0x2] sm:$0x3] }
 0x18d   : > { %v704_v58 = vadd.f32 %v699_v56, %v694_v54  ;;  %v705_v59 = vadd.f32 %v701_v57, %v695_v55 }
 0x18f   : > { %v708_v62 = vadd.f32 %v706_v60, %v704_v58  ;;  %v709_v63 = vadd.f32 %v707_v61, %v705_v59 }
 0x191   : > { %710 = vst.msk [vmem:[#allocation2] sm:$0x3] %vm198_vm2, %v708_v62  ;;  %711 = vst.msk [vmem:[#allocation2 + $0x2] sm:$0x3] %vm198_vm2, %v709_v63 }
 0x198   : > { %v712_v43 = vld [vmem:[#allocation2] sm:$0x3]  ;;  %v713_v46 = vld [vmem:[#allocation2 + $0x2] sm:$0x3] }
 0x199   : > { %v721_v1 = vadd.f32 %v876_v0, %v712_v43  ;;  %v722_v2 = vadd.f32 %v876_v0, %v713_v46 }
 0x19b   : > { %723 = vst.msk [vmem:[%s194_s8] sm:$0x3] %vm198_vm2, %v721_v1  ;;  %724 = vst.msk [vmem:[%s194_s8 + $0x2] sm:$0x3] %vm198_vm2, %v722_v2 }
 0x19c PF: > { %s15_s16 = sadd.s32 1, %s1020_s16   ;;  %s1259_s14 = smov %s1016_s15 }
 0x19d   : > { %p12_p5 = scmp.ge.s32.totalorder %s15_s16, 4   ;;  %s1260_s15 = smov %s1262_s2 }
 0x19f   :  { %14 = sbr.rel (!%p12_p5) target bundleno = 3 (0x3), region = 69 }

</bundles_post_ra>
